<compile_context>
chip_gen: v6e
topology: v6e:2x2x1
jax: 0.10.0
libtpu: 0.0.40
codegen_flags: <defaults>
</compile_context>

<pallas_src>
import functools

import jax
import jax.numpy as jnp
import numpy as np
from jax.experimental import pallas as pl
from jax.experimental.pallas import tpu as pltpu


_DILATIONS = (2, 4, 6)   # dilated-branch dilations (branch 1 is the 1x1 conv)
_PAD = 6                 # max spatial halo = max dilation
_PADL = 16               # left/W halo over-allocated to 16 so interior slab writes are
                         # sublane-aligned for bf16 (16, 128) tiling; columns below
                         # _PADL - _PAD are never read and never need zeroing.


# ----------------------------- kernel -------------------------------------------


def _aspp3d_kernel(x_ref, w1_ref, wd_ref, wf_ref, o_ref, xpad_ref, cat_ref,
                   *, H, W, dilations):
    """Fused ASPP3D for one (batch, time) slice.

    x_ref   : (1, H, W, Cin)              bf16 input slice
    w1_ref  : (Cin, mid)                  bf16 1x1-branch weight
    wd_ref  : (3, 9*Cin, mid)             bf16 dilated-branch weights, im2col rows in
                                          (ky, kx, Cin) order
    wf_ref  : (9*Cm, Cout_pad)            bf16 final (1,3,3) conv weight, im2col rows
                                          in (ky, kx, Cm) order, Cout zero-padded
    o_ref   : (1, H*W, Cout_pad)          f32 output (lane-dense, padding sliced off
                                          in the wrapper)
    xpad_ref: (H+2*PAD, W+PADL+PAD, Cin)  bf16 VMEM scratch, zero-halo'd input slab
    cat_ref : (H+2, W+PADL+1, Cm)         bf16 VMEM scratch, zero-halo'd branch concat
    """
    Cin = x_ref.shape[-1]
    Cm = cat_ref.shape[-1]
    HW = H * W

    # ---- stage 0: refresh only the halo strips, overwrite the interior ----------
    # Only columns [c0, c1) are ever read by the shifted windows, so nothing outside
    # that band needs to be valid.  Re-zeroed every grid step (megacore-safe): under
    # "parallel" semantics each TensorCore owns its own scratch and only one core
    # ever executes program_id(0) == 0.
    zx = lambda s: jnp.zeros(s, xpad_ref.dtype)
    c0, c1 = _PADL - _PAD, _PADL + W + _PAD
    xpad_ref[0:_PAD, c0:c1, :] = zx((_PAD, c1 - c0, Cin))
    xpad_ref[_PAD + H:_PAD + H + _PAD, c0:c1, :] = zx((_PAD, c1 - c0, Cin))
    xpad_ref[_PAD:_PAD + H, c0:_PADL, :] = zx((H, _PAD, Cin))
    xpad_ref[_PAD:_PAD + H, _PADL + W:c1, :] = zx((H, _PAD, Cin))
    xpad_ref[_PAD:_PAD + H, _PADL:_PADL + W, :] = x_ref[0]          # already bf16

    def window(ref, r0, k0, ch):
        # (H, W, ch) shifted window -> (H*W, ch) bf16 MXU operand (no cast needed:
        # both slabs are stored in bf16).
        return ref[r0:r0 + H, k0:k0 + W, :].reshape(HW, ch)

    # ---- stage 1: four dense matmuls (1x1 branch + three 9-tap im2col dilated convs)
    center = window(xpad_ref, _PAD, _PADL, Cin)
    parts = [jnp.dot(center, w1_ref[...], preferred_element_type=jnp.float32)]
    for bi, d in enumerate(dilations):
        cols = [center if (ky == 1 and kx == 1) else
                window(xpad_ref, _PAD + (ky - 1) * d, _PADL + (kx - 1) * d, Cin)
                for ky in range(3) for kx in range(3)]
        xim = jnp.concatenate(cols, axis=-1)                         # (HW, 9*Cin)
        parts.append(jnp.dot(xim, wd_ref[bi], preferred_element_type=jnp.float32))
    cat = jnp.maximum(jnp.concatenate(parts, axis=-1), 0.0)          # (HW, Cm) f32

    # ---- stage 2: ReLU'd concat stays in VMEM (bf16, 1-pixel halo; never hits HBM)
    zc = lambda s: jnp.zeros(s, cat_ref.dtype)
    d0, d1 = _PADL - 1, _PADL + W + 1
    cat_ref[0:1, d0:d1, :] = zc((1, d1 - d0, Cm))
    cat_ref[1 + H:2 + H, d0:d1, :] = zc((1, d1 - d0, Cm))
    cat_ref[1:1 + H, d0:_PADL, :] = zc((H, 1, Cm))
    cat_ref[1:1 + H, _PADL + W:d1, :] = zc((H, 1, Cm))
    cat_ref[1:1 + H, _PADL:_PADL + W, :] = (
        cat.reshape(H, W, Cm).astype(cat_ref.dtype))

    # ---- stage 3: final (1,3,3) conv (pad 1) as one im2col matmul + ReLU ---------
    cols = [window(cat_ref, ky, _PADL - 1 + kx, Cm)
            for ky in range(3) for kx in range(3)]
    cim = jnp.concatenate(cols, axis=-1)                             # (HW, 9*Cm)
    out = jnp.dot(cim, wf_ref[...], preferred_element_type=jnp.float32)
    o_ref[0] = jnp.maximum(out, 0.0)


# ----------------------------- wrapper -------------------------------------------


def _round_up(x, m):
    return (x + m - 1) // m * m


def _pack_weights(params, cout_pad):
    """Pack the module's weights into the kernel's dense bf16 im2col layout."""
    w1 = params["aspp1_w"]          # (Cin, mid)                -- aspp1 1x1 conv
    wd = params["aspp_dil_w"]       # (3, 3, 3, Cin, mid): (branch, ky, kx, Cin, mid)
    wf = params["final_w"]          # (3, 3, 4*mid, Cout)
    Cin, mid = w1.shape
    Cm = 4 * mid
    Cout = wf.shape[-1]
    w_dil = wd.reshape(3, 9 * Cin, mid)                  # rows in (ky, kx, Cin) order
    w_fin = jnp.pad(wf.reshape(9 * Cm, Cout),            # rows in (ky, kx, Cm) order
                    ((0, 0), (0, cout_pad - Cout)))      # zero-padded output columns
    cast = lambda a: a.astype(jnp.bfloat16)
    return cast(w1), cast(w_dil), cast(w_fin)


def _vmem_limit_bytes(H, W, Cin, Cm, Cout_pad, mid):
    """Actual VMEM need (scratch + double-buffered blocks + working buffers) with
    headroom, capped below the physical per-core VMEM of the current generation."""
    xpad = (H + 2 * _PAD) * (W + _PADL + _PAD) * Cin * 2
    cat = (H + 2) * (W + _PADL + 1) * Cm * 2
    blocks = 2 * (H * W * Cin * 2 + H * W * Cout_pad * 4)                   # in/out
    blocks += 2 * (Cin * mid + 3 * 9 * Cin * mid + 9 * Cm * Cout_pad) * 2   # weights
    work = H * W * (9 * Cin + 9 * Cm) * 2 + H * W * (Cm + Cout_pad) * 4     # im2col + f32
    need = 2 * (xpad + cat + blocks + work) + (8 << 20)
    try:
        cap = int(getattr(pltpu.get_tpu_info(), "vmem_capacity_bytes", 0)) or (64 << 20)
    except Exception:
        cap = 64 << 20       # conservative: v7x per-TC size
    return int(min(max(need, 32 << 20), int(cap * 0.85)))


def aspp3d_forward(x_ncdhw, params):
    """ASPP3D forward: (B, Cin, T, H, W) -> (B, Cout, T, H, W), f32."""
    B, Cin, T, H, W = x_ncdhw.shape
    mid = params["aspp1_w"].shape[-1]
    Cm = 4 * mid
    Cout = params["final_w"].shape[-1]
    Cout_pad = _round_up(Cout, 128)            # lane-dense output stores
    w1, wd, wf = _pack_weights(params, Cout_pad)
    BT = B * T

    # channels-last; (b, t) slices are independent (temporal kernel extent is 1)
    xbt = (jnp.transpose(x_ncdhw, (0, 2, 3, 4, 1))
           .reshape(BT, H, W, Cin)
           .astype(jnp.bfloat16))

    kernel = functools.partial(_aspp3d_kernel, H=H, W=W, dilations=_DILATIONS)
    out = pl.pallas_call(
        kernel,
        out_shape=jax.ShapeDtypeStruct((BT, H * W, Cout_pad), jnp.float32),
        grid_spec=pltpu.PrefetchScalarGridSpec(
            num_scalar_prefetch=0,
            grid=(BT,),
            in_specs=[
                pl.BlockSpec((1, H, W, Cin), lambda i: (i, 0, 0, 0)),
                pl.BlockSpec((Cin, mid), lambda i: (0, 0)),
                pl.BlockSpec((3, 9 * Cin, mid), lambda i: (0, 0, 0)),
                pl.BlockSpec((9 * Cm, Cout_pad), lambda i: (0, 0)),
            ],
            out_specs=pl.BlockSpec((1, H * W, Cout_pad), lambda i: (i, 0, 0)),
            scratch_shapes=[
                pltpu.VMEM((H + 2 * _PAD, W + _PADL + _PAD, Cin), jnp.bfloat16),
                pltpu.VMEM((H + 2, W + _PADL + 1, Cm), jnp.bfloat16),
            ],
        ),
        compiler_params=pltpu.CompilerParams(
            dimension_semantics=("parallel",),
            vmem_limit_bytes=_vmem_limit_bytes(H, W, Cin, Cm, Cout_pad, mid),
        ),
    )(xbt, w1, wd, wf)

    out = out[:, :, :Cout]
    return jnp.transpose(out.reshape(B, T, H, W, Cout), (0, 4, 1, 2, 3))


# ----------------------------- params & reference --------------------------------


def init_aspp3d_params(key, in_plane, out_plane, reduction=4):
    """Synthetic weights with the shapes ASPP3D.__init__ implies (all conv bias=False)."""
    mid = out_plane // reduction
    k1, k2, k3 = jax.random.split(key, 3)
    s = 0.1
    return {
        "aspp1_w":    jax.random.normal(k1, (in_plane, mid), jnp.float32) * s,
        "aspp_dil_w": jax.random.normal(k2, (3, 3, 3, in_plane, mid), jnp.float32) * s,
        "final_w":    jax.random.normal(k3, (3, 3, 4 * mid, out_plane), jnp.float32) * s,
    }


def _conv33_ref(x, w33, d, precision):
    # x: (N, H, W, Ci), w33: (3, 3, Ci, Co), dilation d, 'same' zero padding d
    N, H, W, _ = x.shape
    xp = jnp.pad(x, ((0, 0), (d, d), (d, d), (0, 0)))
    out = None
    for ky in range(3):
        for kx in range(3):
            xt = xp[:, ky * d:ky * d + H, kx * d:kx * d + W, :]
            p = jnp.einsum("nhwc,co->nhwo", xt, w33[ky, kx], precision=precision)
            out = p if out is None else out + p
    return out


def aspp3d_reference(x_ncdhw, params):
    """Pure-JAX reference (mirrors the kernel's bf16 operand rounding)."""
    hp = jax.lax.Precision.HIGHEST
    q = lambda a: a.astype(jnp.bfloat16).astype(jnp.float32)
    B, Cin, T, H, W = x_ncdhw.shape
    x = q(jnp.transpose(x_ncdhw, (0, 2, 3, 4, 1)).reshape(B * T, H, W, Cin))
    w1, wd, wf = params["aspp1_w"], params["aspp_dil_w"], params["final_w"]
    branches = [jax.nn.relu(jnp.einsum("nhwc,co->nhwo", x, q(w1), precision=hp))]
    for bi, d in enumerate(_DILATIONS):
        branches.append(jax.nn.relu(_conv33_ref(x, q(wd[bi]), d, hp)))
    cat = q(jnp.concatenate(branches, axis=-1))
    out = jax.nn.relu(_conv33_ref(cat, q(wf), 1, hp))
    Cout = out.shape[-1]
    return jnp.transpose(out.reshape(B, T, H, W, Cout), (0, 4, 1, 2, 3))


if __name__ == "__main__":
    key = jax.random.PRNGKey(0)
    kx, kp = jax.random.split(key)
    # ASPP3D(in_plane=16, out_plane=16, reduction=4): mid_plane = 4
    B, Cin, T, H, W = 2, 16, 2, 8, 8
    Cout = 16
    x = jax.random.normal(kx, (B, Cin, T, H, W), jnp.float32)
    params = init_aspp3d_params(kp, Cin, Cout)

    y = jax.jit(aspp3d_forward)(x, params)
    jax.block_until_ready(y)
    assert y.shape == (B, Cout, T, H, W) and y.dtype == jnp.float32

    y_ref = jax.jit(aspp3d_reference)(x, params)
    np.testing.assert_allclose(np.asarray(y), np.asarray(y_ref), rtol=1e-2, atol=1e-2)
    print("KERNEL_OK")
</pallas_src>

<mosaic_0001>
module attributes {stable_mosaic.version = 11 : i64} {
  func.func @_aspp3d_kernel(%arg0: i32, %arg1: memref<1x8x8x16xbf16, #tpu.memory_space<vmem>>, %arg2: memref<16x4xbf16, #tpu.memory_space<vmem>>, %arg3: memref<3x144x4xbf16, #tpu.memory_space<vmem>>, %arg4: memref<144x128xbf16, #tpu.memory_space<vmem>>, %arg5: memref<1x64x128xf32, #tpu.memory_space<vmem>>, %arg6: memref<20x30x16xbf16, #tpu.memory_space<vmem>>, %arg7: memref<10x25x16xbf16, #tpu.memory_space<vmem>>) attributes {dimension_semantics = [#tpu.dimension_semantics<parallel>], iteration_bounds = array<i64: 4>, scalar_prefetch = 0 : i64, scratch_operands = 2 : i64, tpu.core_type = #tpu.core_type<tc>, window_params = [{transform_indices = @transform_0, window_bounds = array<i64: 1, 8, 8, 16>}, {pipeline_mode = #tpu.pipeline_mode<synchronous>, transform_indices = @transform_1, window_bounds = array<i64: 16, 4>}, {pipeline_mode = #tpu.pipeline_mode<synchronous>, transform_indices = @transform_2, window_bounds = array<i64: 3, 144, 4>}, {pipeline_mode = #tpu.pipeline_mode<synchronous>, transform_indices = @transform_3, window_bounds = array<i64: 144, 128>}, {transform_indices = @transform_4, window_bounds = array<i64: 1, 64, 128>}]} {
    %cst = arith.constant 0.000000e+00 : bf16
    %0 = vector.broadcast %cst : bf16 to vector<6x20x16xbf16>
    %c0 = arith.constant 0 : index
    %c10 = arith.constant 10 : index
    %c0_0 = arith.constant 0 : index
    %1 = vector.load %arg6[%c0, %c10, %c0_0] : memref<20x30x16xbf16, #tpu.memory_space<vmem>>, vector<6x20x16xbf16>
    tpu.vector_store %arg6[%c0, %c10, %c0_0], %0 {strides = array<i32>} : memref<20x30x16xbf16, #tpu.memory_space<vmem>>, vector<6x20x16xbf16>,
    %cst_1 = arith.constant 0.000000e+00 : bf16
    %2 = vector.broadcast %cst_1 : bf16 to vector<6x20x16xbf16>
    %c14 = arith.constant 14 : index
    %c10_2 = arith.constant 10 : index
    %c0_3 = arith.constant 0 : index
    %3 = vector.load %arg6[%c14, %c10_2, %c0_3] : memref<20x30x16xbf16, #tpu.memory_space<vmem>>, vector<6x20x16xbf16>
    tpu.vector_store %arg6[%c14, %c10_2, %c0_3], %2 {strides = array<i32>} : memref<20x30x16xbf16, #tpu.memory_space<vmem>>, vector<6x20x16xbf16>,
    %cst_4 = arith.constant 0.000000e+00 : bf16
    %4 = vector.broadcast %cst_4 : bf16 to vector<8x6x16xbf16>
    %c6 = arith.constant 6 : index
    %c10_5 = arith.constant 10 : index
    %c0_6 = arith.constant 0 : index
    %5 = vector.load %arg6[%c6, %c10_5, %c0_6] : memref<20x30x16xbf16, #tpu.memory_space<vmem>>, vector<8x6x16xbf16>
    tpu.vector_store %arg6[%c6, %c10_5, %c0_6], %4 {strides = array<i32>} : memref<20x30x16xbf16, #tpu.memory_space<vmem>>, vector<8x6x16xbf16>,
    %cst_7 = arith.constant 0.000000e+00 : bf16
    %6 = vector.broadcast %cst_7 : bf16 to vector<8x6x16xbf16>
    %c6_8 = arith.constant 6 : index
    %c24 = arith.constant 24 : index
    %c0_9 = arith.constant 0 : index
    %7 = vector.load %arg6[%c6_8, %c24, %c0_9] : memref<20x30x16xbf16, #tpu.memory_space<vmem>>, vector<8x6x16xbf16>
    tpu.vector_store %arg6[%c6_8, %c24, %c0_9], %6 {strides = array<i32>} : memref<20x30x16xbf16, #tpu.memory_space<vmem>>, vector<8x6x16xbf16>,
    %c0_10 = arith.constant 0 : index
    %c0_11 = arith.constant 0 : index
    %c0_12 = arith.constant 0 : index
    %c0_13 = arith.constant 0 : index
    %8 = vector.load %arg1[%c0_10, %c0_11, %c0_12, %c0_13] : memref<1x8x8x16xbf16, #tpu.memory_space<vmem>>, vector<1x8x8x16xbf16>
    %9 = vector.shape_cast %8 : vector<1x8x8x16xbf16> to vector<8x8x16xbf16>
    %c6_14 = arith.constant 6 : index
    %c16 = arith.constant 16 : index
    %c0_15 = arith.constant 0 : index
    %10 = vector.load %arg6[%c6_14, %c16, %c0_15] : memref<20x30x16xbf16, #tpu.memory_space<vmem>>, vector<8x8x16xbf16>
    tpu.vector_store %arg6[%c6_14, %c16, %c0_15], %9 {strides = array<i32>} : memref<20x30x16xbf16, #tpu.memory_space<vmem>>, vector<8x8x16xbf16>,
    %c6_16 = arith.constant 6 : index
    %c16_17 = arith.constant 16 : index
    %c0_18 = arith.constant 0 : index
    %11 = vector.load %arg6[%c6_16, %c16_17, %c0_18] : memref<20x30x16xbf16, #tpu.memory_space<vmem>>, vector<8x8x16xbf16>
    %12 = vector.shape_cast %11 : vector<8x8x16xbf16> to vector<64x16xbf16>
    %c0_19 = arith.constant 0 : index
    %c0_20 = arith.constant 0 : index
    %13 = vector.load %arg2[%c0_19, %c0_20] : memref<16x4xbf16, #tpu.memory_space<vmem>>, vector<16x4xbf16>
    %cst_21 = arith.constant dense<0.000000e+00> : vector<64x4xf32>
    %14 = tpu.matmul %12, %13, %cst_21 {dimension_numbers = #tpu.dot_dimension_numbers<[1], [0], [0], [1], [0, 0, 1, 1], [], []>} : vector<64x16xbf16>, vector<16x4xbf16>, vector<64x4xf32> -> vector<64x4xf32>
    %c4 = arith.constant 4 : index
    %c14_22 = arith.constant 14 : index
    %c0_23 = arith.constant 0 : index
    %15 = vector.load %arg6[%c4, %c14_22, %c0_23] : memref<20x30x16xbf16, #tpu.memory_space<vmem>>, vector<8x8x16xbf16>
    %16 = vector.shape_cast %15 : vector<8x8x16xbf16> to vector<64x16xbf16>
    %c4_24 = arith.constant 4 : index
    %c16_25 = arith.constant 16 : index
    %c0_26 = arith.constant 0 : index
    %17 = vector.load %arg6[%c4_24, %c16_25, %c0_26] : memref<20x30x16xbf16, #tpu.memory_space<vmem>>, vector<8x8x16xbf16>
    %18 = vector.shape_cast %17 : vector<8x8x16xbf16> to vector<64x16xbf16>
    %c4_27 = arith.constant 4 : index
    %c18 = arith.constant 18 : index
    %c0_28 = arith.constant 0 : index
    %19 = vector.load %arg6[%c4_27, %c18, %c0_28] : memref<20x30x16xbf16, #tpu.memory_space<vmem>>, vector<8x8x16xbf16>
    %20 = vector.shape_cast %19 : vector<8x8x16xbf16> to vector<64x16xbf16>
    %c6_29 = arith.constant 6 : index
    %c14_30 = arith.constant 14 : index
    %c0_31 = arith.constant 0 : index
    %21 = vector.load %arg6[%c6_29, %c14_30, %c0_31] : memref<20x30x16xbf16, #tpu.memory_space<vmem>>, vector<8x8x16xbf16>
    %22 = vector.shape_cast %21 : vector<8x8x16xbf16> to vector<64x16xbf16>
    %c6_32 = arith.constant 6 : index
    %c18_33 = arith.constant 18 : index
    %c0_34 = arith.constant 0 : index
    %23 = vector.load %arg6[%c6_32, %c18_33, %c0_34] : memref<20x30x16xbf16, #tpu.memory_space<vmem>>, vector<8x8x16xbf16>
    %24 = vector.shape_cast %23 : vector<8x8x16xbf16> to vector<64x16xbf16>
    %c8 = arith.constant 8 : index
    %c14_35 = arith.constant 14 : index
    %c0_36 = arith.constant 0 : index
    %25 = vector.load %arg6[%c8, %c14_35, %c0_36] : memref<20x30x16xbf16, #tpu.memory_space<vmem>>, vector<8x8x16xbf16>
    %26 = vector.shape_cast %25 : vector<8x8x16xbf16> to vector<64x16xbf16>
    %c8_37 = arith.constant 8 : index
    %c16_38 = arith.constant 16 : index
    %c0_39 = arith.constant 0 : index
    %27 = vector.load %arg6[%c8_37, %c16_38, %c0_39] : memref<20x30x16xbf16, #tpu.memory_space<vmem>>, vector<8x8x16xbf16>
    %28 = vector.shape_cast %27 : vector<8x8x16xbf16> to vector<64x16xbf16>
    %c8_40 = arith.constant 8 : index
    %c18_41 = arith.constant 18 : index
    %c0_42 = arith.constant 0 : index
    %29 = vector.load %arg6[%c8_40, %c18_41, %c0_42] : memref<20x30x16xbf16, #tpu.memory_space<vmem>>, vector<8x8x16xbf16>
    %30 = vector.shape_cast %29 : vector<8x8x16xbf16> to vector<64x16xbf16>
    %31 = tpu.concatenate %16, %18, %20, %22, %12, %24, %26, %28, %30 in 1 : vector<64x16xbf16>, vector<64x16xbf16>, vector<64x16xbf16>, vector<64x16xbf16>, vector<64x16xbf16>, vector<64x16xbf16>, vector<64x16xbf16>, vector<64x16xbf16>, vector<64x16xbf16> -> vector<64x144xbf16>
    %c0_43 = arith.constant 0 : index
    %c0_44 = arith.constant 0 : index
    %c0_45 = arith.constant 0 : index
    %32 = vector.load %arg3[%c0_43, %c0_44, %c0_45] : memref<3x144x4xbf16, #tpu.memory_space<vmem>>, vector<1x144x4xbf16>
    %33 = vector.shape_cast %32 : vector<1x144x4xbf16> to vector<144x4xbf16>
    %cst_46 = arith.constant dense<0.000000e+00> : vector<64x4xf32>
    %34 = tpu.matmul %31, %33, %cst_46 {dimension_numbers = #tpu.dot_dimension_numbers<[1], [0], [0], [1], [0, 0, 1, 1], [], []>} : vector<64x144xbf16>, vector<144x4xbf16>, vector<64x4xf32> -> vector<64x4xf32>
    %c2 = arith.constant 2 : index
    %c12 = arith.constant 12 : index
    %c0_47 = arith.constant 0 : index
    %35 = vector.load %arg6[%c2, %c12, %c0_47] : memref<20x30x16xbf16, #tpu.memory_space<vmem>>, vector<8x8x16xbf16>
    %36 = vector.shape_cast %35 : vector<8x8x16xbf16> to vector<64x16xbf16>
    %c2_48 = arith.constant 2 : index
    %c16_49 = arith.constant 16 : index
    %c0_50 = arith.constant 0 : index
    %37 = vector.load %arg6[%c2_48, %c16_49, %c0_50] : memref<20x30x16xbf16, #tpu.memory_space<vmem>>, vector<8x8x16xbf16>
    %38 = vector.shape_cast %37 : vector<8x8x16xbf16> to vector<64x16xbf16>
    %c2_51 = arith.constant 2 : index
    %c20 = arith.constant 20 : index
    %c0_52 = arith.constant 0 : index
    %39 = vector.load %arg6[%c2_51, %c20, %c0_52] : memref<20x30x16xbf16, #tpu.memory_space<vmem>>, vector<8x8x16xbf16>
    %40 = vector.shape_cast %39 : vector<8x8x16xbf16> to vector<64x16xbf16>
    %c6_53 = arith.constant 6 : index
    %c12_54 = arith.constant 12 : index
    %c0_55 = arith.constant 0 : index
    %41 = vector.load %arg6[%c6_53, %c12_54, %c0_55] : memref<20x30x16xbf16, #tpu.memory_space<vmem>>, vector<8x8x16xbf16>
    %42 = vector.shape_cast %41 : vector<8x8x16xbf16> to vector<64x16xbf16>
    %c6_56 = arith.constant 6 : index
    %c20_57 = arith.constant 20 : index
    %c0_58 = arith.constant 0 : index
    %43 = vector.load %arg6[%c6_56, %c20_57, %c0_58] : memref<20x30x16xbf16, #tpu.memory_space<vmem>>, vector<8x8x16xbf16>
    %44 = vector.shape_cast %43 : vector<8x8x16xbf16> to vector<64x16xbf16>
    %c10_59 = arith.constant 10 : index
    %c12_60 = arith.constant 12 : index
    %c0_61 = arith.constant 0 : index
    %45 = vector.load %arg6[%c10_59, %c12_60, %c0_61] : memref<20x30x16xbf16, #tpu.memory_space<vmem>>, vector<8x8x16xbf16>
    %46 = vector.shape_cast %45 : vector<8x8x16xbf16> to vector<64x16xbf16>
    %c10_62 = arith.constant 10 : index
    %c16_63 = arith.constant 16 : index
    %c0_64 = arith.constant 0 : index
    %47 = vector.load %arg6[%c10_62, %c16_63, %c0_64] : memref<20x30x16xbf16, #tpu.memory_space<vmem>>, vector<8x8x16xbf16>
    %48 = vector.shape_cast %47 : vector<8x8x16xbf16> to vector<64x16xbf16>
    %c10_65 = arith.constant 10 : index
    %c20_66 = arith.constant 20 : index
    %c0_67 = arith.constant 0 : index
    %49 = vector.load %arg6[%c10_65, %c20_66, %c0_67] : memref<20x30x16xbf16, #tpu.memory_space<vmem>>, vector<8x8x16xbf16>
    %50 = vector.shape_cast %49 : vector<8x8x16xbf16> to vector<64x16xbf16>
    %51 = tpu.concatenate %36, %38, %40, %42, %12, %44, %46, %48, %50 in 1 : vector<64x16xbf16>, vector<64x16xbf16>, vector<64x16xbf16>, vector<64x16xbf16>, vector<64x16xbf16>, vector<64x16xbf16>, vector<64x16xbf16>, vector<64x16xbf16>, vector<64x16xbf16> -> vector<64x144xbf16>
    %c1 = arith.constant 1 : index
    %c0_68 = arith.constant 0 : index
    %c0_69 = arith.constant 0 : index
    %52 = vector.load %arg3[%c1, %c0_68, %c0_69] : memref<3x144x4xbf16, #tpu.memory_space<vmem>>, vector<1x144x4xbf16>
    %53 = vector.shape_cast %52 : vector<1x144x4xbf16> to vector<144x4xbf16>
    %cst_70 = arith.constant dense<0.000000e+00> : vector<64x4xf32>
    %54 = tpu.matmul %51, %53, %cst_70 {dimension_numbers = #tpu.dot_dimension_numbers<[1], [0], [0], [1], [0, 0, 1, 1], [], []>} : vector<64x144xbf16>, vector<144x4xbf16>, vector<64x4xf32> -> vector<64x4xf32>
    %c0_71 = arith.constant 0 : index
    %c10_72 = arith.constant 10 : index
    %c0_73 = arith.constant 0 : index
    %55 = vector.load %arg6[%c0_71, %c10_72, %c0_73] : memref<20x30x16xbf16, #tpu.memory_space<vmem>>, vector<8x8x16xbf16>
    %56 = vector.shape_cast %55 : vector<8x8x16xbf16> to vector<64x16xbf16>
    %c0_74 = arith.constant 0 : index
    %c16_75 = arith.constant 16 : index
    %c0_76 = arith.constant 0 : index
    %57 = vector.load %arg6[%c0_74, %c16_75, %c0_76] : memref<20x30x16xbf16, #tpu.memory_space<vmem>>, vector<8x8x16xbf16>
    %58 = vector.shape_cast %57 : vector<8x8x16xbf16> to vector<64x16xbf16>
    %c0_77 = arith.constant 0 : index
    %c22 = arith.constant 22 : index
    %c0_78 = arith.constant 0 : index
    %59 = vector.load %arg6[%c0_77, %c22, %c0_78] : memref<20x30x16xbf16, #tpu.memory_space<vmem>>, vector<8x8x16xbf16>
    %60 = vector.shape_cast %59 : vector<8x8x16xbf16> to vector<64x16xbf16>
    %c6_79 = arith.constant 6 : index
    %c10_80 = arith.constant 10 : index
    %c0_81 = arith.constant 0 : index
    %61 = vector.load %arg6[%c6_79, %c10_80, %c0_81] : memref<20x30x16xbf16, #tpu.memory_space<vmem>>, vector<8x8x16xbf16>
    %62 = vector.shape_cast %61 : vector<8x8x16xbf16> to vector<64x16xbf16>
    %c6_82 = arith.constant 6 : index
    %c22_83 = arith.constant 22 : index
    %c0_84 = arith.constant 0 : index
    %63 = vector.load %arg6[%c6_82, %c22_83, %c0_84] : memref<20x30x16xbf16, #tpu.memory_space<vmem>>, vector<8x8x16xbf16>
    %64 = vector.shape_cast %63 : vector<8x8x16xbf16> to vector<64x16xbf16>
    %c12_85 = arith.constant 12 : index
    %c10_86 = arith.constant 10 : index
    %c0_87 = arith.constant 0 : index
    %65 = vector.load %arg6[%c12_85, %c10_86, %c0_87] : memref<20x30x16xbf16, #tpu.memory_space<vmem>>, vector<8x8x16xbf16>
    %66 = vector.shape_cast %65 : vector<8x8x16xbf16> to vector<64x16xbf16>
    %c12_88 = arith.constant 12 : index
    %c16_89 = arith.constant 16 : index
    %c0_90 = arith.constant 0 : index
    %67 = vector.load %arg6[%c12_88, %c16_89, %c0_90] : memref<20x30x16xbf16, #tpu.memory_space<vmem>>, vector<8x8x16xbf16>
    %68 = vector.shape_cast %67 : vector<8x8x16xbf16> to vector<64x16xbf16>
    %c12_91 = arith.constant 12 : index
    %c22_92 = arith.constant 22 : index
    %c0_93 = arith.constant 0 : index
    %69 = vector.load %arg6[%c12_91, %c22_92, %c0_93] : memref<20x30x16xbf16, #tpu.memory_space<vmem>>, vector<8x8x16xbf16>
    %70 = vector.shape_cast %69 : vector<8x8x16xbf16> to vector<64x16xbf16>
    %71 = tpu.concatenate %56, %58, %60, %62, %12, %64, %66, %68, %70 in 1 : vector<64x16xbf16>, vector<64x16xbf16>, vector<64x16xbf16>, vector<64x16xbf16>, vector<64x16xbf16>, vector<64x16xbf16>, vector<64x16xbf16>, vector<64x16xbf16>, vector<64x16xbf16> -> vector<64x144xbf16>
    %c2_94 = arith.constant 2 : index
    %c0_95 = arith.constant 0 : index
    %c0_96 = arith.constant 0 : index
    %72 = vector.load %arg3[%c2_94, %c0_95, %c0_96] : memref<3x144x4xbf16, #tpu.memory_space<vmem>>, vector<1x144x4xbf16>
    %73 = vector.shape_cast %72 : vector<1x144x4xbf16> to vector<144x4xbf16>
    %cst_97 = arith.constant dense<0.000000e+00> : vector<64x4xf32>
    %74 = tpu.matmul %71, %73, %cst_97 {dimension_numbers = #tpu.dot_dimension_numbers<[1], [0], [0], [1], [0, 0, 1, 1], [], []>} : vector<64x144xbf16>, vector<144x4xbf16>, vector<64x4xf32> -> vector<64x4xf32>
    %75 = tpu.concatenate %14, %34, %54, %74 in 1 : vector<64x4xf32>, vector<64x4xf32>, vector<64x4xf32>, vector<64x4xf32> -> vector<64x16xf32>
    %cst_98 = arith.constant 0.000000e+00 : f32
    %76 = vector.broadcast %cst_98 : f32 to vector<64x16xf32>
    %77 = arith.maximumf %75, %76 : vector<64x16xf32>
    %cst_99 = arith.constant 0.000000e+00 : bf16
    %78 = vector.broadcast %cst_99 : bf16 to vector<1x10x16xbf16>
    %c0_100 = arith.constant 0 : index
    %c15 = arith.constant 15 : index
    %c0_101 = arith.constant 0 : index
    %79 = vector.load %arg7[%c0_100, %c15, %c0_101] : memref<10x25x16xbf16, #tpu.memory_space<vmem>>, vector<1x10x16xbf16>
    tpu.vector_store %arg7[%c0_100, %c15, %c0_101], %78 {strides = array<i32>} : memref<10x25x16xbf16, #tpu.memory_space<vmem>>, vector<1x10x16xbf16>,
    %cst_102 = arith.constant 0.000000e+00 : bf16
    %80 = vector.broadcast %cst_102 : bf16 to vector<1x10x16xbf16>
    %c9 = arith.constant 9 : index
    %c15_103 = arith.constant 15 : index
    %c0_104 = arith.constant 0 : index
    %81 = vector.load %arg7[%c9, %c15_103, %c0_104] : memref<10x25x16xbf16, #tpu.memory_space<vmem>>, vector<1x10x16xbf16>
    tpu.vector_store %arg7[%c9, %c15_103, %c0_104], %80 {strides = array<i32>} : memref<10x25x16xbf16, #tpu.memory_space<vmem>>, vector<1x10x16xbf16>,
    %cst_105 = arith.constant 0.000000e+00 : bf16
    %82 = vector.broadcast %cst_105 : bf16 to vector<8x1x16xbf16>
    %c1_106 = arith.constant 1 : index
    %c15_107 = arith.constant 15 : index
    %c0_108 = arith.constant 0 : index
    %83 = vector.load %arg7[%c1_106, %c15_107, %c0_108] : memref<10x25x16xbf16, #tpu.memory_space<vmem>>, vector<8x1x16xbf16>
    tpu.vector_store %arg7[%c1_106, %c15_107, %c0_108], %82 {strides = array<i32>} : memref<10x25x16xbf16, #tpu.memory_space<vmem>>, vector<8x1x16xbf16>,
    %cst_109 = arith.constant 0.000000e+00 : bf16
    %84 = vector.broadcast %cst_109 : bf16 to vector<8x1x16xbf16>
    %c1_110 = arith.constant 1 : index
    %c24_111 = arith.constant 24 : index
    %c0_112 = arith.constant 0 : index
    %85 = vector.load %arg7[%c1_110, %c24_111, %c0_112] : memref<10x25x16xbf16, #tpu.memory_space<vmem>>, vector<8x1x16xbf16>
    tpu.vector_store %arg7[%c1_110, %c24_111, %c0_112], %84 {strides = array<i32>} : memref<10x25x16xbf16, #tpu.memory_space<vmem>>, vector<8x1x16xbf16>,
    %86 = vector.shape_cast %77 : vector<64x16xf32> to vector<8x8x16xf32>
    %87 = arith.truncf %86 : vector<8x8x16xf32> to vector<8x8x16xbf16>
    %c1_113 = arith.constant 1 : index
    %c16_114 = arith.constant 16 : index
    %c0_115 = arith.constant 0 : index
    %88 = vector.load %arg7[%c1_113, %c16_114, %c0_115] : memref<10x25x16xbf16, #tpu.memory_space<vmem>>, vector<8x8x16xbf16>
    tpu.vector_store %arg7[%c1_113, %c16_114, %c0_115], %87 {strides = array<i32>} : memref<10x25x16xbf16, #tpu.memory_space<vmem>>, vector<8x8x16xbf16>,
    %c0_116 = arith.constant 0 : index
    %c15_117 = arith.constant 15 : index
    %c0_118 = arith.constant 0 : index
    %89 = vector.load %arg7[%c0_116, %c15_117, %c0_118] : memref<10x25x16xbf16, #tpu.memory_space<vmem>>, vector<8x8x16xbf16>
    %90 = vector.shape_cast %89 : vector<8x8x16xbf16> to vector<64x16xbf16>
    %c0_119 = arith.constant 0 : index
    %c16_120 = arith.constant 16 : index
    %c0_121 = arith.constant 0 : index
    %91 = vector.load %arg7[%c0_119, %c16_120, %c0_121] : memref<10x25x16xbf16, #tpu.memory_space<vmem>>, vector<8x8x16xbf16>
    %92 = vector.shape_cast %91 : vector<8x8x16xbf16> to vector<64x16xbf16>
    %c0_122 = arith.constant 0 : index
    %c17 = arith.constant 17 : index
    %c0_123 = arith.constant 0 : index
    %93 = vector.load %arg7[%c0_122, %c17, %c0_123] : memref<10x25x16xbf16, #tpu.memory_space<vmem>>, vector<8x8x16xbf16>
    %94 = vector.shape_cast %93 : vector<8x8x16xbf16> to vector<64x16xbf16>
    %c1_124 = arith.constant 1 : index
    %c15_125 = arith.constant 15 : index
    %c0_126 = arith.constant 0 : index
    %95 = vector.load %arg7[%c1_124, %c15_125, %c0_126] : memref<10x25x16xbf16, #tpu.memory_space<vmem>>, vector<8x8x16xbf16>
    %96 = vector.shape_cast %95 : vector<8x8x16xbf16> to vector<64x16xbf16>
    %c1_127 = arith.constant 1 : index
    %c16_128 = arith.constant 16 : index
    %c0_129 = arith.constant 0 : index
    %97 = vector.load %arg7[%c1_127, %c16_128, %c0_129] : memref<10x25x16xbf16, #tpu.memory_space<vmem>>, vector<8x8x16xbf16>
    %98 = vector.shape_cast %97 : vector<8x8x16xbf16> to vector<64x16xbf16>
    %c1_130 = arith.constant 1 : index
    %c17_131 = arith.constant 17 : index
    %c0_132 = arith.constant 0 : index
    %99 = vector.load %arg7[%c1_130, %c17_131, %c0_132] : memref<10x25x16xbf16, #tpu.memory_space<vmem>>, vector<8x8x16xbf16>
    %100 = vector.shape_cast %99 : vector<8x8x16xbf16> to vector<64x16xbf16>
    %c2_133 = arith.constant 2 : index
    %c15_134 = arith.constant 15 : index
    %c0_135 = arith.constant 0 : index
    %101 = vector.load %arg7[%c2_133, %c15_134, %c0_135] : memref<10x25x16xbf16, #tpu.memory_space<vmem>>, vector<8x8x16xbf16>
    %102 = vector.shape_cast %101 : vector<8x8x16xbf16> to vector<64x16xbf16>
    %c2_136 = arith.constant 2 : index
    %c16_137 = arith.constant 16 : index
    %c0_138 = arith.constant 0 : index
    %103 = vector.load %arg7[%c2_136, %c16_137, %c0_138] : memref<10x25x16xbf16, #tpu.memory_space<vmem>>, vector<8x8x16xbf16>
    %104 = vector.shape_cast %103 : vector<8x8x16xbf16> to vector<64x16xbf16>
    %c2_139 = arith.constant 2 : index
    %c17_140 = arith.constant 17 : index
    %c0_141 = arith.constant 0 : index
    %105 = vector.load %arg7[%c2_139, %c17_140, %c0_141] : memref<10x25x16xbf16, #tpu.memory_space<vmem>>, vector<8x8x16xbf16>
    %106 = vector.shape_cast %105 : vector<8x8x16xbf16> to vector<64x16xbf16>
    %107 = tpu.concatenate %90, %92, %94, %96, %98, %100, %102, %104, %106 in 1 : vector<64x16xbf16>, vector<64x16xbf16>, vector<64x16xbf16>, vector<64x16xbf16>, vector<64x16xbf16>, vector<64x16xbf16>, vector<64x16xbf16>, vector<64x16xbf16>, vector<64x16xbf16> -> vector<64x144xbf16>
    %c0_142 = arith.constant 0 : index
    %c0_143 = arith.constant 0 : index
    %108 = vector.load %arg4[%c0_142, %c0_143] : memref<144x128xbf16, #tpu.memory_space<vmem>>, vector<144x128xbf16>
    %cst_144 = arith.constant dense<0.000000e+00> : vector<64x128xf32>
    %109 = tpu.matmul %107, %108, %cst_144 {dimension_numbers = #tpu.dot_dimension_numbers<[1], [0], [0], [1], [0, 0, 1, 1], [], []>} : vector<64x144xbf16>, vector<144x128xbf16>, vector<64x128xf32> -> vector<64x128xf32>
    %cst_145 = arith.constant 0.000000e+00 : f32
    %110 = vector.broadcast %cst_145 : f32 to vector<64x128xf32>
    %111 = arith.maximumf %109, %110 : vector<64x128xf32>
    %c0_146 = arith.constant 0 : index
    %c0_147 = arith.constant 0 : index
    %c0_148 = arith.constant 0 : index
    %112 = vector.load %arg5[%c0_146, %c0_147, %c0_148] : memref<1x64x128xf32, #tpu.memory_space<vmem>>, vector<1x64x128xf32>
    %113 = vector.shape_cast %112 : vector<1x64x128xf32> to vector<64x128xf32>
    %114 = vector.shape_cast %111 : vector<64x128xf32> to vector<1x64x128xf32>
    tpu.vector_store %arg5[%c0_146, %c0_147, %c0_148], %114 {strides = array<i32>} : memref<1x64x128xf32, #tpu.memory_space<vmem>>, vector<1x64x128xf32>,
    return
  }
  func.func @transform_0(%arg0: i32) -> (i32, i32, i32, i32) {
    %c0_i32 = arith.constant 0 : i32
    %c0_i32_0 = arith.constant 0 : i32
    %c0_i32_1 = arith.constant 0 : i32
    %c0_i32_2 = arith.constant 0 : i32
    return %arg0, %c0_i32, %c0_i32_0, %c0_i32_1 : i32, i32, i32, i32
  }
  func.func @transform_1(%arg0: i32) -> (i32, i32) {
    %c0_i32 = arith.constant 0 : i32
    %c0_i32_0 = arith.constant 0 : i32
    %c0_i32_1 = arith.constant 0 : i32
    return %c0_i32, %c0_i32_0 : i32, i32
  }
  func.func @transform_2(%arg0: i32) -> (i32, i32, i32) {
    %c0_i32 = arith.constant 0 : i32
    %c0_i32_0 = arith.constant 0 : i32
    %c0_i32_1 = arith.constant 0 : i32
    %c0_i32_2 = arith.constant 0 : i32
    return %c0_i32, %c0_i32_0, %c0_i32_1 : i32, i32, i32
  }
  func.func @transform_3(%arg0: i32) -> (i32, i32) {
    %c0_i32 = arith.constant 0 : i32
    %c0_i32_0 = arith.constant 0 : i32
    %c0_i32_1 = arith.constant 0 : i32
    return %c0_i32, %c0_i32_0 : i32, i32
  }
  func.func @transform_4(%arg0: i32) -> (i32, i32, i32) {
    %c0_i32 = arith.constant 0 : i32
    %c0_i32_0 = arith.constant 0 : i32
    %c0_i32_1 = arith.constant 0 : i32
    return %arg0, %c0_i32, %c0_i32_0 : i32, i32, i32
  }
}

</mosaic_0001>

<bundles_post_ra>
// kernel: aspp3d_forward.1
= control target key start
LH: loop header
LB: loop body
LE: loop exit
PB: predicated region body
PF: predicated region fallthrough
CT: control target
= control target key end

     0   :  { %9 = vsyncpa [#allocation5], 0  ;;  %s6596_s0 = inlined_call_operand.vmem [shape: bf16[4,8,8,16], index: 0, kind: input, shape index: {}]   ;;  %s6597_s1 = inlined_call_operand.vmem [shape: bf16[16,4], index: 1, kind: input, shape index: {}]   ;;  %s6598_s2 = inlined_call_operand.vmem [shape: bf16[3,144,4], index: 2, kind: input, shape index: {}]   ;;  %s6599_s3 = inlined_call_operand.vmem [shape: bf16[144,128], index: 3, kind: input, shape index: {}]   ;;  %s6600_s4 = inlined_call_operand.hbm [shape: f32[4,64,128], index: 4, kind: output, shape index: {}]  }
   0x1   :  { %11 = vsyncpa [#allocation5 + $0x1], 0  ;;  %s4741_s15 = smov 0   ;;  %s4743_s16 = smov 0  }
   0x2   :  { %s4745_s17 = smov 0   ;;  %s4747_s18 = smov 0  }
   0x3 LB: > { %s4762_s19 = sadd.s32 4294967295, %s4701_s18   ;;  %s4041_s20 = sadd.s32 4294967294, %s4701_s18   ;;  %s4701_s18 = sphi %s4747_s18, %s6688_s18   ;;  %s4697_s17 = sphi %s4745_s17, %s6687_s17   ;;  %s4693_s16 = sphi %s4743_s16, %s6686_s16   ;;  %s4689_s15 = sphi %s4741_s15, %s6685_s15  }
   0x4   : > { %s4766_s21 = sadd.s32 1, %s4701_s18   ;;  %s113_s22 = sadd.s32 1, %s4697_s17 }
   0x5   : > { %s110_s23 = ssub.s32 %s4701_s18, %s4766_s21  ;;  %p123_p0 = scmp.ne.s32.totalorder %s4697_s17, %s4693_s16 }
   0x6   : > { %p111_p1 = scmp.eq.s32.totalorder %s110_s23, 0  ;;  %p124_p2 = scmp.eq.s32.totalorder %s4762_s19, 3 }
   0x7   : > { %p129_p3 = scmp.ne.s32.totalorder %s4693_s16, %s4689_s15  ;;  %p130_p4 = scmp.eq.s32.totalorder %s4041_s20, 3 }
   0x8   : > { %s4777_s24 = scalar_select %p111_p1, %s4697_s17, %s113_s22  }
   0x9   : > { %p4779_p5 = por %p124_p2, %p123_p0  ;;  %p4783_p6 = por %p130_p4, %p129_p3 }
   0xa   : > { %p4044_p7 = scmp.ge.s32.totalorder %s4701_s18, 1  ;;  %p165_p8 = scmp.lt.s32.totalorder %s4701_s18, 5 }
   0xc   : > { %p166_p9 = pnand %p4044_p7, %p165_p8 }
   0xe   : > { %169 = sbr.rel (%p166_p9) target bundleno = 995 (0x3e3), region = 36 }
  0x13   : > { %vm199_vm0 = vcmask 125952   ;;  %vm201_vm1 = vcmask 124928   ;;  %v6604_v0 = vmov 0   ;;  %p191_p10 = scmp.lt.s32.totalorder %s4762_s19, 3  ;;  %vm197_vm2 = vcmask 125953   ;;  %v4581_v1 = vld [vmem:[%s6598_s2 + $0x38] sm:$0xff]  }
  0x14   : > { %213 = vst.msk [vmem:[#allocation2 + $0x48] sm:$0xf] %vm199_vm0, %v6604_v0  ;;  %216 = vst.msk [vmem:[#allocation2 + $0x58] sm:$0xf] %vm199_vm0, %v6604_v0  ;;  %1114 = vmatprep.subr.bf16.mxu1 %v6604_v0  ;;  %vm492_vm3 = vcmask 1042432   ;;  %vm493_vm4 = vcmask 1046532  }
  0x15   : > { %200 = vst.msk [vmem:[#allocation2 + $0x8] sm:$0xf] %vm199_vm0, %v6604_v0  ;;  %204 = vst.msk [vmem:[#allocation2 + $0x18] sm:$0xf] %vm199_vm0, %v6604_v0  ;;  %s192_s27 = scalar_select %p191_p10, %s4762_s19, 3  ;;  %1115 = vmatpush1.bf16.msra.mxu1 %v4581_v1  ;;  %v4583_v2 = vld [vmem:[%s6598_s2 + $0x30] sm:$0xff]  }
  0x16   : > { %207 = vst.msk [vmem:[#allocation2 + $0x28] sm:$0xf] %vm199_vm0, %v6604_v0  ;;  %210 = vst.msk [vmem:[#allocation2 + $0x38] sm:$0xf] %vm199_vm0, %v6604_v0  ;;  %vm417_vm6 = vcmask 1040384   ;;  %1116 = vmatprep.subr.bf16.mxu1 %v6604_v0  ;;  %v4586_v7 = vld [vmem:[%s6598_s2 + $0x28] sm:$0xff]  }
  0x17   : > { %220 = vst.msk [vmem:[#allocation2 + $0xe8] sm:$0xf] %vm199_vm0, %v6604_v0  ;;  %223 = vst.msk [vmem:[#allocation2 + $0xf8] sm:$0xf] %vm199_vm0, %v6604_v0  ;;  %s4450_s30 = sshll.u32 %s192_s27, 5  ;;  %s4704_s12 = smov 16  }
  0x18   : > { %226 = vst.msk [vmem:[#allocation2 + $0x108] sm:$0xf] %vm199_vm0, %v6604_v0  ;;  %229 = vst.msk [vmem:[#allocation2 + $0x118] sm:$0xf] %vm199_vm0, %v6604_v0  ;;  %s4915_s9 = scalar_lea.vmem %s6596_s0, %s4450_s30  ;;  %vm418_vm7 = vcmask 1044484   ;;  %v4588_v22 = vld [vmem:[%s6598_s2 + $0x20] sm:$0xff]  }
  0x19   : > { %232 = vst.msk [vmem:[#allocation2 + $0x128] sm:$0xf] %vm199_vm0, %v6604_v0  ;;  %235 = vst.msk [vmem:[#allocation2 + $0x138] sm:$0xf] %vm199_vm0, %v6604_v0  ;;  %v254_v4 = vld [vmem:[%s4915_s9] sm:$0xf]  ;;  %1117 = vmatpush1.bf16.msra.mxu1 %v4583_v2 }
  0x1a   : > { %2862 = vst.msk [vmem:[#allocation3 + $0x8] sm:$0xf] %vm199_vm0, %v6604_v0  ;;  %2873 = vst.msk [vmem:[#allocation3 + $0x98] sm:$0xf] %vm199_vm0, %v6604_v0  ;;  %v255_v5 = vld [vmem:[%s4915_s9 + $0x4] sm:$0xf]  ;;  %1118 = vmatprep.subr.bf16.mxu1 %v6604_v0 }
  0x1b   : > { %214 = vst.msk [vmem:[#allocation2 + $0x4c] sm:$0x7] %vm201_vm1, %v6604_v0  ;;  %217 = vst.msk [vmem:[#allocation2 + $0x5c] sm:$0x7] %vm201_vm1, %v6604_v0  ;;  %v256_v6 = vld [vmem:[%s4915_s9 + $0x8] sm:$0xf] }
  0x1c   : > { %202 = vst.msk [vmem:[#allocation2 + $0xc] sm:$0x7] %vm201_vm1, %v6604_v0  ;;  %205 = vst.msk [vmem:[#allocation2 + $0x1c] sm:$0x7] %vm201_vm1, %v6604_v0  ;;  %v4563_v8 = vld [vmem:[#allocation2 + $0x48] ss:$16 sps:$4 sm:$0xff]  }
  0x1d   : > { %208 = vst.msk [vmem:[#allocation2 + $0x2c] sm:$0x7] %vm201_vm1, %v6604_v0  ;;  %211 = vst.msk [vmem:[#allocation2 + $0x3c] sm:$0x7] %vm201_vm1, %v6604_v0  ;;  %v460_v9 = vld [vmem:[#allocation2 + $0x48] sm:$0xe]  ;;  %824 = vrot.lane.b32.xlu0 %v4563_v8, %s4704_s12  ;;  %1119 = vmatpush1.bf16.msra.mxu1 %v4586_v7 }
  0x1e   : > { %221 = vst.msk [vmem:[#allocation2 + $0xec] sm:$0x7] %vm201_vm1, %v6604_v0  ;;  %224 = vst.msk [vmem:[#allocation2 + $0xfc] sm:$0x7] %vm201_vm1, %v6604_v0  ;;  %v462_v11 = vld [vmem:[#allocation2 + $0x58] sm:$0xe]  ;;  %1120 = vmatprep.subr.bf16.mxu1 %v6604_v0 }
  0x1f   : > { %227 = vst.msk [vmem:[#allocation2 + $0x10c] sm:$0x7] %vm201_vm1, %v6604_v0  ;;  %230 = vst.msk [vmem:[#allocation2 + $0x11c] sm:$0x7] %vm201_vm1, %v6604_v0  ;;  %v4065_v13 = vrot.slane %v460_v9, 9  ;;  %v4066_v15 = vrot.slane %v462_v11, 9 }
  0x20   : > { %233 = vst.msk [vmem:[#allocation2 + $0x12c] sm:$0x7] %vm201_vm1, %v6604_v0  ;;  %236 = vst.msk [vmem:[#allocation2 + $0x13c] sm:$0x7] %vm201_vm1, %v6604_v0  ;;  %v257_v17 = vld [vmem:[%s4915_s9 + $0xc] sm:$0xf] }
  0x21   : > { %246 = vst.msk [vmem:[#allocation2 + $0x6c] sm:$0x7] %vm201_vm1, %v6604_v0  ;;  %247 = vst.msk [vmem:[#allocation2 + $0x7c] sm:$0x7] %vm201_vm1, %v6604_v0  ;;  %vm306_vm8 = vcmask 130048   ;;  %s4705_s20 = smov 32   ;;  %1121 = vmatpush1.bf16.msra.mxu1 %v4588_v22 }
  0x22   : > { %248 = vst.msk [vmem:[#allocation2 + $0x8c] sm:$0x7] %vm201_vm1, %v6604_v0  ;;  %249 = vst.msk [vmem:[#allocation2 + $0x9c] sm:$0x7] %vm201_vm1, %v6604_v0  ;;  %v461_v10 = vld [vmem:[#allocation2 + $0x4c] sm:$0x1]  ;;  %1122 = vmatprep.subr.bf16.mxu1 %v6604_v0 }
  0x23   : > { %250 = vst.msk [vmem:[#allocation2 + $0xac] sm:$0x7] %vm201_vm1, %v6604_v0  ;;  %251 = vst.msk [vmem:[#allocation2 + $0xbc] sm:$0x7] %vm201_vm1, %v6604_v0  ;;  %v463_v12 = vld [vmem:[#allocation2 + $0x5c] sm:$0x1] }
  0x24   : > { %252 = vst.msk [vmem:[#allocation2 + $0xcc] sm:$0x7] %vm201_vm1, %v6604_v0  ;;  %253 = vst.msk [vmem:[#allocation2 + $0xdc] sm:$0x7] %vm201_vm1, %v6604_v0  ;;  %v497_v14 = vrot.slane %v461_v10, 5  ;;  %v501_v16 = vrot.slane %v463_v12, 5 }
  0x25   : > { %238 = vst.msk [vmem:[#allocation2 + $0x64] sm:$0xe] %vm197_vm2, %v6604_v0  ;;  %239 = vst.msk [vmem:[#allocation2 + $0x74] sm:$0xe] %vm197_vm2, %v6604_v0  ;;  %v4589_v36 = vld [vmem:[%s6598_s2 + $0x18] sm:$0xff]   ;;  %s4706_s27 = smov 64  }
  0x26   : > { %198 = vst.msk [vmem:[#allocation2 + $0x4] sm:$0xe] %vm197_vm2, %v6604_v0  ;;  %203 = vst.msk [vmem:[#allocation2 + $0x14] sm:$0xe] %vm197_vm2, %v6604_v0  ;;  %v4590_v49 = vld [vmem:[%s6598_s2 + $0x10] sm:$0xff]   ;;  %s4707_s30 = smov 112   ;;  %1123 = vmatpush1.bf16.msra.mxu1 %v4589_v36 }
  0x27   : > { %206 = vst.msk [vmem:[#allocation2 + $0x24] sm:$0xe] %vm197_vm2, %v6604_v0  ;;  %209 = vst.msk [vmem:[#allocation2 + $0x34] sm:$0xe] %vm197_vm2, %v6604_v0  ;;  %1124 = vmatprep.subr.bf16.mxu1 %v6604_v0  ;;  %s4708_s5 = smov 48   ;;  %s4709_s8 = smov 80  }
  0x28   : > { %212 = vst.msk [vmem:[#allocation2 + $0x44] sm:$0xe] %vm197_vm2, %v6604_v0  ;;  %215 = vst.msk [vmem:[#allocation2 + $0x54] sm:$0xe] %vm197_vm2, %v6604_v0  ;;  %v592_v21 = vld [vmem:[#allocation2 + $0x6c] sm:$0x1] }
  0x29   : > { %219 = vst.msk [vmem:[#allocation2 + $0xe4] sm:$0xe] %vm197_vm2, %v6604_v0  ;;  %222 = vst.msk [vmem:[#allocation2 + $0xf4] sm:$0xe] %vm197_vm2, %v6604_v0  ;;  %v594_v26 = vld [vmem:[#allocation2 + $0x7c] sm:$0x1] }
  0x2a   : > { %225 = vst.msk [vmem:[#allocation2 + $0x104] sm:$0xe] %vm197_vm2, %v6604_v0  ;;  %228 = vst.msk [vmem:[#allocation2 + $0x114] sm:$0xe] %vm197_vm2, %v6604_v0  ;;  %v625_v30 = vrot.slane %v592_v21, 5  ;;  %v629_v31 = vrot.slane %v594_v26, 5  ;;  %1125 = vmatpush1.bf16.msra.mxu1 %v4590_v49 }
  0x2b   : > { %231 = vst.msk [vmem:[#allocation2 + $0x124] sm:$0xe] %vm197_vm2, %v6604_v0  ;;  %234 = vst.msk [vmem:[#allocation2 + $0x134] sm:$0xe] %vm197_vm2, %v6604_v0  ;;  %v465_v35 = vld [vmem:[#allocation2 + $0x6c] sm:$0x1]  ;;  %1126 = vmatprep.subr.bf16.mxu1 %v6604_v0 }
  0x2c   : > { %240 = vst.msk [vmem:[#allocation2 + $0x84] sm:$0xe] %vm197_vm2, %v6604_v0  ;;  %241 = vst.msk [vmem:[#allocation2 + $0x94] sm:$0xe] %vm197_vm2, %v6604_v0  ;;  %v527_v18 = vld [vmem:[#allocation2 + $0x64] sm:$0x8] }
  0x2d   : > { %242 = vst.msk [vmem:[#allocation2 + $0xa4] sm:$0xe] %vm197_vm2, %v6604_v0  ;;  %243 = vst.msk [vmem:[#allocation2 + $0xb4] sm:$0xe] %vm197_vm2, %v6604_v0  ;;  %v529_v20 = vld [vmem:[#allocation2 + $0x74] sm:$0x8] }
  0x2e   : > { %244 = vst.msk [vmem:[#allocation2 + $0xc4] sm:$0xe] %vm197_vm2, %v6604_v0  ;;  %245 = vst.msk [vmem:[#allocation2 + $0xd4] sm:$0xe] %vm197_vm2, %v6604_v0  ;;  %v4073_v24 = vrot.slane %v527_v18, 11  ;;  %v4074_v25 = vrot.slane %v529_v20, 11 }
  0x2f   : > { %vm4908_vm5 = vmor %vm492_vm3, %vm493_vm4  ;;  %262 = vst.msk [vmem:[#allocation2 + $0x68] sm:$0xf] %vm199_vm0, %v254_v4  ;;  %v505_v53 = vrot.slane %v465_v35, 5  ;;  %v467_v62 = vld [vmem:[#allocation2 + $0x7c] sm:$0x1]  ;;  %v4591_v20 = vld [vmem:[%s6598_s2 + $0x8] sm:$0xff]  }
  0x30   : > { %263 = vst.msk [vmem:[#allocation2 + $0x78] sm:$0xf] %vm199_vm0, %v255_v5  ;;  %264 = vst.msk [vmem:[#allocation2 + $0x88] sm:$0xf] %vm199_vm0, %v256_v6  ;;  %v498_v19 = vsel %vm4908_vm5, %v4065_v13, %v497_v14  ;;  %v502_v23 = vsel %vm4908_vm5, %v4066_v15, %v501_v16  ;;  %v509_v6 = vrot.slane %v467_v62, 5  ;;  %s4710_s10 = smov 96   ;;  %1127 = vmatpush1.bf16.msra.mxu1 %v4591_v20 }
  0x31   : > { %265 = vst.msk [vmem:[#allocation2 + $0x98] sm:$0xf] %vm199_vm0, %v257_v17  ;;  %v4113_v28 = vcombine.low %v498_v19, %v502_v23  ;;  %vm4940_vm9 = vmor %vm417_vm6, %vm418_vm7  ;;  %v258_v14 = vld [vmem:[%s4915_s9 + $0x10] sm:$0xf]  ;;  %v259_v19 = vld [vmem:[%s4915_s9 + $0x14] sm:$0xf]  ;;  %1128 = vmatprep.subr.bf16.mxu1 %v6604_v0 }
  0x32   : > { %266 = vst.msk [vmem:[#allocation2 + $0xa8] sm:$0xf] %vm199_vm0, %v258_v14  ;;  %267 = vst.msk [vmem:[#allocation2 + $0xb8] sm:$0xf] %vm199_vm0, %v259_v19  ;;  %v596_v26 = vld [vmem:[#allocation2 + $0x8c] sm:$0x1] }
  0x33   : > { %v656_v27 = vld [vmem:[#allocation2 + $0x84] sm:$0x8]  ;;  %v658_v32 = vld [vmem:[#allocation2 + $0x94] sm:$0x8]  ;;  %844 = vrot.lane.b32.xlu0 %v4113_v28, %s4705_s20  ;;  %vm1212_vm10 = vcmask 1041408   ;;  %vm1213_vm11 = vcmask 1045508  }
  0x34   : > { %v4089_v33 = vrot.slane %v656_v27, 11  ;;  %v4090_v42 = vrot.slane %v658_v32, 11  ;;  %v531_v2 = vld [vmem:[#allocation2 + $0x84] sm:$0x8]  ;;  %v533_v8 = vld [vmem:[#allocation2 + $0x94] sm:$0x8]  ;;  %vm5090_vm12 = vmor %vm1212_vm10, %vm1213_vm11 }
  0x35   : > { %v4075_v12 = vrot.slane %v531_v2, 11  ;;  %v4076_v17 = vrot.slane %v533_v8, 11  ;;  %v660_v22 = vld [vmem:[#allocation2 + $0xa4] sm:$0x8]  ;;  %v662_v23 = vld [vmem:[#allocation2 + $0xb4] sm:$0x8] }
  0x36   : > { %v528_v38 = vld [vmem:[#allocation2 + $0x68] sm:$0x7]  ;;  %v598_v32 = vld [vmem:[#allocation2 + $0x9c] sm:$0x1]  ;;  %v4091_v35 = vrot.slane %v660_v22, 11  ;;  %v4092_v36 = vrot.slane %v662_v23, 11 }
  0x37   : > { %v4564_v34 = vld [vmem:[#allocation2 + $0x68] ss:$16 sps:$4 sm:$0xff]   ;;  %v561_v40 = vrot.slane %v528_v38, 7  ;;  %v4593_v38 = vld [vmem:[%s6598_s2] sm:$0xff]   ;;  %v473_v23 = vld [vmem:[#allocation2 + $0xac] sm:$0x1] }
  0x38   : > { %872 = vrot.lane.b32.xlu1 %v4564_v34, %s4706_s27  ;;  %v4566_v37 = vld [vmem:[#allocation2 + $0x68] ss:$16 sps:$4 sm:$0xff]   ;;  %4459 = vmatprep.mubr.msk.bf16.mxu0 %vm306_vm8, %v4564_v34  ;;  %vm972_vm13 = vcmask 261120   ;;  %vm981_vm14 = vcmask 392192   ;;  %vm990_vm15 = vcmask 523264   ;;  %vm999_vm1 = vcmask 654336  }
  0x39   : > { %v530_v39 = vld [vmem:[#allocation2 + $0x78] sm:$0x7]  ;;  %v591_v41 = vld [vmem:[#allocation2 + $0x68] sm:$0xe]  ;;  %v562_v45 = vsel %vm4940_vm9, %v4073_v24, %v561_v40  ;;  %v535_v40 = vld [vmem:[#allocation2 + $0xa4] sm:$0x8]  ;;  %1129 = vmatpush1.bf16.msra.mxu1 %v4593_v38 }
  0x3a   : > { %v4565_v43 = vld [vmem:[#allocation2 + $0x88] ss:$16 sps:$4 sm:$0xff]   ;;  %v565_v46 = vrot.slane %v530_v39, 7  ;;  %v4081_v48 = vrot.slane %v591_v41, 9  ;;  %v537_v41 = vld [vmem:[#allocation2 + $0xb4] sm:$0x8]  ;;  %1144 = vmatprep.subr.bf16.mxu1 %v6604_v0 }
  0x3b   : > { %v4952_v44 = vld [vmem:[#allocation2 + $0x88] ss:$16 sps:$4 sm:$0xff]   ;;  %940 = vrot.lane.b32.xlu0 %v4565_v43, %s4707_s30  ;;  %v539_v38 = vld [vmem:[#allocation2 + $0xc4] sm:$0x8]  ;;  %vm1008_vm2 = vcmask 785408   ;;  %vm1017_vm3 = vcmask 916480  }
  0x3c   : > { %v593_v47 = vld [vmem:[#allocation2 + $0x78] sm:$0xe]  ;;  %826 = vrot.lane.b32.xlu1 %v4566_v37, %s4704_s12  ;;  %v657_v51 = vld [vmem:[#allocation2 + $0x88] sm:$0x7]  ;;  %v566_v54 = vsel %vm4940_vm9, %v4074_v25, %v565_v46  ;;  %v626_v55 = vsel %vm4908_vm5, %v4081_v48, %v625_v30  ;;  %v637_v37 = vrot.slane %v598_v32, 5  ;;  %v4078_v46 = vrot.slane %v537_v41, 11 }
  0x3d   : > { %v4082_v50 = vrot.slane %v593_v47, 9  ;;  %v659_v52 = vld [vmem:[#allocation2 + $0x98] sm:$0x7]  ;;  %v690_v56 = vrot.slane %v657_v51, 7  ;;  %v464_v58 = vld [vmem:[#allocation2 + $0x68] sm:$0xe]  ;;  %v4117_v60 = vcombine.low %v562_v45, %v566_v54 }
  0x3e   : > { %v694_v57 = vrot.slane %v659_v52, 7  ;;  %v466_v59 = vld [vmem:[#allocation2 + $0x78] sm:$0xe]  ;;  %v4067_v63 = vrot.slane %v464_v58, 9  ;;  %v532_v7 = vld [vmem:[#allocation2 + $0x88] sm:$0x7] }
  0x3f   : > { %v630_v61 = vsel %vm4908_vm5, %v4082_v50, %v629_v31  ;;  %v4068_v1 = vrot.slane %v466_v59, 9  ;;  %v691_v4 = vsel %vm4940_vm9, %v4089_v33, %v690_v56  ;;  %874 = vrot.lane.b32.xlu0 %v4952_v44, %s4706_s27  ;;  %v534_v11 = vld [vmem:[#allocation2 + $0x98] sm:$0x7]  ;;  %v569_v13 = vrot.slane %v532_v7, 7  ;;  %v595_v24 = vld [vmem:[#allocation2 + $0x88] sm:$0xe] }
  0x40   : > { %v695_v5 = vsel %vm4940_vm9, %v4090_v42, %v694_v57  ;;  %864 = vrot.lane.b32.xlu1 %v4117_v60, %s4708_s5  ;;  %v4121_v9 = vcombine.low %v626_v55, %v630_v61  ;;  %v506_v15 = vsel %vm4908_vm5, %v4067_v63, %v505_v53  ;;  %v573_v18 = vrot.slane %v534_v11, 7  ;;  %v597_v27 = vld [vmem:[#allocation2 + $0x98] sm:$0xe]  ;;  %v468_v42 = vld [vmem:[#allocation2 + $0x88] sm:$0xe]  ;;  %s4711_s14 = smov 4  }
  0x41   : > { %v4125_v10 = vcombine.low %v691_v4, %v695_v5  ;;  %v510_v16 = vsel %vm4908_vm5, %v4068_v1, %v509_v6  ;;  %v570_v21 = vsel %vm4940_vm9, %v4075_v12, %v569_v13  ;;  %v4083_v28 = vrot.slane %v595_v24, 9  ;;  %v469_v47 = vld [vmem:[#allocation2 + $0x8c] sm:$0x1]  ;;  %v470_v48 = vld [vmem:[#allocation2 + $0x98] sm:$0xe]  ;;  %s4712_s22 = smov 8  }
  0x42   : > { %v574_v25 = vsel %vm4940_vm9, %v4076_v17, %v573_v18  ;;  %v4114_v30 = vcombine.low %v506_v15, %v510_v16  ;;  %v633_v33 = vrot.slane %v596_v26, 5  ;;  %v4084_v34 = vrot.slane %v597_v27, 9  ;;  %v661_v49 = vld [vmem:[#allocation2 + $0xa8] sm:$0x7]  ;;  %v663_v52 = vld [vmem:[#allocation2 + $0xb8] sm:$0x7] }
  0x43   : > { %892 = vrot.lane.b32.xlu0 %v4121_v9, %s4709_s8  ;;  %v4118_v31 = vcombine.low %v570_v21, %v574_v25  ;;  %v4077_v45 = vrot.slane %v535_v40, 11  ;;  %v536_v51 = vld [vmem:[#allocation2 + $0xa8] sm:$0x7]  ;;  %v698_v53 = vrot.slane %v661_v49, 7  ;;  %v702_v55 = vrot.slane %v663_v52, 7  ;;  %v4599_v25 = vld [vmem:[%s6597_s1] sm:$0xff]  }
  0x44   : > { %912 = vrot.lane.b32.xlu1 %v4125_v10, %s4710_s10  ;;  %v634_v39 = vsel %vm4908_vm5, %v4083_v28, %v633_v33  ;;  %v638_v43 = vsel %vm4908_vm5, %v4084_v34, %v637_v37  ;;  %v577_v54 = vrot.slane %v536_v51, 7  ;;  %v4569_v56 = vld [vmem:[#allocation2 + $0xa8] ss:$16 sps:$4 sm:$0xff]   ;;  %v4069_v58 = vrot.slane %v468_v42, 9  ;;  %v471_v61 = vld [vmem:[#allocation2 + $0x9c] sm:$0x1]  ;;  %4457 = vmatprep.subr.bf16.mxu0 %v4599_v25 }
  0x45   : > { %v4122_v50 = vcombine.low %v634_v39, %v638_v43  ;;  %v538_v57 = vld [vmem:[#allocation2 + $0xb8] sm:$0x7]  ;;  %v699_v59 = vsel %vm4940_vm9, %v4091_v35, %v698_v53  ;;  %v513_v62 = vrot.slane %v469_v47, 5  ;;  %v599_v63 = vld [vmem:[#allocation2 + $0xa8] sm:$0xe]  ;;  %v703_v1 = vsel %vm4940_vm9, %v4092_v36, %v702_v55  ;;  %v4596_v10 = vld [vmem:[%s6598_s2 + $0x40] sm:$0xff]   ;;  %4458 = vmatpush3.bf16.msra.mxu0 %v4599_v25 }
  0x46   : > { %v581_v60 = vrot.slane %v538_v57, 7  ;;  %v4070_v2 = vrot.slane %v470_v48, 9  ;;  %v517_v4 = vrot.slane %v471_v61, 5  ;;  %v600_v5 = vld [vmem:[#allocation2 + $0xac] sm:$0x1]  ;;  %v4126_v7 = vcombine.low %v699_v59, %v703_v1  ;;  %1145 = vmatpush2.bf16.msra.mxu1 %v4596_v10  ;;  %1889 = vmatprep.subr.bf16.mxu0 %v6604_v0  ;;  %s4713_s23 = smov 12  }
  0x47   : > { %846 = vrot.lane.b32.xlu0 %v4114_v30, %s4705_s20  ;;  %v601_v6 = vld [vmem:[#allocation2 + $0xb8] sm:$0xe]  ;;  %v514_v8 = vsel %vm4908_vm5, %v4069_v58, %v513_v62  ;;  %v602_v9 = vld [vmem:[#allocation2 + $0xbc] sm:$0x1]  ;;  %v578_v13 = vsel %vm4940_vm9, %v4077_v45, %v577_v54  ;;  %v4085_v15 = vrot.slane %v599_v63, 9  ;;  %v641_v19 = vrot.slane %v600_v5, 5  ;;  %2660 = vmatprep.subr.bf16.mxu1 %v6604_v0 }
  0x48   : > { %866 = vrot.lane.b32.xlu1 %v4118_v31, %s4708_s5  ;;  %v4568_v11 = vld [vmem:[#allocation2 + $0x88] ss:$16 sps:$4 sm:$0xff]   ;;  %v518_v12 = vsel %vm4908_vm5, %v4070_v2, %v517_v4  ;;  %v582_v14 = vsel %vm4940_vm9, %v4078_v46, %v581_v60  ;;  %v261_v17 = vld [vmem:[%s4915_s9 + $0x1c] sm:$0xf]  ;;  %v4086_v20 = vrot.slane %v601_v6, 9  ;;  %v645_v21 = vrot.slane %v602_v9, 5  ;;  %4460 = vmatmul.mubr.msk.bf16.vlgmr.msra.gmra.mxu0 %vm306_vm8, %v4952_v44 }
  0x49   : > { %v260_v16 = vld [vmem:[%s4915_s9 + $0x18] sm:$0xf]  ;;  %v4115_v18 = vcombine.low %v514_v8, %v518_v12  ;;  %269 = vst.msk [vmem:[#allocation2 + $0xd8] sm:$0xf] %vm199_vm0, %v261_v17  ;;  %v472_v22 = vld [vmem:[#allocation2 + $0xa8] sm:$0xe]  ;;  %v4119_v26 = vcombine.low %v578_v13, %v582_v14  ;;  %v642_v28 = vsel %vm4908_vm5, %v4085_v15, %v641_v19 }
  0x4a   : > { %268 = vst.msk [vmem:[#allocation2 + $0xc8] sm:$0xf] %vm199_vm0, %v260_v16  ;;  %v474_v24 = vld [vmem:[#allocation2 + $0xb8] sm:$0xe]  ;;  %v475_v27 = vld [vmem:[#allocation2 + $0xbc] sm:$0x1]  ;;  %v646_v30 = vsel %vm4908_vm5, %v4086_v20, %v645_v21 }
  0x4b   : > { %914 = vrot.lane.b32.xlu0 %v4126_v7, %s4710_s10  ;;  %v4570_v31 = vld [vmem:[#allocation2 + $0xa8] ss:$16 sps:$4 sm:$0xff]   ;;  %v664_v32 = vld [vmem:[#allocation2 + $0xc4] sm:$0x8]  ;;  %v666_v33 = vld [vmem:[#allocation2 + $0xd4] sm:$0x8]  ;;  %v4123_v40 = vcombine.low %v642_v28, %v646_v30 }
  0x4c   : > { %894 = vrot.lane.b32.xlu1 %v4122_v50, %s4709_s8  ;;  %v4071_v34 = vrot.slane %v472_v22, 9  ;;  %v521_v35 = vrot.slane %v473_v23, 5  ;;  %v4072_v36 = vrot.slane %v474_v24, 9  ;;  %v525_v37 = vrot.slane %v475_v27, 5  ;;  %v541_v39 = vld [vmem:[#allocation2 + $0xd4] sm:$0x8]  ;;  %4463 = vmatprep.mubr.msk.bf16.mxu0 %vm306_vm8, %v4570_v31 }
  0x4d   : > { %v4093_v41 = vrot.slane %v664_v32, 11  ;;  %v4094_v42 = vrot.slane %v666_v33, 11  ;;  %v4079_v48 = vrot.slane %v539_v38, 11  ;;  %v4080_v49 = vrot.slane %v541_v39, 11  ;;  %v668_v55 = vld [vmem:[#allocation2 + $0xe4] sm:$0x8] }
  0x4e   : > { %v522_v51 = vsel %vm4908_vm5, %v4071_v34, %v521_v35  ;;  %v526_v52 = vsel %vm4908_vm5, %v4072_v36, %v525_v37  ;;  %v670_v60 = vld [vmem:[#allocation2 + $0xf4] sm:$0x8]  ;;  %v671_v61 = vld [vmem:[#allocation2 + $0xf8] sm:$0x7]  ;;  %v604_v63 = vld [vmem:[#allocation2 + $0xcc] sm:$0x1] }
  0x4f   : > { %828 = vrot.lane.b32.xlu0 %v4568_v11, %s4704_s12  ;;  %v4572_v2 = vld [vmem:[#allocation2 + $0xa8] ss:$16 sps:$4 sm:$0xff]   ;;  %v606_v6 = vld [vmem:[#allocation2 + $0xdc] sm:$0x1]  ;;  %v4116_v7 = vcombine.low %v522_v51, %v526_v52  ;;  %v4601_v8 = vld [vmem:[%s6598_s2 + $0x80] sm:$0xff]   ;;  %v649_v10 = vrot.slane %v604_v63, 5 }
  0x50   : > { %942 = vrot.lane.b32.xlu1 %v4569_v56, %s4707_s30  ;;  %v667_v45 = vld [vmem:[#allocation2 + $0xd8] sm:$0x7]  ;;  %v669_v56 = vld [vmem:[#allocation2 + $0xe8] sm:$0x7]  ;;  %v653_v12 = vrot.slane %v606_v6, 5  ;;  %v4095_v15 = vrot.slane %v668_v55, 11  ;;  %1890 = vmatpush1.bf16.msra.mxu0 %v4601_v8 }
  0x51   : > { %v665_v43 = vld [vmem:[#allocation2 + $0xc8] sm:$0x7]  ;;  %v710_v47 = vrot.slane %v667_v45, 7  ;;  %v542_v54 = vld [vmem:[#allocation2 + $0xd8] sm:$0x7]  ;;  %v714_v16 = vrot.slane %v669_v56, 7  ;;  %1891 = vmatprep.subr.bf16.mxu0 %v6604_v0 }
  0x52   : > { %v706_v46 = vrot.slane %v665_v43, 7  ;;  %v4571_v50 = vld [vmem:[#allocation2 + $0xc8] ss:$16 sps:$4 sm:$0xff]   ;;  %v589_v59 = vrot.slane %v542_v54, 7  ;;  %v4096_v17 = vrot.slane %v670_v60, 11  ;;  %vm2856_vm4 = vcmask 125955  }
  0x53   : > { %868 = vrot.lane.b32.xlu0 %v4119_v26, %s4708_s5  ;;  %v540_v53 = vld [vmem:[#allocation2 + $0xc8] sm:$0x7]  ;;  %v711_v57 = vsel %vm4940_vm9, %v4094_v42, %v710_v47  ;;  %v605_v5 = vld [vmem:[#allocation2 + $0xd8] sm:$0xe]  ;;  %v1256_v20 = vld [vmem:[#allocation2 + $0x2c] sm:$0x3]  ;;  %v715_v32 = vsel %vm4940_vm9, %v4095_v15, %v714_v16 }
  0x54   : > { %848 = vrot.lane.b32.xlu1 %v4115_v18, %s4705_s20  ;;  %v707_v44 = vsel %vm4940_vm9, %v4093_v41, %v706_v46  ;;  %v585_v58 = vrot.slane %v540_v53, 7  ;;  %v603_v62 = vld [vmem:[#allocation2 + $0xc8] sm:$0xe]  ;;  %v4088_v11 = vrot.slane %v605_v5, 9  ;;  %v590_v14 = vsel %vm4940_vm9, %v4080_v49, %v589_v59  ;;  %v1257_v21 = vld [vmem:[#allocation2 + $0x38] sm:$0xc] }
  0x55   : > { %v4127_v1 = vcombine.low %v707_v44, %v711_v57  ;;  %v4573_v4 = vld [vmem:[#allocation2 + $0xc8] ss:$16 sps:$4 sm:$0xff]   ;;  %v4087_v9 = vrot.slane %v603_v62, 9  ;;  %v718_v18 = vrot.slane %v671_v61, 7  ;;  %v1258_v22 = vld [vmem:[#allocation2 + $0x3c] sm:$0x3] }
  0x56   : > { %v586_v13 = vsel %vm4940_vm9, %v4079_v48, %v585_v58  ;;  %v1255_v19 = vld [vmem:[#allocation2 + $0x28] sm:$0xc]  ;;  %4464 = vmatmul.mubr.msk.bf16.gmra.mxu0 %vm306_vm8, %v4573_v4  ;;  %v654_v25 = vsel %vm4908_vm5, %v4088_v11, %v653_v12  ;;  %v1289_v27 = vrot.slane %v1256_v20, 6  ;;  %v4159_v28 = vrot.slane %v1257_v21, 10  ;;  %v5074_v34 = vld [vmem:[#allocation2 + $0xc] sm:$0x7] }
  0x57   : > { %896 = vrot.lane.b32.xlu0 %v4123_v40, %s4709_s8  ;;  %v4120_v23 = vcombine.low %v586_v13, %v590_v14  ;;  %v650_v24 = vsel %vm4908_vm5, %v4087_v9, %v649_v10  ;;  %v4158_v26 = vrot.slane %v1255_v19, 10  ;;  %v1293_v30 = vrot.slane %v1258_v22, 6  ;;  %v5076_v35 = vld [vmem:[#allocation2 + $0x18] sm:$0x8]  ;;  %v5078_v36 = vld [vmem:[#allocation2 + $0x1c] sm:$0x7] }
  0x58   : > { %876 = vrot.lane.b32.xlu1 %v4570_v31, %s4706_s27  ;;  %v5068_v31 = vld [vmem:[#allocation2 + $0x8] sm:$0x8]  ;;  %v719_v33 = vsel %vm4940_vm9, %v4096_v17, %v718_v18  ;;  %v1319_v37 = vld [vmem:[#allocation2 + $0x64] sm:$0xc]  ;;  %v1320_v38 = vld [vmem:[#allocation2 + $0x68] sm:$0x3]  ;;  %v4124_v40 = vcombine.low %v650_v24, %v654_v25 }
  0x59   : > { %v1321_v39 = vld [vmem:[#allocation2 + $0x74] sm:$0xc]  ;;  %v4269_v41 = vrot.slane %v5068_v31, 11  ;;  %v1322_v42 = vld [vmem:[#allocation2 + $0x78] sm:$0x3]  ;;  %v4128_v46 = vcombine.low %v715_v32, %v719_v33  ;;  %v2060_v48 = vrot.slane %v5074_v34, 7  ;;  %v1290_v62 = vsel %vm5090_vm12, %v4158_v26, %v1289_v27 }
  0x5a   : > { %v5082_v43 = vld [vmem:[#allocation2 + $0x68] sm:$0xc]  ;;  %v4602_v45 = vld [vmem:[%s6598_s2 + $0x78] sm:$0xff]   ;;  %v4270_v49 = vrot.slane %v5076_v35, 11  ;;  %v2064_v53 = vrot.slane %v5078_v36, 7  ;;  %v4166_v54 = vrot.slane %v1319_v37, 10  ;;  %v1294_v63 = vsel %vm5090_vm12, %v4159_v28, %v1293_v30 }
  0x5b   : > { %944 = vrot.lane.b32.xlu0 %v4571_v50, %s4707_s30  ;;  %v5096_v50 = vld [vmem:[#allocation2 + $0x6c] sm:$0x3]  ;;  %v5098_v51 = vld [vmem:[#allocation2 + $0x78] sm:$0xc]  ;;  %v1353_v55 = vrot.slane %v1320_v38, 6  ;;  %v4167_v56 = vrot.slane %v1321_v39, 10  ;;  %1892 = vmatpush1.bf16.msra.mxu0 %v4602_v45  ;;  %v4206_v13 = vcombine.low %v1290_v62, %v1294_v63  ;;  %v2061_v30 = vsel %vm4940_vm9, %v4269_v41, %v2060_v48 }
  0x5c   : > { %916 = vrot.lane.b32.xlu1 %v4127_v1, %s4710_s10  ;;  %v4575_v52 = vld [vmem:[#allocation2 + $0xe8] ss:$16 sps:$4 sm:$0xff]   ;;  %v2090_v44 = vld [vmem:[#allocation2 + $0x64] sm:$0xe]  ;;  %v1357_v58 = vrot.slane %v1322_v42, 6  ;;  %v4174_v60 = vrot.slane %v5082_v43, 10  ;;  %1893 = vmatprep.subr.bf16.mxu0 %v6604_v0  ;;  %v2065_v31 = vsel %vm4940_vm9, %v4270_v49, %v2064_v53 }
  0x5d   : > { %v4574_v57 = vld [vmem:[#allocation2 + $0x28] ss:$16 sps:$4 sm:$0xff]   ;;  %v1386_v59 = vld [vmem:[#allocation2 + $0x7c] sm:$0x3]  ;;  %v1417_v1 = vrot.slane %v5096_v50, 6  ;;  %v4277_v6 = vrot.slane %v2090_v44, 9  ;;  %v1354_v14 = vsel %vm5090_vm12, %v4166_v54, %v1353_v55  ;;  %v4317_v41 = vcombine.low %v2061_v30, %v2065_v31 }
  0x5e   : > { %v2091_v61 = vld [vmem:[#allocation2 + $0x68] sm:$0x1]  ;;  %v2093_v5 = vld [vmem:[#allocation2 + $0x78] sm:$0x1]  ;;  %v2154_v8 = vld [vmem:[#allocation2 + $0x68] sm:$0x8]  ;;  %v1358_v19 = vsel %vm5090_vm12, %v4167_v56, %v1357_v58 }
  0x5f   : > { %850 = vrot.lane.b32.xlu0 %v4116_v7, %s4705_s20  ;;  %v2124_v7 = vrot.slane %v2091_v61, 5  ;;  %v2155_v9 = vld [vmem:[#allocation2 + $0x6c] sm:$0x7]  ;;  %v2156_v10 = vld [vmem:[#allocation2 + $0x78] sm:$0x8]  ;;  %v2128_v16 = vrot.slane %v2093_v5, 5  ;;  %v4210_v39 = vcombine.low %v1354_v14, %v1358_v19  ;;  %v1418_v42 = vsel %vm5090_vm12, %v4174_v60, %v1417_v1 }
  0x60   : > { %830 = vrot.lane.b32.xlu1 %v4572_v2, %s4704_s12  ;;  %v4175_v2 = vrot.slane %v5098_v51, 10  ;;  %v2157_v11 = vld [vmem:[#allocation2 + $0x7c] sm:$0x7]  ;;  %v1448_v12 = vld [vmem:[#allocation2 + $0xa4] sm:$0xc]  ;;  %v1421_v20 = vrot.slane %v1386_v59, 6 }
  0x61   : > { %v1449_v17 = vld [vmem:[#allocation2 + $0xa8] sm:$0x3]  ;;  %v1450_v18 = vld [vmem:[#allocation2 + $0xb4] sm:$0xc]  ;;  %v4285_v21 = vrot.slane %v2154_v8, 11  ;;  %v2188_v22 = vrot.slane %v2155_v9, 7  ;;  %v2125_v35 = vsel %vm4908_vm5, %v4277_v6, %v2124_v7 }
  0x62   : > { %v4576_v24 = vld [vmem:[#allocation2 + $0x8] ss:$16 sps:$4 sm:$0xff]   ;;  %v4286_v25 = vrot.slane %v2156_v10, 11  ;;  %v2192_v26 = vrot.slane %v2157_v11, 7  ;;  %v4182_v27 = vrot.slane %v1448_v12, 10  ;;  %v1482_v28 = vrot.slane %v1449_v17, 6 }
  0x63   : > { %878 = vrot.lane.b32.xlu0 %v4573_v4, %s4706_s27  ;;  %v2092_v4 = vld [vmem:[#allocation2 + $0x74] sm:$0xe]  ;;  %v4183_v32 = vrot.slane %v1450_v18, 10  ;;  %v2219_v34 = vld [vmem:[#allocation2 + $0xc4] sm:$0xe]  ;;  %v1422_v43 = vsel %vm5090_vm12, %v4175_v2, %v1421_v20  ;;  %v2189_v51 = vsel %vm4940_vm9, %v4285_v21, %v2188_v22  ;;  %vm2863_vm7 = vcmask 122880  }
  0x64   : > { %870 = vrot.lane.b32.xlu1 %v4120_v23, %s4708_s5  ;;  %v4278_v15 = vrot.slane %v2092_v4, 9  ;;  %v1451_v23 = vld [vmem:[#allocation2 + $0xb8] sm:$0x3]  ;;  %v2220_v37 = vld [vmem:[#allocation2 + $0xc8] sm:$0x1]  ;;  %v1483_v53 = vsel %vm5090_vm12, %v4182_v27, %v1482_v28  ;;  %v4604_v60 = vld [vmem:[%s6598_s2 + $0x70] sm:$0xff]  }
  0x65   : > { %v1486_v33 = vrot.slane %v1451_v23, 6  ;;  %v2221_v38 = vld [vmem:[#allocation2 + $0xd4] sm:$0xe]  ;;  %v2253_v48 = vrot.slane %v2220_v37, 5  ;;  %v1259_v55 = vld [vmem:[#allocation2 + $0x48] sm:$0xc]  ;;  %1894 = vmatpush1.bf16.msra.mxu0 %v4604_v60 }
  0x66   : > { %v2129_v36 = vsel %vm4908_vm5, %v4278_v15, %v2128_v16  ;;  %v4294_v49 = vrot.slane %v2221_v38, 9  ;;  %v1260_v56 = vld [vmem:[#allocation2 + $0x4c] sm:$0x3]  ;;  %v1261_v44 = vld [vmem:[#allocation2 + $0x58] sm:$0xc]  ;;  %v4160_v4 = vrot.slane %v1259_v55, 10  ;;  %1895 = vmatprep.subr.bf16.mxu0 %v6604_v0 }
  0x67   : > { %918 = vrot.lane.b32.xlu0 %v4128_v46, %s4710_s10  ;;  %v4321_v45 = vcombine.low %v2125_v35, %v2129_v36  ;;  %v4293_v46 = vrot.slane %v2219_v34, 9  ;;  %v1487_v54 = vsel %vm5090_vm12, %v4183_v32, %v1486_v33  ;;  %v1262_v58 = vld [vmem:[#allocation2 + $0x5c] sm:$0x3]  ;;  %v5141_v59 = vld [vmem:[#allocation2 + $0x28] sm:$0x8]  ;;  %v1297_v5 = vrot.slane %v1260_v56, 6 }
  0x68   : > { %898 = vrot.lane.b32.xlu1 %v4124_v40, %s4709_s8  ;;  %v2222_v40 = vld [vmem:[#allocation2 + $0xd8] sm:$0x1]  ;;  %v5146_v61 = vld [vmem:[#allocation2 + $0x2c] sm:$0x7]  ;;  %v5148_v62 = vld [vmem:[#allocation2 + $0x38] sm:$0x8]  ;;  %v4218_v2 = vcombine.low %v1483_v53, %v1487_v54 }
  0x69   : > { %v2257_v50 = vrot.slane %v2222_v40, 5  ;;  %v5150_v63 = vld [vmem:[#allocation2 + $0x3c] sm:$0x7]  ;;  %v5152_v6 = vld [vmem:[#allocation2 + $0x84] sm:$0xc]  ;;  %v2254_v8 = vsel %vm4908_vm5, %v4293_v46, %v2253_v48  ;;  %v4161_v10 = vrot.slane %v1261_v44, 10  ;;  %v1298_v34 = vsel %vm5090_vm12, %v4160_v4, %v1297_v5 }
  0x6a   : > { %v5154_v7 = vld [vmem:[#allocation2 + $0x88] sm:$0x3]  ;;  %v1301_v11 = vrot.slane %v1262_v58, 6  ;;  %v1325_v12 = vld [vmem:[#allocation2 + $0x94] sm:$0xc]  ;;  %v4271_v14 = vrot.slane %v5141_v59, 11 }
  0x6b   : > { %1616 = vrot.lane.b32.xlu0 %v4574_v57, %s4704_s12  ;;  %v4214_v57 = vcombine.low %v1418_v42, %v1422_v43  ;;  %v2258_v9 = vsel %vm4908_vm5, %v4294_v49, %v2257_v50  ;;  %v2068_v15 = vrot.slane %v5146_v61, 7  ;;  %v4272_v16 = vrot.slane %v5148_v62, 11  ;;  %v4577_v18 = vld [vmem:[#allocation2 + $0xa8] ss:$16 sps:$4 sm:$0xff]   ;;  %v2094_v27 = vld [vmem:[#allocation2 + $0x84] sm:$0xe] }
  0x6c   : > { %946 = vrot.lane.b32.xlu1 %v4575_v52, %s4707_s30  ;;  %v2193_v52 = vsel %vm4940_vm9, %v4286_v25, %v2192_v26  ;;  %v2072_v17 = vrot.slane %v5150_v63, 7  ;;  %v4168_v19 = vrot.slane %v5152_v6, 10  ;;  %v1361_v20 = vrot.slane %v5154_v7, 6  ;;  %v1387_v23 = vld [vmem:[#allocation2 + $0x88] sm:$0xc]  ;;  %s4714_s29 = smov [#allocation4]  }
  0x6d   : > { %v4325_v1 = vcombine.low %v2189_v51, %v2193_v52  ;;  %v4169_v21 = vrot.slane %v1325_v12, 10  ;;  %v1389_v25 = vld [vmem:[#allocation2 + $0x98] sm:$0xc]  ;;  %v1390_v26 = vld [vmem:[#allocation2 + $0x9c] sm:$0x3]  ;;  %v4329_v30 = vcombine.low %v2254_v8, %v2258_v9  ;;  %v1302_v35 = vsel %vm5090_vm12, %v4161_v10, %v1301_v11  ;;  %s4645_s6 = sshll.u32 %s4714_s29, 4  ;;  %s4646_s6 = int_to_ptr.vmem [resolvable:$false] %s4645_s6 }
  0x6e   : > { %v2095_v28 = vld [vmem:[#allocation2 + $0x88] sm:$0x1]  ;;  %v2096_v31 = vld [vmem:[#allocation2 + $0x94] sm:$0xe]  ;;  %v2097_v32 = vld [vmem:[#allocation2 + $0x98] sm:$0x1]  ;;  %v4207_v60 = vcombine.low %v1298_v34, %v1302_v35  ;;  %v2069_v61 = vsel %vm4940_vm9, %v4271_v14, %v2068_v15  ;;  %v2073_v62 = vsel %vm4940_vm9, %v4272_v16, %v2072_v17 }
  0x6f   : > { %2387 = vrot.lane.b32.xlu0 %v4576_v24, %s4704_s12  ;;  %v1388_v24 = vld [vmem:[#allocation2 + $0x8c] sm:$0x3]  ;;  %v5171_v33 = vld [vmem:[#allocation2 + $0x88] sm:$0x8]  ;;  %v5179_v37 = vld [vmem:[#allocation2 + $0x98] sm:$0x8] }
  0x70   : > { %1636 = vrot.lane.b32.xlu1 %v4206_v13, %s4705_s20  ;;  %v1326_v13 = vld [vmem:[#allocation2 + $0x98] sm:$0x3]  ;;  %v5177_v36 = vld [vmem:[#allocation2 + $0x8c] sm:$0x7]  ;;  %v2161_v38 = vld [vmem:[#allocation2 + $0x9c] sm:$0x7] }
  0x71   : > { %v1365_v22 = vrot.slane %v1326_v13, 6  ;;  %v4176_v40 = vrot.slane %v1387_v23, 10  ;;  %v4177_v42 = vrot.slane %v1389_v25, 10  ;;  %v1429_v43 = vrot.slane %v1390_v26, 6  ;;  %v1452_v55 = vld [vmem:[#allocation2 + $0xc4] sm:$0xc] }
  0x72   : > { %v4279_v46 = vrot.slane %v2094_v27, 9  ;;  %v2132_v48 = vrot.slane %v2095_v28, 5  ;;  %v4280_v49 = vrot.slane %v2096_v31, 9  ;;  %v2136_v50 = vrot.slane %v2097_v32, 5  ;;  %v1453_v56 = vld [vmem:[#allocation2 + $0xc8] sm:$0x3] }
  0x73   : > { %2407 = vrot.lane.b32.xlu0 %v4317_v41, %s4705_s20  ;;  %v1425_v41 = vrot.slane %v1388_v24, 6  ;;  %v4287_v51 = vrot.slane %v5171_v33, 11  ;;  %v2196_v52 = vrot.slane %v5177_v36, 7  ;;  %v4288_v53 = vrot.slane %v5179_v37, 11  ;;  %v1454_v44 = vld [vmem:[#allocation2 + $0xd4] sm:$0xc] }
  0x74   : > { %1656 = vrot.lane.b32.xlu1 %v4210_v39, %s4708_s5  ;;  %v4578_v39 = vld [vmem:[#allocation2 + $0x48] ss:$16 sps:$4 sm:$0xff]   ;;  %v2200_v54 = vrot.slane %v2161_v38, 7  ;;  %v5186_v59 = vld [vmem:[#allocation2 + $0xe4] sm:$0xe]  ;;  %v4184_v4 = vrot.slane %v1452_v55, 10  ;;  %v1430_v7 = vsel %vm5090_vm12, %v4177_v42, %v1429_v43  ;;  %v2133_v10 = vsel %vm4908_vm5, %v4279_v46, %v2132_v48 }
  0x75   : > { %v4580_v58 = vld [vmem:[#allocation2 + $0x28] ss:$16 sps:$4 sm:$0xff]   ;;  %v1490_v5 = vrot.slane %v1453_v56, 6  ;;  %v1426_v6 = vsel %vm5090_vm12, %v4176_v40, %v1425_v41  ;;  %v4185_v8 = vrot.slane %v1454_v44, 10  ;;  %v2137_v11 = vsel %vm4908_vm5, %v4280_v49, %v2136_v50  ;;  %v2225_v12 = vld [vmem:[#allocation2 + $0xf4] sm:$0xe] }
  0x76   : > { %v5193_v63 = vld [vmem:[#allocation2 + $0xe8] sm:$0x1]  ;;  %v2226_v13 = vld [vmem:[#allocation2 + $0xf8] sm:$0x1]  ;;  %v4295_v14 = vrot.slane %v5186_v59, 9  ;;  %v4215_v24 = vcombine.low %v1426_v6, %v1430_v7  ;;  %v4322_v25 = vcombine.low %v2133_v10, %v2137_v11  ;;  %v4296_v26 = vrot.slane %v2225_v12, 9 }
  0x77   : > { %1676 = vrot.lane.b32.xlu0 %v4214_v57, %s4709_s8  ;;  %v1455_v57 = vld [vmem:[#allocation2 + $0xd8] sm:$0x3]  ;;  %v2261_v15 = vrot.slane %v5193_v63, 5  ;;  %v5211_v17 = vld [vmem:[#allocation2 + $0x68] sm:$0xc]  ;;  %v2265_v27 = vrot.slane %v2226_v13, 5  ;;  %v2197_v31 = vsel %vm4940_vm9, %v4287_v51, %v2196_v52  ;;  %v2201_v32 = vsel %vm4940_vm9, %v4288_v53, %v2200_v54 }
  0x78   : > { %2427 = vrot.lane.b32.xlu1 %v4321_v45, %s4708_s5  ;;  %v4579_v45 = vld [vmem:[#allocation2 + $0xc8] ss:$16 sps:$4 sm:$0xff]   ;;  %v1494_v9 = vrot.slane %v1455_v57, 6  ;;  %v5222_v23 = vld [vmem:[#allocation2 + $0x4c] sm:$0x7]  ;;  %v4162_v33 = vrot.slane %v5211_v17, 10  ;;  %v1491_v41 = vsel %vm5090_vm12, %v4184_v4, %v1490_v5  ;;  %v4326_v54 = vcombine.low %v2197_v31, %v2201_v32 }
  0x79   : > { %v5224_v28 = vld [vmem:[#allocation2 + $0x58] sm:$0x8]  ;;  %v5234_v35 = vld [vmem:[#allocation2 + $0x58] sm:$0x7]  ;;  %v5236_v36 = vld [vmem:[#allocation2 + $0x44] sm:$0x8]  ;;  %v2262_v59 = vsel %vm4908_vm5, %v4295_v14, %v2261_v15 }
  0x7a   : > { %v2076_v40 = vrot.slane %v5222_v23, 7  ;;  %v1495_v42 = vsel %vm5090_vm12, %v4185_v8, %v1494_v9  ;;  %v4274_v43 = vrot.slane %v5224_v28, 11  ;;  %v5250_v46 = vld [vmem:[#allocation2 + $0x48] sm:$0x7]  ;;  %v5252_v48 = vld [vmem:[#allocation2 + $0x54] sm:$0x8] }
  0x7b   : > { %2447 = vrot.lane.b32.xlu0 %v4325_v1, %s4709_s8  ;;  %v1362_v1 = vsel %vm5090_vm12, %v4168_v19, %v1361_v20  ;;  %v5215_v19 = vld [vmem:[#allocation2 + $0x78] sm:$0xc]  ;;  %v4318_v20 = vcombine.low %v2069_v61, %v2073_v62  ;;  %v426_v49 = vrot.slane %v5234_v35, 7  ;;  %v4057_v50 = vrot.slane %v5236_v36, 11  ;;  %v1327_v51 = vld [vmem:[#allocation2 + $0xa4] sm:$0xc] }
  0x7c   : > { %1696 = vrot.lane.b32.xlu1 %v4218_v2, %s4710_s10  ;;  %v1366_v2 = vsel %vm5090_vm12, %v4169_v21, %v1365_v22  ;;  %v5218_v21 = vld [vmem:[#allocation2 + $0x7c] sm:$0x3]  ;;  %v5220_v22 = vld [vmem:[#allocation2 + $0x48] sm:$0x8]  ;;  %v4163_v37 = vrot.slane %v5215_v19, 10  ;;  %v4219_v55 = vcombine.low %v1491_v41, %v1495_v42  ;;  %v422_v56 = vrot.slane %v5250_v46, 7 }
  0x7d   : > { %v4211_v16 = vcombine.low %v1362_v1, %v1366_v2  ;;  %v1309_v38 = vrot.slane %v5218_v21, 6  ;;  %v1328_v52 = vld [vmem:[#allocation2 + $0xa8] sm:$0x3]  ;;  %v1329_v53 = vld [vmem:[#allocation2 + $0xb4] sm:$0xc]  ;;  %v4058_v44 = vrot.slane %v5252_v48, 11 }
  0x7e   : > { %v1330_v57 = vld [vmem:[#allocation2 + $0xb8] sm:$0x3]  ;;  %v4170_v61 = vrot.slane %v1327_v51, 10  ;;  %v1369_v62 = vrot.slane %v1328_v52, 6  ;;  %v5266_v63 = vld [vmem:[#allocation2 + $0xac] sm:$0x3] }
  0x7f   : > { %2467 = vrot.lane.b32.xlu0 %v4329_v30, %s4710_s10  ;;  %v5226_v30 = vld [vmem:[#allocation2 + $0x5c] sm:$0x7]  ;;  %v5268_v1 = vld [vmem:[#allocation2 + $0xb8] sm:$0xc]  ;;  %v4171_v4 = vrot.slane %v1329_v53, 10  ;;  %v4606_v7 = vld [vmem:[%s6598_s2 + $0x68] sm:$0xff]  }
  0x80   : > { %1724 = vrot.lane.b32.xlu1 %v4577_v18, %s4707_s30  ;;  %v5213_v18 = vld [vmem:[#allocation2 + $0x6c] sm:$0x3]  ;;  %v4582_v2 = vld [vmem:[#allocation2 + $0xc8] ss:$16 sps:$4 sm:$0xff]   ;;  %v5270_v5 = vld [vmem:[#allocation2 + $0xbc] sm:$0x3]  ;;  %1896 = vmatpush1.bf16.msra.mxu0 %v4606_v7 }
  0x81   : > { %v1305_v34 = vrot.slane %v5213_v18, 6  ;;  %v5272_v6 = vld [vmem:[#allocation2 + $0xa4] sm:$0xe]  ;;  %v1373_v8 = vrot.slane %v1330_v57, 6  ;;  %v5278_v10 = vld [vmem:[#allocation2 + $0xa8] sm:$0x1]  ;;  %1897 = vmatprep.subr.bf16.mxu0 %v6604_v0 }
  0x82   : > { %v5280_v11 = vld [vmem:[#allocation2 + $0xb4] sm:$0xe]  ;;  %v5283_v13 = vld [vmem:[#allocation2 + $0xb8] sm:$0x1]  ;;  %v1433_v14 = vrot.slane %v5266_v63, 6  ;;  %v4179_v15 = vrot.slane %v5268_v1, 10 }
  0x83   : > { %1618 = vrot.lane.b32.xlu0 %v4578_v39, %s4704_s12  ;;  %v4273_v39 = vrot.slane %v5220_v22, 11  ;;  %v4281_v17 = vrot.slane %v5272_v6, 9  ;;  %v4585_v18 = vld [vmem:[#allocation2 + $0xe8] ss:$16 sps:$4 sm:$0xff]   ;;  %v1306_v19 = vsel %vm5090_vm12, %v4162_v33, %v1305_v34  ;;  %v2140_v21 = vrot.slane %v5278_v10, 5  ;;  %v4608_v33 = vld [vmem:[%s6598_s2 + $0x60] sm:$0xff]  }
  0x84   : > { %2495 = vrot.lane.b32.xlu1 %v4579_v45, %s4707_s30  ;;  %v2080_v45 = vrot.slane %v5226_v30, 7  ;;  %v2144_v31 = vrot.slane %v5283_v13, 5  ;;  %v5302_v32 = vld [vmem:[#allocation2 + $0xb8] sm:$0x8]  ;;  %v5304_v41 = vld [vmem:[#allocation2 + $0xbc] sm:$0x7]  ;;  %1898 = vmatpush1.bf16.msra.mxu0 %v4608_v33 }
  0x85   : > { %v1456_v34 = vld [vmem:[#allocation2 + $0xe4] sm:$0xc]  ;;  %v1459_v51 = vld [vmem:[#allocation2 + $0xf8] sm:$0x3]  ;;  %v2077_v52 = vsel %vm4940_vm9, %v4273_v39, %v2076_v40  ;;  %v5329_v23 = vld [vmem:[#allocation2 + $0x108] sm:$0x1]  ;;  %1899 = vmatprep.subr.bf16.mxu0 %v6604_v0 }
  0x86   : > { %v2081_v53 = vsel %vm4940_vm9, %v4274_v43, %v2080_v45  ;;  %v5327_v57 = vld [vmem:[#allocation2 + $0x104] sm:$0xe]  ;;  %v5331_v22 = vld [vmem:[#allocation2 + $0x114] sm:$0xe]  ;;  %v4587_v30 = vld [vmem:[#allocation2 + $0x48] ss:$16 sps:$4 sm:$0xff]  }
  0x87   : > { %2389 = vrot.lane.b32.xlu0 %v4580_v58, %s4704_s12  ;;  %v5259_v58 = vld [vmem:[#allocation2 + $0xa8] sm:$0xc]  ;;  %v4290_v40 = vrot.slane %v5302_v32, 11  ;;  %v2208_v43 = vrot.slane %v5304_v41, 7  ;;  %v5338_v45 = vld [vmem:[#allocation2 + $0x118] sm:$0x1]  ;;  %v4319_v10 = vcombine.low %v2077_v52, %v2081_v53 }
  0x88   : > { %1638 = vrot.lane.b32.xlu1 %v4207_v60, %s4705_s20  ;;  %v2266_v60 = vsel %vm4908_vm5, %v4296_v26, %v2265_v27  ;;  %v4178_v9 = vrot.slane %v5259_v58, 10  ;;  %v5299_v26 = vld [vmem:[#allocation2 + $0xac] sm:$0x7]  ;;  %v4584_v27 = vld [vmem:[#allocation2 + $0x68] ss:$16 sps:$4 sm:$0xff]   ;;  %v4297_v1 = vrot.slane %v5327_v57, 9 }
  0x89   : > { %v4330_v12 = vcombine.low %v2262_v59, %v2266_v60  ;;  %v2204_v39 = vrot.slane %v5299_v26, 7  ;;  %v4186_v59 = vrot.slane %v1456_v34, 10  ;;  %v4610_v63 = vld [vmem:[%s6598_s2 + $0x58] sm:$0xff]   ;;  %v5349_v6 = vld [vmem:[#allocation2 + $0x64] sm:$0x8]  ;;  %v2209_v33 = vsel %vm4940_vm9, %v4290_v40, %v2208_v43  ;;  %s4647_s7 = scalar_lea.vmem %s4646_s6, 2048 }
  0x8a   : > { %v5351_v7 = vld [vmem:[#allocation2 + $0x68] sm:$0x7]  ;;  %1900 = vmatpush1.bf16.msra.mxu0 %v4610_v63  ;;  %v4059_v58 = vrot.slane %v5349_v6, 11  ;;  %v729_v48 = vld [vmem:[#allocation2 + $0x8c] sm:$0x1]  ;;  %vm2821_vm11 = vcmask 31744  }
  0x8b   : > { %2409 = vrot.lane.b32.xlu0 %v4318_v20, %s4705_s20  ;;  %v1310_v20 = vsel %vm5090_vm12, %v4163_v37, %v1309_v38  ;;  %v1457_v37 = vld [vmem:[#allocation2 + $0xe8] sm:$0x3]  ;;  %v1458_v38 = vld [vmem:[#allocation2 + $0xf4] sm:$0xc]  ;;  %1901 = vmatprep.subr.bf16.mxu0 %v6604_v0  ;;  %v430_v26 = vrot.slane %v5351_v7, 7 }
  0x8c   : > { %1658 = vrot.lane.b32.xlu1 %v4211_v16, %s4708_s5  ;;  %v1437_v16 = vrot.slane %v5270_v5, 6  ;;  %v4208_v42 = vcombine.low %v1306_v19, %v1310_v20  ;;  %v1498_v60 = vrot.slane %v1457_v37, 6  ;;  %v2273_v5 = vrot.slane %v5338_v45, 5  ;;  %v1268_v34 = vld [vmem:[#allocation2 + $0x8c] sm:$0x3] }
  0x8d   : > { %v2141_v20 = vsel %vm4908_vm5, %v4281_v17, %v2140_v21  ;;  %v728_v17 = vld [vmem:[#allocation2 + $0x88] sm:$0xe]  ;;  %v731_v21 = vld [vmem:[#allocation2 + $0x9c] sm:$0x1]  ;;  %v1269_v37 = vld [vmem:[#allocation2 + $0x98] sm:$0xc] }
  0x8e   : > { %v1438_v13 = vsel %vm5090_vm12, %v4179_v15, %v1437_v16  ;;  %v4165_v43 = vrot.slane %v1269_v37, 10  ;;  %v1331_v7 = vld [vmem:[#allocation2 + $0xc4] sm:$0xc] }
  0x8f   : > { %1678 = vrot.lane.b32.xlu0 %v4215_v24, %s4709_s8  ;;  %v4282_v24 = vrot.slane %v5280_v11, 9  ;;  %v5366_v19 = vpop.permute.xlu0 %824 }
  0x90   : > { %2429 = vrot.lane.b32.xlu1 %v4322_v25, %s4708_s5  ;;  %v5297_v25 = vld [vmem:[#allocation2 + $0xa8] sm:$0x8] }
  0x91   : > { %v4289_v28 = vrot.slane %v5297_v25, 11  ;;  %v2145_v25 = vsel %vm4908_vm5, %v4282_v24, %v2144_v31  ;;  %v1267_v31 = vld [vmem:[#allocation2 + $0x88] sm:$0xc] }
  0x92   : > { %v4323_v36 = vcombine.low %v2141_v20, %v2145_v25  ;;  %v4164_v53 = vrot.slane %v1267_v31, 10 }
  0x93   : > { %2449 = vrot.lane.b32.xlu0 %v4326_v54, %s4709_s8  ;;  %v1370_v54 = vsel %vm5090_vm12, %v4170_v61, %v1369_v62  ;;  %v4187_v61 = vrot.slane %v1458_v38, 10  ;;  %v1502_v62 = vrot.slane %v1459_v51, 6  ;;  %v2205_v41 = vsel %vm4940_vm9, %v4289_v28, %v2204_v39  ;;  %v1270_v38 = vld [vmem:[#allocation2 + $0x9c] sm:$0x3] }
  0x94   : > { %1698 = vrot.lane.b32.xlu1 %v4219_v55, %s4710_s10  ;;  %v1374_v55 = vsel %vm5090_vm12, %v4171_v4, %v1373_v8  ;;  %v4298_v4 = vrot.slane %v5331_v22, 9  ;;  %v5353_v8 = vld [vmem:[#allocation2 + $0x74] sm:$0x8] }
  0x95   : > { %v4212_v11 = vcombine.low %v1370_v54, %v1374_v55  ;;  %v4060_v15 = vrot.slane %v5353_v8, 11  ;;  %v1503_v35 = vsel %vm5090_vm12, %v4187_v61, %v1502_v62  ;;  %v1313_v54 = vrot.slane %v1268_v34, 6  ;;  %v2038_v55 = vld [vmem:[#allocation2 + $0x68] sm:$0x8]  ;;  %v2041_v61 = vld [vmem:[#allocation2 + $0x7c] sm:$0x7] }
  0x96   : > { %v4327_v62 = vcombine.low %v2205_v41, %v2209_v33  ;;  %v4275_v6 = vrot.slane %v2038_v55, 11  ;;  %v2274_v8 = vsel %vm4908_vm5, %v4298_v4, %v2273_v5  ;;  %v2088_v4 = vrot.slane %v2041_v61, 7  ;;  %v1334_v5 = vld [vmem:[#allocation2 + $0xd8] sm:$0x3]  ;;  %v2102_v34 = vld [vmem:[#allocation2 + $0xc4] sm:$0xe] }
  0x97   : > { %2469 = vrot.lane.b32.xlu0 %v4330_v12, %s4710_s10  ;;  %v1434_v12 = vsel %vm5090_vm12, %v4178_v9, %v1433_v14  ;;  %v423_v9 = vsel %vm4940_vm9, %v4057_v50, %v422_v56  ;;  %v427_v14 = vsel %vm4940_vm9, %v4058_v44, %v426_v49  ;;  %v1499_v50 = vsel %vm5090_vm12, %v4186_v59, %v1498_v60  ;;  %v730_v56 = vld [vmem:[#allocation2 + $0x98] sm:$0xe]  ;;  %v2104_v55 = vld [vmem:[#allocation2 + $0xd4] sm:$0xe] }
  0x98   : > { %1726 = vrot.lane.b32.xlu1 %v4582_v2, %s4707_s30  ;;  %v2269_v2 = vrot.slane %v5329_v23, 5  ;;  %v4216_v46 = vcombine.low %v1434_v12, %v1438_v13  ;;  %v4097_v49 = vrot.slane %v728_v17, 9  ;;  %v762_v44 = vrot.slane %v729_v48, 5  ;;  %v2040_v60 = vld [vmem:[#allocation2 + $0x78] sm:$0x8] }
  0x99   : > { %v4098_v24 = vrot.slane %v730_v56, 9  ;;  %v4105_v32 = vcombine.low %v423_v9, %v427_v14  ;;  %v4220_v39 = vcombine.low %v1499_v50, %v1503_v35  ;;  %v1317_v59 = vrot.slane %v1270_v38, 6  ;;  %v4592_v23 = vld [vmem:[#allocation2 + $0xe8] ss:$16 sps:$4 sm:$0xff]   ;;  %v1396_v9 = vld [vmem:[#allocation2 + $0xcc] sm:$0x3] }
  0x9a   : > { %v763_v51 = vsel %vm4908_vm5, %v4097_v49, %v762_v44  ;;  %v2270_v63 = vsel %vm4908_vm5, %v4297_v1, %v2269_v2  ;;  %v4276_v1 = vrot.slane %v2040_v60, 11  ;;  %v1332_v2 = vld [vmem:[#allocation2 + $0xc8] sm:$0x3]  ;;  %v4172_v12 = vrot.slane %v1331_v7, 10  ;;  %v1395_v13 = vld [vmem:[#allocation2 + $0xc8] sm:$0xc] }
  0x9b   : > { %1620 = vrot.lane.b32.xlu0 %v4584_v27, %s4704_s12  ;;  %v766_v27 = vrot.slane %v731_v21, 5  ;;  %v962_v45 = vsel %vm306_vm8, %v4105_v32, %v5366_v19  ;;  %v5434_v25 = vsel %vm5090_vm12, %v4164_v53, %v1313_v54  ;;  %v5438_v19 = vsel %vm5090_vm12, %v4165_v43, %v1317_v59  ;;  %v1397_v14 = vld [vmem:[#allocation2 + $0xd8] sm:$0xc]  ;;  %v1398_v17 = vld [vmem:[#allocation2 + $0xdc] sm:$0x3] }
  0x9c   : > { %2497 = vrot.lane.b32.xlu1 %v4585_v18, %s4707_s30  ;;  %v5363_v18 = vld [vmem:[#allocation2 + $0x78] sm:$0x7]  ;;  %v4180_v56 = vrot.slane %v1395_v13, 10  ;;  %v1441_v21 = vrot.slane %v1396_v9, 6  ;;  %v394_v49 = vld [vmem:[#allocation2 + $0x88] sm:$0x7] }
  0x9d   : > { %v434_v16 = vrot.slane %v5363_v18, 7  ;;  %v767_v52 = vsel %vm4908_vm5, %v4098_v24, %v766_v27  ;;  %v4595_v48 = vld [vmem:[#allocation2 + $0x108] ss:$16 sps:$4 sm:$0xff]   ;;  %v5449_v44 = vld [vmem:[#allocation2 + $0x94] sm:$0x8]  ;;  %v4209_v27 = vcombine.low %v5434_v25, %v5438_v19  ;;  %v4181_v32 = vrot.slane %v1397_v14, 10 }
  0x9e   : > { %v4133_v40 = vcombine.low %v763_v51, %v767_v52  ;;  %v4594_v24 = vld [vmem:[#allocation2 + $0x88] ss:$16 sps:$4 sm:$0xff]   ;;  %v1445_v41 = vrot.slane %v1398_v17, 6  ;;  %v438_v53 = vrot.slane %v394_v49, 7  ;;  %v5488_v7 = vld [vmem:[#allocation2 + $0xcc] sm:$0x7] }
  0x9f   : > { %2391 = vrot.lane.b32.xlu0 %v4587_v30, %s4704_s12  ;;  %v2039_v30 = vld [vmem:[#allocation2 + $0x6c] sm:$0x7]  ;;  %v5427_v22 = vsel %vm4940_vm9, %v4060_v15, %v434_v16  ;;  %v4331_v15 = vcombine.low %v2270_v63, %v2274_v8  ;;  %v1381_v16 = vrot.slane %v1334_v5, 6  ;;  %v5457_v33 = vld [vmem:[#allocation2 + $0x98] sm:$0x7]  ;;  %v4283_v63 = vrot.slane %v2102_v34, 9 }
  0xa0   : > { %1640 = vrot.lane.b32.xlu1 %v4208_v42, %s4705_s20  ;;  %4146 = vmatprep.mubr.msk.bf16.mxu1 %vm306_vm8, %v4133_v40  ;;  %v2084_v57 = vrot.slane %v2039_v30, 7  ;;  %v2103_v54 = vld [vmem:[#allocation2 + $0xc8] sm:$0x1]  ;;  %v4062_v40 = vrot.slane %v5449_v44, 11  ;;  %v442_v43 = vrot.slane %v5457_v33, 7  ;;  %v4607_v33 = vld [vmem:[%s6598_s2 + $0xb8] sm:$0xff]  }
  0xa1   : > { %v2105_v59 = vld [vmem:[#allocation2 + $0xd8] sm:$0x1]  ;;  %v5480_v60 = vld [vmem:[#allocation2 + $0xc8] sm:$0x8]  ;;  %v5490_v8 = vld [vmem:[#allocation2 + $0xd8] sm:$0x8] }
  0xa2   : > { %v5455_v31 = vsel %vm4940_vm9, %v4275_v6, %v2084_v57  ;;  %v2148_v6 = vrot.slane %v2103_v54, 5  ;;  %v4284_v57 = vrot.slane %v2104_v55, 9  ;;  %v732_v9 = vld [vmem:[#allocation2 + $0xa8] sm:$0xe]  ;;  %v733_v14 = vld [vmem:[#allocation2 + $0xac] sm:$0x1] }
  0xa3   : > { %2411 = vrot.lane.b32.xlu0 %v4319_v10, %s4705_s20  ;;  %v5420_v10 = vsel %vm4940_vm9, %v4059_v58, %v430_v26  ;;  %v1377_v58 = vrot.slane %v1332_v2, 6  ;;  %v5496_v2 = vld [vmem:[#allocation2 + $0xdc] sm:$0x7]  ;;  %v734_v17 = vld [vmem:[#allocation2 + $0xb8] sm:$0xe] }
  0xa4   : > { %1660 = vrot.lane.b32.xlu1 %v4212_v11, %s4708_s5  ;;  %v1333_v11 = vld [vmem:[#allocation2 + $0xd4] sm:$0xc]  ;;  %v4106_v35 = vcombine.low %v5420_v10, %v5427_v22  ;;  %v4597_v10 = vld [vmem:[#allocation2 + $0x68] ss:$16 sps:$4 sm:$0xff]   ;;  %v4100_v34 = vrot.slane %v734_v17, 9 }
  0xa5   : > { %v845_v42 = vpop.permute.xlu0 %844  ;;  %v4173_v26 = vrot.slane %v1333_v11, 10  ;;  %v5468_v51 = vsel %vm5090_vm12, %v4172_v12, %v1377_v58  ;;  %v4291_v11 = vrot.slane %v5480_v60, 11  ;;  %v4614_v22 = vld [vmem:[%s6598_s2 + $0x48] sm:$0xff]   ;;  %v2212_v58 = vrot.slane %v5488_v7, 7 }
  0xa6   : > { %v974_v50 = vsel %vm972_vm13, %v962_v45, %v845_v42  ;;  %v5464_v42 = vsel %vm4940_vm9, %v4276_v1, %v2088_v4  ;;  %v2152_v1 = vrot.slane %v2105_v59, 5  ;;  %v4603_v45 = vld [vmem:[%s6598_s2 + $0xc8] sm:$0xff]   ;;  %v2231_v59 = vld [vmem:[#allocation2 + $0x124] sm:$0xe]  ;;  %v443_v7 = vsel %vm4940_vm9, %v4062_v40, %v442_v43 }
  0xa7   : > { %1680 = vrot.lane.b32.xlu0 %v4216_v46, %s4709_s8  ;;  %v5441_v46 = vld [vmem:[#allocation2 + $0x84] sm:$0x8]  ;;  %v4320_v13 = vcombine.low %v5455_v31, %v5464_v42  ;;  %v1461_v49 = vld [vmem:[#allocation2 + $0x108] sm:$0x3] }
  0xa8   : > { %2431 = vrot.lane.b32.xlu1 %v4323_v36, %s4708_s5  ;;  %v4612_v36 = vld [vmem:[%s6598_s2 + $0x50] sm:$0xff]   ;;  %v4061_v52 = vrot.slane %v5441_v46, 11  ;;  %v735_v46 = vld [vmem:[#allocation2 + $0xbc] sm:$0x1]  ;;  %v2153_v55 = vsel %vm4908_vm5, %v4284_v57, %v2152_v1  ;;  %v2234_v57 = vld [vmem:[#allocation2 + $0x138] sm:$0x1] }
  0xa9   : > { %1902 = vmatpush1.bf16.msra.mxu0 %v4612_v36  ;;  %v4099_v36 = vrot.slane %v732_v9, 9  ;;  %v736_v9 = vld [vmem:[#allocation2 + $0xc8] sm:$0xe] }
  0xaa   : > { %v5403_v28 = vpop.permute.xlu1 %872  ;;  %1903 = vmatprep.subr.bf16.mxu0 %v6604_v0 }
  0xab   : > { %2451 = vrot.lane.b32.xlu0 %v4327_v62, %s4709_s8  ;;  %v5486_v62 = vsel %vm5090_vm12, %v4180_v56, %v1441_v21  ;;  %v770_v56 = vrot.slane %v733_v14, 5  ;;  %v1460_v21 = vld [vmem:[#allocation2 + $0x104] sm:$0xc]  ;;  %v738_v14 = vld [vmem:[#allocation2 + $0xd8] sm:$0xe] }
  0xac   : > { %1700 = vrot.lane.b32.xlu1 %v4220_v39, %s4710_s10  ;;  %v5476_v39 = vsel %vm5090_vm12, %v4173_v26, %v1381_v16  ;;  %v4292_v26 = vrot.slane %v5490_v8, 11  ;;  %v2216_v16 = vrot.slane %v5496_v2, 7  ;;  %v2213_v2 = vsel %vm4940_vm9, %v4291_v11, %v2212_v58 }
  0xad   : > { %v5429_v18 = vpop.permute.xlu0 %940  ;;  %1904 = vmatpush1.bf16.msra.mxu0 %v4614_v22  ;;  %v2281_v58 = vrot.slane %v2234_v57, 5 }
  0xae   : > { %v827_v20 = vpop.permute.xlu1 %826  ;;  %1919 = vmatprep.subr.bf16.mxu0 %v6604_v0  ;;  %v2217_v43 = vsel %vm4940_vm9, %v4292_v26, %v2216_v16  ;;  %v737_v26 = vld [vmem:[#allocation2 + $0xcc] sm:$0x1]  ;;  %v4101_v16 = vrot.slane %v736_v9, 9 }
  0xaf   : > { %2471 = vrot.lane.b32.xlu0 %v4331_v15, %s4710_s10  ;;  %v965_v4 = vsel %vm306_vm8, %v4106_v35, %v827_v20  ;;  %v4213_v20 = vcombine.low %v5468_v51, %v5476_v39  ;;  %v1462_v51 = vld [vmem:[#allocation2 + $0x114] sm:$0xc]  ;;  %v1506_v39 = vrot.slane %v1461_v49, 6  ;;  %v778_v17 = vrot.slane %v737_v26, 5 }
  0xb0   : > { %1728 = vrot.lane.b32.xlu1 %v4592_v23, %s4707_s30  ;;  %v5494_v23 = vsel %vm5090_vm12, %v4181_v32, %v1445_v41  ;;  %v2149_v41 = vsel %vm4908_vm5, %v4283_v63, %v2148_v6  ;;  %v4189_v25 = vrot.slane %v1462_v51, 10  ;;  %v4605_v63 = vld [vmem:[%s6598_s2 + $0xc0] sm:$0xff]   ;;  %v400_v51 = vld [vmem:[#allocation2 + $0xb8] sm:$0x7] }
  0xb1   : > { %v5459_v37 = vpop.permute.xlu0 %874  ;;  %v4217_v35 = vcombine.low %v5486_v62, %v5494_v23  ;;  %v4324_v1 = vcombine.low %v2149_v41, %v2153_v55  ;;  %v779_v49 = vsel %vm4908_vm5, %v4101_v16, %v778_v17  ;;  %v4609_v41 = vld [vmem:[%s6598_s2 + $0xb0] sm:$0xff]  }
  0xb2   : > { %v865_v38 = vpop.permute.xlu1 %864  ;;  %v4617_v16 = vld [vmem:[%s6598_s2 + $0x90] sm:$0xff]  }
  0xb3   : > { %v983_v30 = vsel %vm981_vm14, %v974_v50, %v865_v38  ;;  %1622 = vrot.lane.b32.xlu0 %v4594_v24, %s4704_s12  ;;  %v4616_v24 = vld [vmem:[%s6598_s2 + $0x88] sm:$0xff]   ;;  %v774_v38 = vrot.slane %v735_v46, 5  ;;  %v4102_v46 = vrot.slane %v738_v14, 9 }
  0xb4   : > { %v992_v61 = vsel %vm990_vm15, %v983_v30, %v5403_v28  ;;  %2499 = vrot.lane.b32.xlu1 %v4595_v48, %s4707_s30  ;;  %v5521_v48 = vsel %vm4940_vm9, %v4061_v52, %v438_v53  ;;  %v1463_v52 = vld [vmem:[#allocation2 + $0x118] sm:$0x3]  ;;  %v4188_v30 = vrot.slane %v1460_v21, 10  ;;  %1920 = vmatpush2.bf16.msra.mxu0 %v4616_v24  ;;  %v397_v24 = vld [vmem:[#allocation2 + $0xa4] sm:$0x8] }
  0xb5   : > { %v893_v5 = vpop.permute.xlu0 %892  ;;  %v1510_v19 = vrot.slane %v1463_v52, 6  ;;  %3884 = vmatprep.subr.bf16.mxu0 %v6604_v0  ;;  %v4107_v42 = vcombine.low %v5521_v48, %v443_v7  ;;  %v741_v7 = vld [vmem:[#allocation2 + $0xec] sm:$0x1] }
  0xb6   : > { %v913_v12 = vpop.permute.xlu1 %912  ;;  %v1001_v15 = vsel %vm999_vm1, %v992_v61, %v893_v5  ;;  %v775_v61 = vsel %vm4908_vm5, %v4100_v34, %v774_v38  ;;  %v1507_v11 = vsel %vm5090_vm12, %v4188_v30, %v1506_v39  ;;  %v399_v38 = vld [vmem:[#allocation2 + $0xb4] sm:$0x8]  ;;  %v4600_v30 = vld [vmem:[#allocation2 + $0x128] ss:$16 sps:$4 sm:$0xff]   ;;  %v4063_v39 = vrot.slane %v397_v24, 11 }
  0xb7   : > { %v1010_v50 = vsel %vm1008_vm2, %v1001_v15, %v913_v12  ;;  %2393 = vrot.lane.b32.xlu0 %v4597_v10, %s4704_s12  ;;  %v2233_v10 = vld [vmem:[#allocation2 + $0x134] sm:$0xe]  ;;  %v1511_v5 = vsel %vm5090_vm12, %v4189_v25, %v1510_v19  ;;  %v739_v15 = vld [vmem:[#allocation2 + $0xdc] sm:$0x1]  ;;  %v4064_v25 = vrot.slane %v399_v38, 11  ;;  %v450_v19 = vrot.slane %v400_v51, 7 }
  0xb8   : > { %v1019_v32 = vsel %vm1017_vm3, %v1010_v50, %v5429_v18  ;;  %1642 = vrot.lane.b32.xlu1 %v4209_v27, %s4705_s20  ;;  %v771_v18 = vsel %vm4908_vm5, %v4099_v36, %v770_v56  ;;  %v2232_v27 = vld [vmem:[#allocation2 + $0x128] sm:$0x1]  ;;  %v4300_v12 = vrot.slane %v2233_v10, 9  ;;  %v782_v31 = vrot.slane %v739_v15, 5  ;;  %v743_v10 = vld [vmem:[#allocation2 + $0xfc] sm:$0x1] }
  0xb9   : > { %v847_v53 = vpop.permute.xlu0 %846  ;;  %1147 = vmatmul.mubr.bf16.vlgmr.msra.gmra.mxu1 %v1019_v32  ;;  %v4134_v8 = vcombine.low %v771_v18, %v775_v61  ;;  %v2277_v22 = vrot.slane %v2232_v27, 5  ;;  %v4221_v50 = vcombine.low %v1507_v11, %v1511_v5  ;;  %v398_v32 = vld [vmem:[#allocation2 + $0xa8] sm:$0x7]  ;;  %v4613_v27 = vld [vmem:[%s6598_s2 + $0xa0] sm:$0xff]   ;;  %v4615_v5 = vld [vmem:[%s6598_s2 + $0x98] sm:$0xff]  }
  0xba   : > { %v867_v54 = vpop.permute.xlu1 %866  ;;  %v976_v60 = vsel %vm972_vm13, %v965_v4, %v847_v53  ;;  %2661 = vmatpush1.bf16.msra.mxu1 %v4603_v45  ;;  %v4299_v45 = vrot.slane %v2231_v59, 9  ;;  %v783_v48 = vsel %vm4908_vm5, %v4102_v46, %v782_v31  ;;  %v2282_v23 = vsel %vm4908_vm5, %v4300_v12, %v2281_v58  ;;  %v4611_v18 = vld [vmem:[%s6598_s2 + $0xa8] sm:$0xff]   ;;  %v1182_v38 = vld [vmem:[#allocation2 + $0x34] sm:$0xc] }
  0xbb   : > { %v985_v6 = vsel %vm981_vm14, %v976_v60, %v867_v54  ;;  %2662 = vmatprep.subr.bf16.mxu1 %v6604_v0  ;;  %4147 = vmatprep.mubr.msk.bf16.mxu1 %vm306_vm8, %v4134_v8  ;;  %v4135_v34 = vcombine.low %v779_v49, %v783_v48  ;;  %v446_v59 = vrot.slane %v398_v32, 7  ;;  %v742_v8 = vld [vmem:[#allocation2 + $0xf8] sm:$0xe] }
  0xbc   : > { %1662 = vrot.lane.b32.xlu1 %v4213_v20, %s4708_s5  ;;  %v994_v44 = vsel %vm990_vm15, %v985_v6, %v5459_v37  ;;  %2413 = vrot.lane.b32.xlu0 %v4320_v13, %s4705_s20  ;;  %v4328_v13 = vcombine.low %v2213_v2, %v2217_v43  ;;  %v2278_v62 = vsel %vm4908_vm5, %v4299_v45, %v2277_v22  ;;  %v740_v6 = vld [vmem:[#allocation2 + $0xe8] sm:$0xe]  ;;  %v786_v2 = vrot.slane %v741_v7, 5 }
  0xbd   : > { %v915_v20 = vpop.permute.xlu0 %914  ;;  %v4332_v55 = vcombine.low %v2278_v62, %v2282_v23  ;;  %v4104_v45 = vrot.slane %v742_v8, 9  ;;  %v451_v43 = vsel %vm4940_vm9, %v4064_v25, %v450_v19  ;;  %v1181_v62 = vld [vmem:[#allocation2 + $0x28] sm:$0x3]  ;;  %v4618_v23 = vld [vmem:[%s6598_s2 + $0xd0] sm:$0xff]  }
  0xbe   : > { %v895_v40 = vpop.permute.xlu1 %894  ;;  %2663 = vmatpush1.bf16.msra.mxu1 %v4605_v63 }
  0xbf   : > { %v1003_v4 = vsel %vm999_vm1, %v994_v44, %v895_v40  ;;  %2664 = vmatprep.subr.bf16.mxu1 %v6604_v0  ;;  %v790_v44 = vrot.slane %v743_v10, 5  ;;  %v447_v40 = vsel %vm4940_vm9, %v4063_v39, %v446_v59  ;;  %v2293_v39 = vld [vmem:[#allocation2 + $0xd8] sm:$0x8]  ;;  %v2294_v59 = vld [vmem:[#allocation2 + $0xdc] sm:$0x7]  ;;  %v1217_v10 = vrot.slane %v1181_v62, 6 }
  0xc0   : > { %2433 = vrot.lane.b32.xlu1 %v4324_v1, %s4708_s5  ;;  %v1012_v56 = vsel %vm1008_vm2, %v1003_v4, %v915_v20  ;;  %1682 = vrot.lane.b32.xlu0 %v4217_v35, %s4709_s8  ;;  %v4598_v35 = vld [vmem:[#allocation2 + $0x108] ss:$16 sps:$4 sm:$0xff]   ;;  %v4103_v1 = vrot.slane %v740_v6, 9  ;;  %v4108_v15 = vcombine.low %v447_v40, %v451_v43  ;;  %v2329_v6 = vrot.slane %v2294_v59, 7 }
  0xc1   : > { %v829_v52 = vpop.permute.xlu0 %828  ;;  %v791_v4 = vsel %vm4908_vm5, %v4104_v45, %v790_v44  ;;  %v1956_v44 = vld [vmem:[#allocation2 + $0x14] sm:$0xe]  ;;  %v1957_v40 = vld [vmem:[#allocation2 + $0x18] sm:$0x1]  ;;  %v1185_v59 = vld [vmem:[#allocation2 + $0x48] sm:$0x3] }
  0xc2   : > { %v943_v36 = vpop.permute.xlu1 %942  ;;  %2665 = vmatpush1.bf16.msra.mxu1 %v4607_v33  ;;  %v968_v53 = vsel %vm306_vm8, %v4107_v42, %v829_v52  ;;  %v787_v11 = vsel %vm4908_vm5, %v4103_v1, %v786_v2  ;;  %v1520_v42 = vld [vmem:[#allocation2 + $0xa8] sm:$0xc]  ;;  %v1954_v2 = vld [vmem:[#allocation2 + $0x4] sm:$0xe] }
  0xc3   : > { %v1022_v21 = vsel %vm1017_vm3, %v1012_v56, %v943_v36  ;;  %2666 = vmatprep.subr.bf16.mxu1 %v6604_v0  ;;  %v4136_v9 = vcombine.low %v787_v11, %v791_v4  ;;  %v1522_v36 = vld [vmem:[#allocation2 + $0xb8] sm:$0xc]  ;;  %v4190_v56 = vrot.slane %v1520_v42, 10 }
  0xc4   : > { %1155 = vmatmul.mubr.bf16.gmra.mxu1 %v1022_v21  ;;  %1702 = vrot.lane.b32.xlu1 %v4221_v50, %s4710_s10  ;;  %v1523_v50 = vld [vmem:[#allocation2 + $0xbc] sm:$0x3]  ;;  %v4191_v49 = vrot.slane %v1522_v36, 10 }
  0xc5   : > { %4148 = vmatprep.mubr.msk.bf16.mxu1 %vm306_vm8, %v4135_v34  ;;  %2453 = vrot.lane.b32.xlu0 %v4328_v13, %s4709_s8  ;;  %v869_v60 = vpop.permute.xlu0 %868  ;;  %v1521_v13 = vld [vmem:[#allocation2 + $0xac] sm:$0x3]  ;;  %v1558_v48 = vrot.slane %v1523_v50, 6 }
  0xc6   : > { %v849_v54 = vpop.permute.xlu1 %848  ;;  %2667 = vmatpush1.bf16.msra.mxu1 %v4609_v41  ;;  %v1554_v21 = vrot.slane %v1521_v13, 6  ;;  %v1180_v41 = vld [vmem:[#allocation2 + $0x24] sm:$0xc]  ;;  %v1524_v13 = vld [vmem:[#allocation2 + $0xc8] sm:$0xc] }
  0xc7   : > { %2668 = vmatprep.subr.bf16.mxu1 %v6604_v0  ;;  %v978_v61 = vsel %vm972_vm13, %v968_v53, %v849_v54  ;;  %v1559_v52 = vsel %vm5090_vm12, %v4191_v49, %v1558_v48  ;;  %v1183_v53 = vld [vmem:[#allocation2 + $0x38] sm:$0x3]  ;;  %v1525_v50 = vld [vmem:[#allocation2 + $0xcc] sm:$0x3] }
  0xc8   : > { %1730 = vrot.lane.b32.xlu1 %v4598_v35, %s4707_s30  ;;  %v987_v57 = vsel %vm981_vm14, %v978_v61, %v869_v60  ;;  %v1555_v51 = vsel %vm5090_vm12, %v4190_v56, %v1554_v21  ;;  %v1221_v1 = vrot.slane %v1183_v53, 6  ;;  %v1526_v56 = vld [vmem:[#allocation2 + $0xd8] sm:$0xc]  ;;  %v1527_v21 = vld [vmem:[#allocation2 + $0xdc] sm:$0x3] }
  0xc9   : > { %2473 = vrot.lane.b32.xlu0 %v4332_v55, %s4710_s10  ;;  %v897_v22 = vpop.permute.xlu0 %896  ;;  %v4226_v54 = vcombine.low %v1555_v51, %v1559_v52  ;;  %v2291_v55 = vld [vmem:[#allocation2 + $0xc8] sm:$0x8]  ;;  %v4193_v62 = vrot.slane %v1526_v56, 10  ;;  %v2296_v52 = vld [vmem:[#allocation2 + $0xec] sm:$0x7] }
  0xca   : > { %v5609_v63 = vpop.permute.xlu1 %876  ;;  %2669 = vmatpush1.bf16.msra.mxu1 %v4611_v18  ;;  %v2292_v18 = vld [vmem:[#allocation2 + $0xcc] sm:$0x7]  ;;  %v4301_v60 = vrot.slane %v2291_v55, 11  ;;  %v2295_v51 = vld [vmem:[#allocation2 + $0xe8] sm:$0x8] }
  0xcb   : > { %2670 = vmatprep.subr.bf16.mxu1 %v6604_v0  ;;  %v996_v33 = vsel %vm990_vm15, %v987_v57, %v5609_v63  ;;  %4257 = vmatprep.mubr.msk.bf16.mxu0 %vm306_vm8, %v4226_v54  ;;  %v2325_v19 = vrot.slane %v2292_v18, 7  ;;  %v4151_v57 = vrot.slane %v1182_v38, 10  ;;  %v2297_v18 = vld [vmem:[#allocation2 + $0xf8] sm:$0x8] }
  0xcc   : > { %2501 = vrot.lane.b32.xlu1 %v4600_v30, %s4707_s30  ;;  %v1005_v12 = vsel %vm999_vm1, %v996_v33, %v897_v22  ;;  %v4150_v30 = vrot.slane %v1180_v41, 10  ;;  %v1955_v33 = vld [vmem:[#allocation2 + $0x8] sm:$0x1]  ;;  %v1562_v41 = vrot.slane %v1525_v50, 6 }
  0xcd   : > { %v945_v26 = vpop.permute.xlu0 %944  ;;  %v2326_v45 = vsel %vm4940_vm9, %v4301_v60, %v2325_v19  ;;  %v2333_v19 = vrot.slane %v2296_v52, 7  ;;  %v1529_v52 = vld [vmem:[#allocation2 + $0xec] sm:$0x3] }
  0xce   : > { %2671 = vmatpush1.bf16.msra.mxu1 %v4613_v27  ;;  %v917_v58 = vpop.permute.xlu1 %916  ;;  %v4302_v27 = vrot.slane %v2293_v39, 11  ;;  %v1184_v39 = vld [vmem:[#allocation2 + $0x44] sm:$0xc] }
  0xcf   : > { %2672 = vmatprep.subr.bf16.mxu1 %v6604_v0  ;;  %v1014_v14 = vsel %vm1008_vm2, %v1005_v12, %v917_v58  ;;  %v1222_v12 = vsel %vm5090_vm12, %v4151_v57, %v1221_v1  ;;  %v4304_v57 = vrot.slane %v2297_v18, 11 }
  0xd0   : > { %v1025_v20 = vsel %vm1017_vm3, %v1014_v14, %v945_v26  ;;  %v2330_v22 = vsel %vm4940_vm9, %v4302_v27, %v2329_v6  ;;  %v4261_v26 = vrot.slane %v1954_v2, 9  ;;  %v1988_v14 = vrot.slane %v1955_v33, 5 }
  0xd1   : > { %1163 = vmatmul.mubr.bf16.gmra.mxu1 %v1025_v20  ;;  %v851_v46 = vpop.permute.xlu0 %850  ;;  %v4337_v43 = vcombine.low %v2326_v45, %v2330_v22  ;;  %v1992_v20 = vrot.slane %v1957_v40, 5  ;;  %v4152_v22 = vrot.slane %v1184_v39, 10  ;;  %v1225_v33 = vrot.slane %v1185_v59, 6 }
  0xd2   : > { %v831_v17 = vpop.permute.xlu1 %830  ;;  %4149 = vmatprep.mubr.msk.bf16.mxu1 %vm306_vm8, %v4136_v9  ;;  %2673 = vmatpush1.bf16.msra.mxu1 %v4615_v5  ;;  %v1218_v5 = vsel %vm5090_vm12, %v4150_v30, %v1217_v10  ;;  %v2298_v30 = vld [vmem:[#allocation2 + $0xfc] sm:$0x7]  ;;  %v1187_v10 = vld [vmem:[#allocation2 + $0x58] sm:$0x3]  ;;  %v1570_v59 = vrot.slane %v1529_v52, 6 }
  0xd3   : > { %v971_v31 = vsel %vm306_vm8, %v4108_v15, %v831_v17  ;;  %2674 = vmatprep.subr.bf16.mxu1 %v6604_v0  ;;  %v4262_v15 = vrot.slane %v1956_v44, 9  ;;  %v4198_v17 = vcombine.low %v1218_v5, %v1222_v12  ;;  %v2337_v1 = vrot.slane %v2298_v30, 7 }
  0xd4   : > { %v980_v24 = vsel %vm972_vm13, %v971_v31, %v851_v46  ;;  %v1989_v31 = vsel %vm4908_vm5, %v4261_v26, %v1988_v14 }
  0xd5   : > { %v5642_v35 = vpop.permute.xlu0 %878  ;;  %v1993_v42 = vsel %vm4908_vm5, %v4262_v15, %v1992_v20  ;;  %v1958_v15 = vld [vmem:[#allocation2 + $0x24] sm:$0xe]  ;;  %v1959_v20 = vld [vmem:[#allocation2 + $0x28] sm:$0x1] }
  0xd6   : > { %v871_v32 = vpop.permute.xlu1 %870  ;;  %2675 = vmatpush1.bf16.msra.mxu1 %v4617_v16  ;;  %v4309_v48 = vcombine.low %v1989_v31, %v1993_v42 }
  0xd7   : > { %v989_v34 = vsel %vm981_vm14, %v980_v24, %v871_v32  ;;  %2690 = vmatprep.subr.bf16.mxu1 %v6604_v0  ;;  %v4192_v32 = vrot.slane %v1524_v13, 10  ;;  %v1226_v13 = vsel %vm5090_vm12, %v4152_v22, %v1225_v33 }
  0xd8   : > { %v998_v61 = vsel %vm990_vm15, %v989_v34, %v5642_v35 }
  0xd9   : > { %v919_v7 = vpop.permute.xlu0 %918  ;;  %v1563_v60 = vsel %vm5090_vm12, %v4192_v32, %v1562_v41 }
  0xda   : > { %v899_v25 = vpop.permute.xlu1 %898  ;;  %2691 = vmatpush2.bf16.msra.mxu1 %v4618_v23  ;;  %v1566_v23 = vrot.slane %v1527_v21, 6  ;;  %v4263_v21 = vrot.slane %v1958_v15, 9 }
  0xdb   : > { %v1007_v8 = vsel %vm999_vm1, %v998_v61, %v899_v25  ;;  %v4303_v25 = vrot.slane %v2295_v51, 11 }
  0xdc   : > { %v1016_v4 = vsel %vm1008_vm2, %v1007_v8, %v919_v7  ;;  %v1567_v61 = vsel %vm5090_vm12, %v4193_v62, %v1566_v23  ;;  %v1186_v8 = vld [vmem:[#allocation2 + $0x54] sm:$0xc] }
  0xdd   : > { %v1617_v58 = vpop.permute.xlu0 %1616  ;;  %v4153_v40 = vrot.slane %v1186_v8, 10 }
  0xde   : > { %v947_v11 = vpop.permute.xlu1 %946  ;;  %v1746_v49 = vsel %vm306_vm8, %v4198_v17, %v1617_v58  ;;  %v2334_v58 = vsel %vm4940_vm9, %v4303_v25, %v2333_v19  ;;  %v1961_v17 = vld [vmem:[#allocation2 + $0x38] sm:$0x1] }
  0xdf   : > { %v1028_v9 = vsel %vm1017_vm3, %v1016_v4, %v947_v11  ;;  %v4227_v11 = vcombine.low %v1563_v60, %v1567_v61 }
  0xe0   : > { %1171 = vmatmul.mubr.bf16.gmra.mxu1 %v1028_v9  ;;  %v2338_v9 = vsel %vm4940_vm9, %v4304_v57, %v2337_v1  ;;  %v2301_v57 = vld [vmem:[#allocation2 + $0x118] sm:$0x8]  ;;  %v2302_v1 = vld [vmem:[#allocation2 + $0x11c] sm:$0x7] }
  0xe1   : > { %4368 = vmatprep.mubr.msk.bf16.mxu1 %vm306_vm8, %v4337_v43  ;;  %v2388_v46 = vpop.permute.xlu0 %2387  ;;  %v1229_v43 = vrot.slane %v1187_v10, 6 }
  0xe2   : > { %v1637_v16 = vpop.permute.xlu1 %1636  ;;  %v2517_v53 = vsel %vm306_vm8, %v4309_v48, %v2388_v46 }
  0xe3   : > { %v1757_v34 = vsel %vm972_vm13, %v1746_v49, %v1637_v16  ;;  %v1960_v16 = vld [vmem:[#allocation2 + $0x34] sm:$0xe]  ;;  %v1996_v49 = vrot.slane %v1959_v20, 5 }
  0xe4   : > { %v4264_v48 = vrot.slane %v1960_v16, 9 }
  0xe5   : > { %v2408_v24 = vpop.permute.xlu0 %2407  ;;  %v1997_v23 = vsel %vm4908_vm5, %v4263_v21, %v1996_v49  ;;  %v1962_v49 = vld [vmem:[#allocation2 + $0x44] sm:$0xe] }
  0xe6   : > { %v1657_v36 = vpop.permute.xlu1 %1656  ;;  %v2528_v27 = vsel %vm972_vm13, %v2517_v53, %v2408_v24  ;;  %v2000_v24 = vrot.slane %v1961_v17, 5  ;;  %v1530_v53 = vld [vmem:[#allocation2 + $0xf8] sm:$0xc] }
  0xe7   : > { %v1765_v54 = vsel %vm981_vm14, %v1757_v34, %v1657_v36  ;;  %v1230_v36 = vsel %vm5090_vm12, %v4153_v40, %v1229_v43  ;;  %v4195_v60 = vrot.slane %v1530_v53, 10  ;;  %v4265_v53 = vrot.slane %v1962_v49, 9 }
  0xe8   : > { %v1772_v6 = vsel %vm990_vm15, %v1765_v54, %v5403_v28  ;;  %v4199_v41 = vcombine.low %v1226_v13, %v1230_v36  ;;  %v2001_v34 = vsel %vm4908_vm5, %v4264_v48, %v2000_v24  ;;  %v1531_v54 = vld [vmem:[#allocation2 + $0xfc] sm:$0x3]  ;;  %v1964_v24 = vld [vmem:[#allocation2 + $0x54] sm:$0xe] }
  0xe9   : > { %v1677_v55 = vpop.permute.xlu0 %1676  ;;  %v4310_v18 = vcombine.low %v1997_v23, %v2001_v34  ;;  %v1574_v61 = vrot.slane %v1531_v54, 6 }
  0xea   : > { %v2428_v38 = vpop.permute.xlu1 %2427  ;;  %v1777_v44 = vsel %vm999_vm1, %v1772_v6, %v1677_v55  ;;  %v2300_v6 = vld [vmem:[#allocation2 + $0x10c] sm:$0x7] }
  0xeb   : > { %v2536_v2 = vsel %vm981_vm14, %v2528_v27, %v2428_v38  ;;  %v1528_v38 = vld [vmem:[#allocation2 + $0xe8] sm:$0xc]  ;;  %v2341_v33 = vrot.slane %v2300_v6, 7 }
  0xec   : > { %v2543_v4 = vsel %vm990_vm15, %v2536_v2, %v5403_v28  ;;  %v4338_v28 = vcombine.low %v2334_v58, %v2338_v9  ;;  %v4194_v39 = vrot.slane %v1528_v38, 10  ;;  %v2299_v27 = vld [vmem:[#allocation2 + $0x108] sm:$0x8]  ;;  %v1189_v9 = vld [vmem:[#allocation2 + $0x68] sm:$0x3] }
  0xed   : > { %v2448_v45 = vpop.permute.xlu0 %2447  ;;  %v4305_v22 = vrot.slane %v2299_v27, 11  ;;  %v1233_v36 = vrot.slane %v1189_v9, 6  ;;  %v1533_v27 = vld [vmem:[#allocation2 + $0x10c] sm:$0x3] }
  0xee   : > { %v1697_v7 = vpop.permute.xlu1 %1696  ;;  %v2548_v46 = vsel %vm999_vm1, %v2543_v4, %v2448_v45  ;;  %v1571_v2 = vsel %vm5090_vm12, %v4194_v39, %v1570_v59  ;;  %v1575_v45 = vsel %vm5090_vm12, %v4195_v60, %v1574_v61  ;;  %v4306_v4 = vrot.slane %v2301_v57, 11  ;;  %v1535_v57 = vld [vmem:[#allocation2 + $0x11c] sm:$0x3] }
  0xef   : > { %v1785_v5 = vsel %vm1008_vm2, %v1777_v44, %v1697_v7  ;;  %v4228_v16 = vcombine.low %v1571_v2, %v1575_v45  ;;  %v1578_v2 = vrot.slane %v1533_v27, 6  ;;  %v2303_v45 = vld [vmem:[#allocation2 + $0x128] sm:$0x8] }
  0xf1   : > { %v2468_v26 = vpop.permute.xlu0 %2467 }
  0xf2   : > { %v1725_v12 = vpop.permute.xlu1 %1724  ;;  %v2556_v31 = vsel %vm1008_vm2, %v2548_v46, %v2468_v26  ;;  %v1190_v26 = vld [vmem:[#allocation2 + $0x74] sm:$0xc] }
  0xf3   : > { %v1793_v14 = vsel %vm1017_vm3, %v1785_v5, %v1725_v12  ;;  %v2345_v5 = vrot.slane %v2302_v1, 7 }
  0xf4   : > { %1922 = vmatmul.mubr.bf16.vlgmr.msra.gmra.mxu0 %v1793_v14  ;;  %v1191_v14 = vld [vmem:[#allocation2 + $0x78] sm:$0x3] }
  0xf5   : > { %4258 = vmatprep.mubr.msk.bf16.mxu0 %vm306_vm8, %v4227_v11  ;;  %v1619_v50 = vpop.permute.xlu0 %1618  ;;  %v1188_v11 = vld [vmem:[#allocation2 + $0x64] sm:$0xc] }
  0xf6   : > { %v2496_v42 = vpop.permute.xlu1 %2495  ;;  %v1749_v55 = vsel %vm306_vm8, %v4199_v41, %v1619_v50  ;;  %v4154_v20 = vrot.slane %v1188_v11, 10  ;;  %v4155_v50 = vrot.slane %v1190_v26, 10  ;;  %v2305_v11 = vld [vmem:[#allocation2 + $0x138] sm:$0x8]  ;;  %v4307_v26 = vrot.slane %v2303_v45, 11 }
  0xf7   : > { %v2564_v56 = vsel %vm1017_vm3, %v2556_v31, %v2496_v42  ;;  %v2342_v31 = vsel %vm4940_vm9, %v4305_v22, %v2341_v33  ;;  %v2346_v42 = vsel %vm4940_vm9, %v4306_v4, %v2345_v5 }
  0xf8   : > { %2693 = vmatmul.mubr.bf16.vlgmr.msra.gmra.mxu1 %v2564_v56  ;;  %v1237_v56 = vrot.slane %v1191_v14, 6  ;;  %v4339_v41 = vcombine.low %v2342_v31, %v2346_v42  ;;  %v1234_v34 = vsel %vm5090_vm12, %v4154_v20, %v1233_v36  ;;  %v1193_v36 = vld [vmem:[#allocation2 + $0x88] sm:$0x3] }
  0xf9   : > { %4369 = vmatprep.mubr.msk.bf16.mxu1 %vm306_vm8, %v4338_v28  ;;  %v2390_v62 = vpop.permute.xlu0 %2389 }
  0xfa   : > { %v1639_v32 = vpop.permute.xlu1 %1638  ;;  %v2520_v7 = vsel %vm306_vm8, %v4310_v18, %v2390_v62  ;;  %v1238_v38 = vsel %vm5090_vm12, %v4155_v50, %v1237_v56  ;;  %v1194_v50 = vld [vmem:[#allocation2 + $0x94] sm:$0xc]  ;;  %v1195_v56 = vld [vmem:[#allocation2 + $0x98] sm:$0x3] }
  0xfb   : > { %v1759_v25 = vsel %vm972_vm13, %v1749_v55, %v1639_v32  ;;  %v1965_v32 = vld [vmem:[#allocation2 + $0x58] sm:$0x1]  ;;  %v4266_v55 = vrot.slane %v1964_v24, 9  ;;  %v4200_v39 = vcombine.low %v1234_v34, %v1238_v38  ;;  %v1241_v34 = vrot.slane %v1193_v36, 6 }
  0xfc   : > { %v2008_v18 = vrot.slane %v1965_v32, 5  ;;  %v4157_v38 = vrot.slane %v1194_v50, 10 }
  0xfd   : > { %v2410_v30 = vpop.permute.xlu0 %2409 }
  0xfe   : > { %v1659_v51 = vpop.permute.xlu1 %1658  ;;  %v2530_v44 = vsel %vm972_vm13, %v2520_v7, %v2410_v30  ;;  %v2009_v61 = vsel %vm4908_vm5, %v4266_v55, %v2008_v18  ;;  %v1968_v55 = vld [vmem:[#allocation2 + $0x74] sm:$0xe]  ;;  %v1969_v18 = vld [vmem:[#allocation2 + $0x78] sm:$0x1] }
  0xff   : > { %v1767_v8 = vsel %vm981_vm14, %v1759_v25, %v1659_v51 }
 0x100   : > { %v1773_v40 = vsel %vm990_vm15, %v1767_v8, %v5459_v37 }
 0x101   : > { %v1679_v10 = vpop.permute.xlu0 %1678 }
 0x102   : > { %v2430_v19 = vpop.permute.xlu1 %2429  ;;  %v1779_v15 = vsel %vm999_vm1, %v1773_v40, %v1679_v10  ;;  %v1534_v10 = vld [vmem:[#allocation2 + $0x118] sm:$0xc]  ;;  %v1582_v40 = vrot.slane %v1535_v57, 6 }
 0x103   : > { %v2538_v12 = vsel %vm981_vm14, %v2530_v44, %v2430_v19  ;;  %v1532_v19 = vld [vmem:[#allocation2 + $0x108] sm:$0xc]  ;;  %v4197_v44 = vrot.slane %v1534_v10, 10 }
 0x104   : > { %v2544_v17 = vsel %vm990_vm15, %v2538_v12, %v5459_v37  ;;  %v1963_v37 = vld [vmem:[#allocation2 + $0x48] sm:$0x1]  ;;  %v4196_v1 = vrot.slane %v1532_v19, 10 }
 0x105   : > { %v2450_v58 = vpop.permute.xlu0 %2449  ;;  %v2004_v54 = vrot.slane %v1963_v37, 5 }
 0x106   : > { %v1699_v43 = vpop.permute.xlu1 %1698  ;;  %v2550_v48 = vsel %vm999_vm1, %v2544_v17, %v2450_v58  ;;  %v2306_v58 = vld [vmem:[#allocation2 + $0x13c] sm:$0x7]  ;;  %v1579_v9 = vsel %vm5090_vm12, %v4196_v1, %v1578_v2 }
 0x107   : > { %v1787_v46 = vsel %vm1008_vm2, %v1779_v15, %v1699_v43  ;;  %v2005_v60 = vsel %vm4908_vm5, %v4265_v53, %v2004_v54  ;;  %v2304_v43 = vld [vmem:[#allocation2 + $0x12c] sm:$0x7]  ;;  %v4308_v15 = vrot.slane %v2305_v11, 11  ;;  %v2353_v31 = vrot.slane %v2306_v58, 7  ;;  %v1966_v53 = vld [vmem:[#allocation2 + $0x64] sm:$0xe] }
 0x108   : > { %v4311_v7 = vcombine.low %v2005_v60, %v2009_v61  ;;  %v2349_v14 = vrot.slane %v2304_v43, 7  ;;  %v4267_v19 = vrot.slane %v1966_v53, 9 }
 0x109   : > { %v2470_v13 = vpop.permute.xlu0 %2469 }
 0x10a   : > { %v1727_v28 = vpop.permute.xlu1 %1726  ;;  %v2558_v62 = vsel %vm1008_vm2, %v2550_v48, %v2470_v13 }
 0x10b   : > { %v1796_v21 = vsel %vm1017_vm3, %v1787_v46, %v1727_v28  ;;  %v1192_v46 = vld [vmem:[#allocation2 + $0x84] sm:$0xc]  ;;  %v1583_v28 = vsel %vm5090_vm12, %v4197_v44, %v1582_v40 }
 0x10c   : > { %1930 = vmatmul.mubr.bf16.gmra.mxu0 %v1796_v21  ;;  %v4156_v49 = vrot.slane %v1192_v46, 10  ;;  %v4229_v48 = vcombine.low %v1579_v9, %v1583_v28 }
 0x10d   : > { %4259 = vmatprep.mubr.msk.bf16.mxu0 %vm306_vm8, %v4228_v16  ;;  %v1621_v51 = vpop.permute.xlu0 %1620 }
 0x10e   : > { %v2498_v23 = vpop.permute.xlu1 %2497  ;;  %v1752_v6 = vsel %vm306_vm8, %v4200_v39, %v1621_v51  ;;  %v1245_v51 = vrot.slane %v1195_v56, 6 }
 0x10f   : > { %v2567_v52 = vsel %vm1017_vm3, %v2558_v62, %v2498_v23  ;;  %v2354_v62 = vsel %vm4940_vm9, %v4308_v15, %v2353_v31 }
 0x110   : > { %2701 = vmatmul.mubr.bf16.gmra.mxu1 %v2567_v52  ;;  %v1246_v60 = vsel %vm5090_vm12, %v4157_v38, %v1245_v51 }
 0x111   : > { %4370 = vmatprep.mubr.msk.bf16.mxu1 %vm306_vm8, %v4339_v41  ;;  %v2392_v59 = vpop.permute.xlu0 %2391  ;;  %v2350_v41 = vsel %vm4940_vm9, %v4307_v26, %v2349_v14  ;;  %vm2864_vm9 = vsmask.f32 256 }
 0x112   : > { %v1641_v30 = vpop.permute.xlu1 %1640  ;;  %v2523_v4 = vsel %vm306_vm8, %v4311_v7, %v2392_v59  ;;  %v1242_v59 = vsel %vm5090_vm12, %v4156_v49, %v1241_v34  ;;  %v2016_v7 = vrot.slane %v1969_v18, 5  ;;  %vm5826_vm10 = vmand %vm2863_vm7, %vm2864_vm9  ;;  %vm2830_vm12 = vcmask 64512  }
 0x113   : > { %v1761_v22 = vsel %vm972_vm13, %v1752_v6, %v1641_v30  ;;  %v4340_v30 = vcombine.low %v2350_v41, %v2354_v62  ;;  %v4268_v6 = vrot.slane %v1968_v55, 9  ;;  %v4201_v10 = vcombine.low %v1242_v59, %v1246_v60  ;;  %v5790_v41 = vpop.f32.mrf.mxu0 }
 0x114   : > { %vm2958_vm7 = vsmask.f32 4368 }
 0x115   : > { %v2412_v8 = vpop.permute.xlu0 %2411  ;;  %v2017_v47 = vsel %vm4908_vm5, %v4268_v6, %v2016_v7  ;;  %v5794_v34 = vpop.f32.mrf.mxu0 }
 0x116   : > { %v1661_v25 = vpop.permute.xlu1 %1660  ;;  %v2532_v20 = vsel %vm972_vm13, %v2523_v4, %v2412_v8 }
 0x117   : > { %v1769_v5 = vsel %vm981_vm14, %v1761_v22, %v1661_v25  ;;  %v5796_v38 = vpop.f32.mrf.mxu0 }
 0x118   : > { %v1774_v16 = vsel %vm990_vm15, %v1769_v5, %v5609_v63 }
 0x119   : > { %v1681_v12 = vpop.permute.xlu0 %1680 }
 0x11a   : > { %v2432_v33 = vpop.permute.xlu1 %2431  ;;  %v1781_v21 = vsel %vm999_vm1, %v1774_v16, %v1681_v12 }
 0x11b   : > { %v2540_v42 = vsel %vm981_vm14, %v2532_v20, %v2432_v33 }
 0x11c   : > { %v2545_v37 = vsel %vm990_vm15, %v2540_v42, %v5609_v63  ;;  %v1967_v63 = vld [vmem:[#allocation2 + $0x68] sm:$0x1] }
 0x11d   : > { %v2452_v13 = vpop.permute.xlu0 %2451  ;;  %v2012_v27 = vrot.slane %v1967_v63, 5 }
 0x11e   : > { %v1701_v17 = vpop.permute.xlu1 %1700  ;;  %v2552_v54 = vsel %vm999_vm1, %v2545_v37, %v2452_v13 }
 0x11f   : > { %v1789_v24 = vsel %vm1008_vm2, %v1781_v21, %v1701_v17  ;;  %v2013_v1 = vsel %vm4908_vm5, %v4267_v19, %v2012_v27  ;;  %vm2857_vm5 = vsmask.f32 7950 }
 0x120   : > { %v4312_v22 = vcombine.low %v2013_v1, %v2017_v47  ;;  %vm5815_vm6 = vmand %vm2856_vm4, %vm2857_vm5  ;;  %v2878_v1 = vld [vmem:[#allocation3 + $0x14] sm:$0x8]  ;;  %v2881_v47 = vld [vmem:[#allocation3 + $0x24] sm:$0x8]  ;;  %vm2839_vm4 = vcmask 97280  }
 0x121   : > { %v2472_v23 = vpop.permute.xlu0 %2471  ;;  %vm3072_vm5 = vsmask.f32 3328 }
 0x122   : > { %v1729_v32 = vpop.permute.xlu1 %1728  ;;  %v2560_v39 = vsel %vm1008_vm2, %v2552_v54, %v2472_v23 }
 0x123   : > { %v1799_v52 = vsel %vm1017_vm3, %v1789_v24, %v1729_v32 }
 0x124   : > { %1938 = vmatmul.mubr.bf16.gmra.mxu0 %v1799_v52  ;;  %v5800_v52 = vpop.f32.mrf.mxu0 }
 0x125   : > { %4260 = vmatprep.mubr.msk.bf16.mxu0 %vm306_vm8, %v4229_v48  ;;  %v1623_v61 = vpop.permute.xlu0 %1622 }
 0x126   : > { %v2500_v29 = vpop.permute.xlu1 %2499  ;;  %v1755_v45 = vsel %vm306_vm8, %v4201_v10, %v1623_v61  ;;  %v5804_v63 = vpop.f32.mrf.mxu0 }
 0x127   : > { %v2570_v25 = vsel %vm1017_vm3, %v2560_v39, %v2500_v29 }
 0x128   : > { %2709 = vmatmul.mubr.bf16.gmra.mxu1 %v2570_v25  ;;  %v5806_v18 = vpop.f32.mrf.mxu0 }
 0x129   : > { %4371 = vmatprep.mubr.msk.bf16.mxu1 %vm306_vm8, %v4340_v30  ;;  %v2394_v57 = vpop.permute.xlu0 %2393 }
 0x12a   : > { %v1643_v8 = vpop.permute.xlu1 %1642  ;;  %v2526_v43 = vsel %vm306_vm8, %v4312_v22, %v2394_v57  ;;  %v5808_v30 = vpop.f32.mrf.mxu0  ;;  %v5823_v22 = vld [vmem:[#allocation3 + $0x8] sm:$0xf] }
 0x12b   : > { %v1763_v44 = vsel %vm972_vm13, %v1755_v45, %v1643_v8  ;;  %6620 = vst [vmem:[#allocation7_spill] sm:$0xff] %v5808_v30  ;;  %v2882_v45 = vsel %vm5815_vm6, 0, %v2881_v47  ;;  %v2917_v47 = vld [vmem:[#allocation3 + $0x6c] sm:$0x1] }
 0x12c   : > { %v5810_v39 = vpop.f32.mrf.mxu0  ;;  %2883 = vst [vmem:[#allocation3 + $0x24] sm:$0x8] %v2882_v45 }
 0x12e   : > { %v1663_v2 = vpop.permute.xlu1 %1662  ;;  %v2414_v33 = vpop.permute.xlu0 %2413 }
 0x12f   : > { %v1771_v11 = vsel %vm981_vm14, %v1763_v44, %v1663_v2  ;;  %v2534_v5 = vsel %vm972_vm13, %v2526_v43, %v2414_v33  ;;  %v2879_v2 = vsel %vm5815_vm6, 0, %v2878_v1  ;;  %v2866_v44 = vld [vmem:[#allocation3 + $0xc] sm:$0x1] }
 0x130   : > { %v1775_v12 = vsel %vm990_vm15, %v1771_v11, %v5642_v35  ;;  %2880 = vst [vmem:[#allocation3 + $0x14] sm:$0x8] %v2879_v2  ;;  %v2867_v43 = vsel %vm5826_vm10, 0, %v2866_v44  ;;  %v2902_v11 = vld [vmem:[#allocation3 + $0x1c] sm:$0x1]  ;;  %v2918_v2 = vsel %vm5826_vm10, 0, %v2917_v47 }
 0x131   : > { %2868 = vst [vmem:[#allocation3 + $0xc] sm:$0x1] %v2867_v43  ;;  %2919 = vst [vmem:[#allocation3 + $0x6c] sm:$0x1] %v2918_v2 }
 0x132   : > { %v2434_v40 = vpop.permute.xlu1 %2433  ;;  %v1683_v4 = vpop.permute.xlu0 %1682 }
 0x133   : > { %v2542_v58 = vsel %vm981_vm14, %v2534_v5, %v2434_v40  ;;  %v1783_v26 = vsel %vm999_vm1, %v1775_v12, %v1683_v4  ;;  %v2966_v40 = vshrl.u32 %v5823_v22, 16  ;;  %v2903_v4 = vsel %vm5826_vm10, 0, %v2902_v11  ;;  %v2905_v5 = vld [vmem:[#allocation3 + $0x2c] sm:$0x1]  ;;  %v2859_v12 = vld [vmem:[#allocation3 + $0x4] sm:$0x8] }
 0x134   : > { %v2546_v14 = vsel %vm990_vm15, %v2542_v58, %v5642_v35  ;;  %v2969_v58 = vshll.u32 %v5823_v22, 16  ;;  %2904 = vst [vmem:[#allocation3 + $0x1c] sm:$0x1] %v2903_v4 }
 0x136   : > { %v1703_v3 = vpop.permute.xlu1 %1702  ;;  %v3076_v33 = vrot.slane %v2969_v58, 5 }
 0x137   : > { %v2454_v9 = vpop.permute.xlu0 %2453  ;;  %v1791_v15 = vsel %vm1008_vm2, %v1783_v26, %v1703_v3  ;;  %v2968_v3 = vrot.slane %v2966_v40, 7  ;;  %v2860_v26 = vsel %vm5815_vm6, 0, %v2859_v12  ;;  %v2896_v12 = vld [vmem:[#allocation3 + $0x74] sm:$0x8] }
 0x138   : > { %v2554_v46 = vsel %vm999_vm1, %v2546_v14, %v2454_v9  ;;  %v2906_v9 = vsel %vm5826_vm10, 0, %v2905_v5  ;;  %2861 = vst [vmem:[#allocation3 + $0x4] sm:$0x8] %v2860_v26  ;;  %v2920_v26 = vld [vmem:[#allocation3 + $0x7c] sm:$0x1] }
 0x139   : > { %2907 = vst [vmem:[#allocation3 + $0x2c] sm:$0x1] %v2906_v9  ;;  %v5844_v14 = vor.u32 %v2969_v58, %v2968_v3  ;;  %v2897_v9 = vsel %vm5815_vm6, 0, %v2896_v12 }
 0x13a   : > { %v1731_v20 = vpop.permute.xlu1 %1730  ;;  %2898 = vst [vmem:[#allocation3 + $0x74] sm:$0x8] %v2897_v9 }
 0x13b   : > { %v2474_v16 = vpop.permute.xlu0 %2473  ;;  %v1802_v17 = vsel %vm1017_vm3, %v1791_v15, %v1731_v20 }
 0x13c   : > { %1946 = vmatmul.mubr.bf16.gmra.mxu0 %v1802_v17  ;;  %v2562_v28 = vsel %vm1008_vm2, %v2554_v46, %v2474_v16 }
 0x13e   : > { %v2502_v31 = vpop.permute.xlu1 %2501 }
 0x13f   : > { %v2573_v42 = vsel %vm1017_vm3, %v2562_v28, %v2502_v31 }
 0x140   : > { %2717 = vmatmul.mubr.bf16.gmra.mxu1 %v2573_v42  ;;  %v3268_v58 = vld [vmem:[#allocation3 + $0x2c] sm:$0x1] }
 0x179   : > { %v1148_v13 = vpop.f32.mrf.mxu1 }
 0x17b   : > { %v1150_v36 = vpop.f32.mrf.mxu1 }
 0x17d   : > { %v1151_v50 = vpop.f32.mrf.mxu1 }
 0x17e   : > { %v4518_v56 = vpack.i.bf16 %v1151_v50, %v1148_v13 }
 0x17f   : > { %v1153_v35 = vpop.f32.mrf.mxu1 }
 0x180   : > { %4519 = vrot.lane.b32.xlu0 %v4518_v56, %s4711_s14  ;;  %v2884_v56 = vld [vmem:[#allocation3 + $0x34] sm:$0x8] }
 0x181   : > { %v2885_v35 = vsel %vm5815_vm6, 0, %v2884_v56 }
 0x182   : > { %2886 = vst [vmem:[#allocation3 + $0x34] sm:$0x8] %v2885_v35  ;;  %v3075_v35 = vrot.slane %v2966_v40, 4 }
 0x184   : > { %v1156_v21 = vpop.f32.mrf.mxu1 }
 0x186   : > { %v1158_v49 = vpop.f32.mrf.mxu1 }
 0x187   : > { %v2887_v49 = vld [vmem:[#allocation3 + $0x44] sm:$0x8] }
 0x188   : > { %v1159_v48 = vpop.f32.mrf.mxu1 }
 0x189   : > { %v4533_v7 = vpack.i.bf16 %v1159_v48, %v1156_v21  ;;  %v2908_v21 = vld [vmem:[#allocation3 + $0x3c] sm:$0x1] }
 0x18a   : > { %v1161_v37 = vpop.f32.mrf.mxu1  ;;  %v2909_v48 = vsel %vm5826_vm10, 0, %v2908_v21 }
 0x18b   : > { %v2888_v37 = vsel %vm5815_vm6, 0, %v2887_v49  ;;  %2910 = vst [vmem:[#allocation3 + $0x3c] sm:$0x1] %v2909_v48  ;;  %v3147_v49 = vld [vmem:[#allocation3 + $0x14] sm:$0x8] }
 0x18c   : > { %2889 = vst [vmem:[#allocation3 + $0x44] sm:$0x8] %v2888_v37  ;;  %v3149_v48 = vld [vmem:[#allocation3 + $0x24] sm:$0x8] }
 0x18d   : > { %v3348_v37 = vld [vmem:[#allocation3 + $0x24] sm:$0x8] }
 0x191   : > { %v5788_v24 = vpop.f32.mrf.mxu1 }
 0x193   : > { %v1166_v32 = vpop.f32.mrf.mxu1 }
 0x195   : > { %v5792_v62 = vpop.f32.mrf.mxu1 }
 0x196   : > { %v4548_v13 = vpack.i.bf16 %v5792_v62, %v5788_v24  ;;  %v2911_v24 = vld [vmem:[#allocation3 + $0x4c] sm:$0x1] }
 0x197   : > { %v1169_v23 = vpop.f32.mrf.mxu1  ;;  %v2912_v32 = vsel %vm5826_vm10, 0, %v2911_v24  ;;  %v3064_v24 = vld [vmem:[#allocation3 + $0xc] sm:$0x1] }
 0x198   : > { %2913 = vst [vmem:[#allocation3 + $0x4c] sm:$0x1] %v2912_v32  ;;  %v3065_v32 = vld [vmem:[#allocation3 + $0x1c] sm:$0x1] }
 0x199   : > { %v3089_v40 = vshll.u32 %v3065_v32, 16 }
 0x1a0   : > { %v5798_v51 = vpop.f32.mrf.mxu1 }
 0x1a2   : > { %v1174_v53 = vpop.f32.mrf.mxu1 }
 0x1a4   : > { %v5802_v54 = vpop.f32.mrf.mxu1 }
 0x1a6   : > { %v1177_v55 = vpop.f32.mrf.mxu1 }
 0x1b4   : > { %v1923_v29 = vpop.f32.mrf.mxu0 }
 0x1b6   : > { %v1925_v59 = vpop.f32.mrf.mxu0 }
 0x1b8   : > { %v1926_v60 = vpop.f32.mrf.mxu0  ;;  %v2694_v61 = vpop.f32.mrf.mxu1 }
 0x1b9   : > { %v4523_v25 = vpack.i.bf16 %v1926_v60, %v1923_v29 }
 0x1ba   : > { %v1928_v19 = vpop.f32.mrf.mxu0  ;;  %v2696_v27 = vpop.f32.mrf.mxu1 }
 0x1bb   : > { %4524 = vrot.lane.b32.xlu1 %v4523_v25, %s4712_s22  ;;  %v2890_v27 = vld [vmem:[#allocation3 + $0x54] sm:$0x8] }
 0x1bc   : > { %v2697_v6 = vpop.f32.mrf.mxu1 }
 0x1bd   : > { %v4528_v8 = vpack.i.bf16 %v2697_v6, %v2694_v61  ;;  %v2891_v6 = vsel %vm5815_vm6, 0, %v2890_v27  ;;  %v3350_v27 = vld [vmem:[#allocation3 + $0x34] sm:$0x8] }
 0x1be   : > { %v2699_v10 = vpop.f32.mrf.mxu1  ;;  %2892 = vst [vmem:[#allocation3 + $0x54] sm:$0x8] %v2891_v6  ;;  %v2944_v6 = vld [vmem:[#allocation3 + $0x14] sm:$0x8]  ;;  %v3378_v12 = vshrl.u32 %v3350_v27, 16 }
 0x1bf   : > { %4529 = vrot.lane.b32.xlu0 %v4528_v8, %s4713_s23  ;;  %4534 = vrot.lane.b32.xlu1 %v4533_v7, %s4711_s14  ;;  %v2893_v7 = vld [vmem:[#allocation3 + $0x64] sm:$0x8]  ;;  %v2914_v8 = vld [vmem:[#allocation3 + $0x5c] sm:$0x1]  ;;  %v2974_v9 = vshrl.u32 %v2944_v6, 16 }
 0x1c0   : > { %v2894_v10 = vsel %vm5815_vm6, 0, %v2893_v7  ;;  %v2915_v1 = vsel %vm5826_vm10, 0, %v2914_v8  ;;  %v2946_v7 = vld [vmem:[#allocation3 + $0x24] sm:$0x8]  ;;  %v5929_v32 = vrot.slane %v3378_v12, 11 }
 0x1c1   : > { %2895 = vst [vmem:[#allocation3 + $0x64] sm:$0x8] %v2894_v10  ;;  %2916 = vst [vmem:[#allocation3 + $0x5c] sm:$0x1] %v2915_v1  ;;  %v3269_v27 = vld [vmem:[#allocation3 + $0x3c] sm:$0x1] }
 0x1c2   : > { %v3470_v12 = vld [vmem:[#allocation3 + $0x4c] sm:$0x1] }
 0x1cc   : > { %v1931_v15 = vpop.f32.mrf.mxu0 }
 0x1ce   : > { %v1933_v20 = vpop.f32.mrf.mxu0 }
 0x1cf   : > { %v2899_v20 = vld [vmem:[#allocation3 + $0x84] sm:$0x8] }
 0x1d0   : > { %v1934_v16 = vpop.f32.mrf.mxu0  ;;  %v2702_v17 = vpop.f32.mrf.mxu1 }
 0x1d1   : > { %v4538_v46 = vpack.i.bf16 %v1934_v16, %v1931_v15  ;;  %v2921_v15 = vsel %vm5826_vm10, 0, %v2920_v26  ;;  %v2900_v16 = vsel %vm5815_vm6, 0, %v2899_v20  ;;  %v2987_v26 = vshrl.u32 %v2946_v7, 16 }
 0x1d2   : > { %v1936_v28 = vpop.f32.mrf.mxu0  ;;  %v2704_v31 = vpop.f32.mrf.mxu1  ;;  %2922 = vst [vmem:[#allocation3 + $0x7c] sm:$0x1] %v2921_v15  ;;  %2901 = vst [vmem:[#allocation3 + $0x84] sm:$0x8] %v2900_v16 }
 0x1d3   : > { %4539 = vrot.lane.b32.xlu0 %v4538_v46, %s4712_s22  ;;  %v2923_v46 = vld [vmem:[#allocation3 + $0x8c] sm:$0x1]  ;;  %v2874_v31 = vld [vmem:[#allocation3 + $0x9c] sm:$0x1] }
 0x1d4   : > { %v2705_v42 = vpop.f32.mrf.mxu1  ;;  %v2924_v28 = vsel %vm5826_vm10, 0, %v2923_v46 }
 0x1d5   : > { %v4543_v36 = vpack.i.bf16 %v2705_v42, %v2702_v17  ;;  %2925 = vst [vmem:[#allocation3 + $0x8c] sm:$0x1] %v2924_v28  ;;  %v5887_v42 = vld [vmem:[#allocation3 + $0x98] sm:$0xf] }
 0x1d6   : > { %v2707_v50 = vpop.f32.mrf.mxu1 }
 0x1d7   : > { %4544 = vrot.lane.b32.xlu1 %v4543_v36, %s4713_s23  ;;  %4549 = vrot.lane.b32.xlu0 %v4548_v13, %s4711_s14  ;;  %v2875_v13 = vsel %vm5826_vm10, 0, %v2874_v31  ;;  %v6602_v36 = vshrl.u32 %v5887_v42, 16  ;;  %v6601_v50 = vshll.u32 %v5887_v42, 16 }
 0x1d8   : > { %2876 = vst [vmem:[#allocation3 + $0x9c] sm:$0x1] %v2875_v13 }
 0x1d9   : > { %v5895_v57 = vrot.slane %v6602_v36, 4  ;;  %v5899_v56 = vrot.slane %v6601_v50, 5  ;;  %v3472_v36 = vld [vmem:[#allocation3 + $0x6c] sm:$0x1]  ;;  %v3273_v30 = vld [vmem:[#allocation3 + $0x7c] sm:$0x1] }
 0x1db   : > { %6625 = vst [vmem:[#allocation8_spill] sm:$0xff] %v5895_v57  ;;  %6626 = vst [vmem:[#allocation9_spill] sm:$0xff] %v5899_v56 }
 0x1e4   : > { %v1939_v62 = vpop.f32.mrf.mxu0 }
 0x1e6   : > { %v1941_v23 = vpop.f32.mrf.mxu0 }
 0x1e7   : > { %v3164_v23 = vshrl.u32 %v3147_v49, 16 }
 0x1e8   : > { %v1942_v53 = vpop.f32.mrf.mxu0  ;;  %v2710_v55 = vpop.f32.mrf.mxu1 }
 0x1e9   : > { %v4553_v29 = vpack.i.bf16 %v1942_v53, %v1939_v62  ;;  %v3468_v62 = vld [vmem:[#allocation3 + $0x2c] sm:$0x1]  ;;  %v3177_v53 = vshrl.u32 %v3149_v48, 16  ;;  %v5907_v10 = vrot.slane %v3164_v23, 11  ;;  %v3352_v48 = vld [vmem:[#allocation3 + $0x44] sm:$0x8] }
 0x1ea   : > { %v1944_v59 = vpop.f32.mrf.mxu0  ;;  %v2712_v60 = vpop.f32.mrf.mxu1  ;;  %v3067_v23 = vld [vmem:[#allocation3 + $0x3c] sm:$0x1] }
 0x1eb   : > { %4554 = vrot.lane.b32.xlu1 %v4553_v29, %s4712_s22  ;;  %v3077_v29 = vor.u32 %v3076_v33, %v3075_v35  ;;  %v3080_v59 = vshll.u32 %v3064_v24, 16  ;;  %v3481_v60 = vshll.u32 %v3468_v62, 16  ;;  %v5909_v1 = vrot.slane %v3177_v53, 11 }
 0x1ec   : > { %v2713_v61 = vpop.f32.mrf.mxu1  ;;  %v5931_v53 = vrot.slane %v2974_v9, 11 }
 0x1ed   : > { %v4558_v25 = vpack.i.bf16 %v2713_v61, %v2710_v55  ;;  %v3365_v55 = vshrl.u32 %v3348_v37, 16  ;;  %v3267_v61 = vld [vmem:[#allocation3 + $0x1c] sm:$0x1]  ;;  %v5919_v16 = vrot.slane %v3481_v60, 5 }
 0x1ee   : > { %v2715_v19 = vpop.f32.mrf.mxu1  ;;  %v3280_v2 = vshll.u32 %v3267_v61, 16 }
 0x1ef   : > { %4559 = vrot.lane.b32.xlu0 %v4558_v25, %s4713_s23  ;;  %2745 = vrot.lane.b32.xlu1 %v5798_v51, %s4711_s14  ;;  %v3066_v25 = vld [vmem:[#allocation3 + $0x2c] sm:$0x1]  ;;  %v2942_v19 = vld [vmem:[#allocation3 + $0x4] sm:$0x8]  ;;  %v5911_v47 = vrot.slane %v3365_v55, 11  ;;  %v5933_v55 = vrot.slane %v2987_v26, 11 }
 0x1f0   : > { %v5921_v13 = vrot.slane %v3280_v2, 5 }
 0x1f2   : > { %v4520_v8 = vpop.permute.xlu0 %4519 }
 0x1f3   : > { %v4522_v15 = vunpack.i.h.bf16 %v4520_v8  ;;  %v4521_v20 = vunpack.i.l.bf16 %v4520_v8  ;;  %v3107_v8 = vshll.u32 %v3067_v23, 16  ;;  %v4632_v23 = vld [vmem:[%s6599_s3 + $0x30] sm:$0xff]  }
 0x1fc   : > { %v1947_v51 = vpop.f32.mrf.mxu0 }
 0x1fd   : > { %2777 = vrot.lane.b32.xlu0 %v1947_v51, %s4712_s22  ;;  %v5913_v51 = vrot.slane %v3077_v29, 4  ;;  %v2822_v29 = vsel %vm2821_vm11, %v5794_v34, %v4521_v20 }
 0x1fe   : > { %v1949_v45 = vpop.f32.mrf.mxu0 }
 0x1ff   : > { %v3469_v45 = vld [vmem:[#allocation3 + $0x3c] sm:$0x1] }
 0x200   : > { %v1950_v44 = vpop.f32.mrf.mxu0  ;;  %v2718_v43 = vpop.f32.mrf.mxu1  ;;  %v3490_v31 = vshll.u32 %v3469_v45, 16 }
 0x201   : > { %2809 = vrot.lane.b32.xlu1 %v2718_v43, %s4713_s23  ;;  %2747 = vrot.lane.b32.xlu0 %v5802_v54, %s4711_s14  ;;  %v2870_v54 = vld [vmem:[#allocation3 + $0x94] sm:$0x8]  ;;  %v3098_v43 = vshll.u32 %v3066_v25, 16 }
 0x202   : > { %v1952_v11 = vpop.f32.mrf.mxu0  ;;  %v2720_v4 = vpop.f32.mrf.mxu1  ;;  %v2871_v17 = vsel %vm5815_vm6, 0, %v2870_v54  ;;  %v5917_v54 = vrot.slane %v3089_v40, 5  ;;  %v5941_v25 = vrot.slane %v3490_v31, 5  ;;  %vm3073_vm6 = vsmask.f32 7440 }
 0x203   : > { %2872 = vst [vmem:[#allocation3 + $0x94] sm:$0x8] %v2871_v17  ;;  %v2961_v11 = vshrl.u32 %v2942_v19, 16  ;;  %v3153_v17 = vld [vmem:[#allocation3 + $0x44] sm:$0x8]  ;;  %v5925_v49 = vrot.slane %v3098_v43, 5  ;;  %vm5984_vm10 = vmor %vm3072_vm5, %vm3073_vm6 }
 0x204   : > { %v2721_v5 = vpop.f32.mrf.mxu1  ;;  %v3203_v62 = vshrl.u32 %v3153_v17, 16  ;;  %v3391_v19 = vshrl.u32 %v3352_v48, 16  ;;  %v2948_v43 = vld [vmem:[#allocation3 + $0x34] sm:$0x8]  ;;  %v3157_v31 = vld [vmem:[#allocation3 + $0x64] sm:$0x8]  ;;  %vm6010_vm5 = vmor %vm2864_vm9, %vm2958_vm7 }
 0x205   : > { %2811 = vrot.lane.b32.xlu0 %v2721_v5, %s4713_s23  ;;  %2779 = vrot.lane.b32.xlu1 %v1950_v44, %s4712_s22  ;;  %v3289_v44 = vshll.u32 %v3268_v58, 16  ;;  %v5915_v5 = vrot.slane %v3080_v59, 5  ;;  %v5927_v37 = vrot.slane %v2961_v11, 11  ;;  %v2823_v59 = vsel %vm2821_vm11, %v5800_v52, %v4522_v15  ;;  %v3270_v52 = vld [vmem:[#allocation3 + $0x4c] sm:$0x1] }
 0x206   : > { %v2723_v3 = vpop.f32.mrf.mxu1  ;;  %v5947_v11 = vrot.slane %v3203_v62, 11  ;;  %v3354_v15 = vld [vmem:[#allocation3 + $0x54] sm:$0x8]  ;;  %v3307_v20 = vshll.u32 %v3270_v52, 16  ;;  %v3000_v48 = vshrl.u32 %v2948_v43, 16  ;;  %v5956_v62 = vrot.slane %v3391_v19, 11 }
 0x207   : > { %v3151_v3 = vld [vmem:[#allocation3 + $0x34] sm:$0x8]  ;;  %v5923_v35 = vrot.slane %v3289_v44, 5  ;;  %v3068_v44 = vld [vmem:[#allocation3 + $0x4c] sm:$0x1] }
 0x208   : > { %v3190_v33 = vshrl.u32 %v3151_v3, 16  ;;  %v2950_v3 = vld [vmem:[#allocation3 + $0x44] sm:$0x8]  ;;  %v3155_v17 = vld [vmem:[#allocation3 + $0x54] sm:$0x8] }
 0x209   : > { %v3272_v52 = vld [vmem:[#allocation3 + $0x6c] sm:$0x1] }
 0x20a   : > { %v5945_v34 = vrot.slane %v3190_v33, 11  ;;  %v3356_v33 = vld [vmem:[#allocation3 + $0x64] sm:$0x8] }
 0x20b   : > { %v3417_v19 = vshrl.u32 %v3356_v33, 16 }
 0x22d   : > { %v4525_v4 = vpop.permute.xlu1 %4524 }
 0x22e   : > { %v4527_v46 = vunpack.i.h.bf16 %v4525_v4  ;;  %v4526_v28 = vunpack.i.l.bf16 %v4525_v4  ;;  %v3298_v4 = vshll.u32 %v3269_v27, 16 }
 0x230   : > { %v2832_v61 = vsel %vm2830_vm12, %v2823_v59, %v4527_v46  ;;  %v2831_v58 = vsel %vm2830_vm12, %v2822_v29, %v4526_v28  ;;  %v4631_v46 = vld [vmem:[%s6599_s3 + $0x38] sm:$0xff]   ;;  %v3116_v28 = vshll.u32 %v3068_v44, 16  ;;  %v3499_v29 = vshll.u32 %v3470_v12, 16  ;;  %v4633_v12 = vld [vmem:[%s6599_s3 + $0x28] sm:$0xff]  }
 0x231   : > { %v4530_v24 = vpop.permute.xlu0 %4529  ;;  %3885 = vmatpush1.bf16.msra.mxu0 %v4631_v46  ;;  %v3013_v59 = vshrl.u32 %v2950_v3, 16  ;;  %v5962_v27 = vrot.slane %v3298_v4, 5 }
 0x232   : > { %v4532_v40 = vunpack.i.h.bf16 %v4530_v24  ;;  %v4531_v60 = vunpack.i.l.bf16 %v4530_v24  ;;  %v5954_v24 = vrot.slane %v3107_v8, 5  ;;  %3886 = vmatprep.subr.bf16.mxu0 %v6604_v0  ;;  %v5966_v8 = vrot.slane %v3116_v28, 5 }
 0x233   : > { %v5973_v3 = vrot.slane %v3499_v29, 5  ;;  %v5975_v4 = vrot.slane %v3013_v59, 11  ;;  %v5990_v28 = vrot.slane %v3417_v19, 11 }
 0x234   : > { %v2840_v6 = vsel %vm2839_vm4, %v2831_v58, %v4531_v60  ;;  %v2841_v7 = vsel %vm2839_vm4, %v2832_v61, %v4532_v40  ;;  %v3404_v40 = vshrl.u32 %v3354_v15, 16  ;;  %v3069_v60 = vld [vmem:[#allocation3 + $0x5c] sm:$0x1]  ;;  %v3216_v61 = vshrl.u32 %v3155_v17, 16  ;;  %6627 = vst [vmem:[#allocation10_spill] sm:$0xff] %v5966_v8 }
 0x235   : > { %v2848_v2 = vmax.f32 %v2840_v6, 0.0  ;;  %v2849_v45 = vmax.f32 %v2841_v7, 0.0  ;;  %v3271_v58 = vld [vmem:[#allocation3 + $0x5c] sm:$0x1]  ;;  %v5964_v6 = vrot.slane %v3307_v20, 5  ;;  %v3229_v7 = vshrl.u32 %v3157_v31, 16  ;;  %3887 = vmatpush1.bf16.msra.mxu0 %v4632_v23 }
 0x236   : > { %v3125_v44 = vshll.u32 %v3069_v60, 16  ;;  %v3316_v43 = vshll.u32 %v3271_v58, 16  ;;  %6628 = vst [vmem:[#allocation11_spill] sm:$0xff] %v5973_v3  ;;  %6629 = vst [vmem:[#allocation12_spill] sm:$0xff] %v5975_v4  ;;  %3888 = vmatprep.subr.bf16.mxu0 %v6604_v0  ;;  %v3471_v15 = vld [vmem:[#allocation3 + $0x5c] sm:$0x1] }
 0x237   : > { %v2926_v9 = vpack.c.bf16 %v2848_v2, %v2848_v2  ;;  %v2927_v26 = vpack.c.bf16 %v2849_v45, %v2849_v45  ;;  %v3070_v2 = vld [vmem:[#allocation3 + $0x6c] sm:$0x1]  ;;  %v5968_v45 = vrot.slane %v3000_v48, 11  ;;  %v2952_v20 = vld [vmem:[#allocation3 + $0x54] sm:$0x8]  ;;  %v5988_v46 = vrot.slane %v3229_v7, 11 }
 0x238   : > { %6635 = vst [vmem:[#allocation16_spill] sm:$0xff] %v5990_v28  ;;  %v3325_v31 = vshll.u32 %v3272_v52, 16  ;;  %v3134_v33 = vshll.u32 %v3070_v2, 16  ;;  %v2954_v48 = vld [vmem:[#allocation3 + $0x64] sm:$0x8]  ;;  %v5996_v60 = vrot.slane %v3125_v44, 5 }
 0x239   : > { %2934 = vst.msk [vmem:[#allocation3 + $0x18] sm:$0xf] %vm199_vm0, %v2926_v9  ;;  %2935 = vst.msk [vmem:[#allocation3 + $0x28] sm:$0xf] %vm199_vm0, %v2927_v26  ;;  %v5977_v9 = vrot.slane %v3404_v40, 11  ;;  %v5979_v26 = vrot.slane %v3216_v61, 11  ;;  %v4535_v40 = vpop.permute.xlu1 %4534  ;;  %3889 = vmatpush1.bf16.msra.mxu0 %v4633_v12 }
 0x23a   : > { %6634 = vst [vmem:[#allocation15_spill] sm:$0xff] %v5988_v46  ;;  %6636 = vst [vmem:[#allocation17_spill] sm:$0xff] %v5996_v60  ;;  %v5998_v61 = vrot.slane %v3316_v43, 5  ;;  %v4634_v58 = vld [vmem:[%s6599_s3 + $0x20] sm:$0xff]   ;;  %v3508_v7 = vshll.u32 %v3471_v15, 16  ;;  %v3026_v19 = vshrl.u32 %v2952_v20, 16  ;;  %3890 = vmatprep.subr.bf16.mxu0 %v6604_v0  ;;  %v4537_v28 = vunpack.i.h.bf16 %v4535_v40 }
 0x23b   : > { %6630 = vst [vmem:[#allocation13_spill] sm:$0xff] %v5977_v9  ;;  %6631 = vst [vmem:[#allocation14_spill] sm:$0xff] %v5979_v26  ;;  %v3039_v43 = vshrl.u32 %v2954_v48, 16  ;;  %v3358_v15 = vld [vmem:[#allocation3 + $0x74] sm:$0x8]  ;;  %v6019_v20 = vrot.slane %v3325_v31, 5 }
 0x23c   : > { %6637 = vst [vmem:[#allocation18_spill] sm:$0xff] %v5998_v61  ;;  %v4536_v61 = vunpack.i.l.bf16 %v4535_v40  ;;  %v6026_v46 = vld [vmem:[#allocation3 + $0x74] sm:$0x8]  ;;  %v6035_v40 = vrot.slane %v3508_v7, 5  ;;  %v6644_v12 = vmov 0   ;;  %v2825_v7 = vsel %vm2821_vm11, %v5796_v38, %v4537_v28 }
 0x23d   : > { %6640 = vst [vmem:[#allocation19_spill] sm:$0xff] %v6019_v20  ;;  %3891 = vmatpush1.bf16.msra.mxu0 %v4634_v58  ;;  %v6040_v0 = vrot.slane %v3039_v43, 11 }
 0x23e   : > { %6642 = vst [vmem:[#allocation21_spill] sm:$0xff] %v6035_v40  ;;  %3892 = vmatprep.subr.bf16.mxu0 %v6644_v12 }
 0x23f   : > { %6645 = vst [vmem:[#allocation23_spill] sm:$0xff] %v6040_v0 }
 0x240   : > { %v5992_v23 = vld [vmem:[#allocation3 + $0x18] sm:$0xf]  ;;  %v5994_v29 = vld [vmem:[#allocation3 + $0x28] sm:$0xf] }
 0x241   : > { %v2945_v59 = vld [vmem:[#allocation3 + $0x18] sm:$0xf]  ;;  %v4412_v52 = vcombine.low %v5992_v23, %v5994_v29  ;;  %v6006_v50 = vld [vmem:[#allocation3 + $0x28] sm:$0xf]  ;;  %v3172_v43 = vshll.u32 %v5992_v23, 16  ;;  %v3182_v40 = vshrl.u32 %v5994_v29, 16 }
 0x242   : > { %v2979_v2 = vshrl.u32 %v2945_v59, 16  ;;  %v4400_v21 = vcombine.low %v5823_v22, %v2945_v59  ;;  %v6021_v22 = vrot.slane %v3134_v33, 5  ;;  %v2982_v60 = vshll.u32 %v2945_v59, 16  ;;  %v4635_v33 = vld [vmem:[%s6599_s3 + $0x18] sm:$0xff]  }
 0x243   : > { %3648 = vrot.lane.b32.xlu0 %v4412_v52, %s4706_s27  ;;  %v6037_v59 = vrot.slane %v3026_v19, 11  ;;  %v3430_v52 = vshrl.u32 %v3358_v15, 16  ;;  %v6646_v31 = vshrl.u32 %v6006_v50, 16  ;;  %v2995_v3 = vshll.u32 %v6006_v50, 16  ;;  %3893 = vmatpush1.bf16.msra.mxu0 %v4635_v33 }
 0x244   : > { %6641 = vst [vmem:[#allocation20_spill] sm:$0xff] %v6021_v22  ;;  %v2981_v4 = vrot.slane %v2979_v2, 7  ;;  %3580 = vrot.lane.b32.xlu1 %v4400_v21, %s4704_s12  ;;  %v3517_v22 = vshll.u32 %v3472_v36, 16  ;;  %v2824_v19 = vsel %vm2821_vm11, %v5790_v41, %v4536_v61  ;;  %v3242_v15 = vshrl.u32 %v6026_v46, 16  ;;  %v3071_v61 = vld [vmem:[#allocation3 + $0x7c] sm:$0x1]  ;;  %3894 = vmatprep.subr.bf16.mxu0 %v6644_v12 }
 0x245   : > { %v4540_v48 = vpop.permute.xlu0 %4539  ;;  %6643 = vst [vmem:[#allocation22_spill] sm:$0xff] %v6037_v59  ;;  %v2994_v58 = vrot.slane %v6646_v31, 7  ;;  %v3084_v36 = vrot.slane %v2979_v2, 4  ;;  %v3085_v0 = vrot.slane %v2982_v60, 5  ;;  %v6054_v31 = vld [vmem:[#allocation3 + $0x28] sm:$0xf] }
 0x246   : > { %v2984_v21 = vor.u32 %v2982_v60, %v2981_v4  ;;  %v4542_v20 = vunpack.i.h.bf16 %v4540_v48  ;;  %v4541_v26 = vunpack.i.l.bf16 %v4540_v48  ;;  %v3169_v4 = vshrl.u32 %v5992_v23, 16 }
 0x247   : > { %v6052_v59 = vor.u32 %v2995_v3, %v2994_v58  ;;  %v3185_v38 = vshll.u32 %v5994_v29, 16  ;;  %v6061_v60 = vrot.slane %v3430_v52, 11  ;;  %v6063_v2 = vrot.slane %v3517_v22, 5  ;;  %v4636_v22 = vld [vmem:[%s6599_s3 + $0x10] sm:$0xff]  }
 0x248   : > { %v2834_v46 = vsel %vm2830_vm12, %v2825_v7, %v4542_v20  ;;  %v2833_v23 = vsel %vm2830_vm12, %v2824_v19, %v4541_v26  ;;  %v3370_v8 = vshrl.u32 %v6054_v31, 16  ;;  %v3373_v29 = vshll.u32 %v6054_v31, 16  ;;  %3895 = vmatpush1.bf16.msra.mxu0 %v4636_v22  ;;  %v6089_v22 = vld [vmem:[#allocation3 + $0x84] sm:$0x8] }
 0x249   : > { %v4545_v48 = vpop.permute.xlu1 %4544  ;;  %6647 = vst [vmem:[#allocation24_spill] sm:$0xff] %v6061_v60  ;;  %6648 = vst [vmem:[#allocation25_spill] sm:$0xff] %v6063_v2  ;;  %v3086_v56 = vor.u32 %v3085_v0, %v3084_v36  ;;  %v3143_v9 = vshll.u32 %v3071_v61, 16  ;;  %v3275_v20 = vrot.slane %v3169_v4, 4  ;;  %v3276_v7 = vrot.slane %v3172_v43, 5  ;;  %v4550_v36 = vpop.permute.xlu0 %4549  ;;  %3896 = vmatprep.subr.bf16.mxu0 %v6644_v12 }
 0x24a   : > { %v4547_v28 = vunpack.i.h.bf16 %v4545_v48  ;;  %v4546_v41 = vunpack.i.l.bf16 %v4545_v48  ;;  %v3284_v26 = vrot.slane %v3182_v40, 4  ;;  %v3285_v52 = vrot.slane %v3185_v38, 5 }
 0x24b   : > { %v3171_v19 = vrot.slane %v3169_v4, 7  ;;  %v3476_v2 = vrot.slane %v3370_v8, 4  ;;  %v3477_v60 = vrot.slane %v3373_v29, 5  ;;  %v2985_v0 = vsel %vm6010_vm5, %v5931_v53, %v2984_v21 }
 0x24c   : > { %v2842_v58 = vsel %vm2839_vm4, %v2833_v23, %v4546_v41  ;;  %v2843_v33 = vsel %vm2839_vm4, %v2834_v46, %v4547_v28  ;;  %v3184_v41 = vrot.slane %v3182_v40, 7  ;;  %v3161_v23 = vld [vmem:[#allocation3 + $0x84] sm:$0x8]  ;;  %v3372_v61 = vrot.slane %v3370_v8, 7  ;;  %v6091_v8 = vld [vmem:[#allocation3 + $0x94] sm:$0x8] }
 0x24d   : > { %v2850_v48 = vmax.f32 %v2842_v58, 0.0  ;;  %v2851_v57 = vmax.f32 %v2843_v33, 0.0  ;;  %v3334_v58 = vshll.u32 %v3273_v30, 16  ;;  %v3087_v33 = vrot.slane %v3086_v56, 4 }
 0x24e   : > { %v6077_v4 = vrot.slane %v3242_v15, 11  ;;  %v3277_v53 = vor.u32 %v3276_v7, %v3275_v20  ;;  %v3286_v40 = vor.u32 %v3285_v52, %v3284_v26  ;;  %v3255_v21 = vshrl.u32 %v3161_v23, 16  ;;  %v4637_v20 = vld [vmem:[%s6599_s3 + $0x8] sm:$0xff]  }
 0x24f   : > { %v2928_v28 = vpack.c.bf16 %v2850_v48, %v2850_v48  ;;  %v2929_v46 = vpack.c.bf16 %v2851_v57, %v2851_v57  ;;  %v6649_v57 = vsel %vm6010_vm5, %v5927_v37, %v5844_v14  ;;  %v6087_v48 = vrot.slane %v3143_v9, 5  ;;  %3897 = vmatpush1.bf16.msra.mxu0 %v4637_v20 }
 0x250   : > { %v6084_v30 = vcombine.low %v6649_v57, %v2985_v0  ;;  %v6650_v56 = vshrl.u32 %v6006_v50, 16  ;;  %v3174_v14 = vor.u32 %v3172_v43, %v3171_v19  ;;  %v3187_v37 = vor.u32 %v3185_v38, %v3184_v41  ;;  %3898 = vmatprep.subr.bf16.mxu0 %v6644_v12 }
 0x251   : > { %2936 = vst.msk [vmem:[#allocation3 + $0x38] sm:$0xf] %vm199_vm0, %v2928_v28  ;;  %2937 = vst.msk [vmem:[#allocation3 + $0x48] sm:$0xf] %vm199_vm0, %v2929_v46  ;;  %v6097_v28 = vrot.slane %v2995_v3, 5  ;;  %v4552_v9 = vunpack.i.h.bf16 %v4550_v36  ;;  %v4551_v7 = vunpack.i.l.bf16 %v4550_v36  ;;  %v3478_v26 = vor.u32 %v3477_v60, %v3476_v2 }
 0x252   : > { %v6095_v15 = vrot.slane %v6650_v56, 4  ;;  %v6099_v46 = vld [vmem:[#allocation3 + $0x8c] sm:$0x1]  ;;  %v6104_v52 = vrot.slane %v3334_v58, 5  ;;  %v3375_v23 = vor.u32 %v3373_v29, %v3372_v61  ;;  %v3092_v0 = vsel %vm5984_vm10, %v3087_v33, %v5917_v54  ;;  %v4638_v54 = vld [vmem:[%s6599_s3] sm:$0xff]  }
 0x253   : > { %v6651_v43 = vshrl.u32 %v5887_v42, 16  ;;  %v3278_v19 = vrot.slane %v3277_v53, 4  ;;  %v6114_v41 = vrot.slane %v3255_v21, 11  ;;  %v3175_v29 = vsel %vm6010_vm5, %v5907_v10, %v3174_v14  ;;  %3899 = vmatpush1.bf16.msra.mxu0 %v4638_v54 }
 0x254   : > { %v3188_v58 = vsel %vm6010_vm5, %v5909_v1, %v3187_v37  ;;  %v3287_v61 = vrot.slane %v3286_v40, 4  ;;  %v2827_v33 = vsel %vm2821_vm11, %v5810_v39, %v4552_v9  ;;  %v2826_v57 = vsel %vm2821_vm11, %v5806_v18, %v4551_v7  ;;  %3914 = vmatprep.subr.bf16.mxu0 %v6644_v12 }
 0x255   : > { %v6112_v38 = vrot.slane %v6651_v43, 7  ;;  %v6652_v56 = vsel %vm5984_vm10, %v5913_v51, %v5915_v5  ;;  %v6139_v10 = vrot.slane %v3478_v26, 4  ;;  %v3376_v39 = vsel %vm6010_vm5, %v5911_v47, %v3375_v23 }
 0x256   : > { %v4404_v20 = vcombine.low %v6652_v56, %v3092_v0  ;;  %v4408_v51 = vcombine.low %v3175_v29, %v3188_v58  ;;  %v3283_v5 = vsel %vm5984_vm10, %v3278_v19, %v5921_v13  ;;  %v3292_v23 = vsel %vm5984_vm10, %v3287_v61, %v5923_v35  ;;  %v4639_v13 = vld [vmem:[%s6599_s3 + $0x40] sm:$0xff]  }
 0x257   : > { %v3484_v35 = vsel %vm5984_vm10, %v6139_v10, %v5919_v16  ;;  %v4416_v56 = vcombine.low %v3283_v5, %v3292_v23  ;;  %3915 = vmatpush2.bf16.msra.mxu0 %v4639_v13 }
 0x258   : > { %v2949_v53 = vld [vmem:[#allocation3 + $0x38] sm:$0xf]  ;;  %v6147_v18 = vld [vmem:[#allocation3 + $0x48] sm:$0xf] }
 0x259   : > { %v3351_v21 = vld [vmem:[#allocation3 + $0x38] sm:$0xf]  ;;  %v3005_v14 = vshrl.u32 %v2949_v53, 16  ;;  %v4401_v1 = vcombine.low %v6006_v50, %v2949_v53  ;;  %v3008_v26 = vshll.u32 %v2949_v53, 16  ;;  %v3208_v54 = vshrl.u32 %v6147_v18, 16 }
 0x25a   : > { %v3383_v40 = vshrl.u32 %v3351_v21, 16  ;;  %v6145_v37 = vld [vmem:[#allocation3 + $0x38] sm:$0xf]  ;;  %v3386_v9 = vshll.u32 %v3351_v21, 16  ;;  %v4424_v7 = vcombine.low %v6054_v31, %v3351_v21  ;;  %v6179_v5 = vld [vmem:[#allocation3 + $0x48] sm:$0xf] }
 0x25b   : > { %v3007_v50 = vrot.slane %v3005_v14, 7  ;;  %3582 = vrot.lane.b32.xlu0 %v4401_v1, %s4704_s12  ;;  %v3195_v31 = vshrl.u32 %v6145_v37, 16  ;;  %v3198_v58 = vshll.u32 %v6145_v37, 16  ;;  %v3102_v1 = vrot.slane %v3005_v14, 4 }
 0x25c   : > { %v3385_v47 = vrot.slane %v3383_v40, 7  ;;  %v3485_v0 = vrot.slane %v3383_v40, 4  ;;  %v3486_v43 = vrot.slane %v3386_v9, 5  ;;  %3716 = vrot.lane.b32.xlu1 %v4424_v7, %s4707_s30  ;;  %v3103_v40 = vrot.slane %v3008_v26, 5 }
 0x25d   : > { %v6164_v12 = vor.u32 %v3008_v26, %v3007_v50  ;;  %v4555_v29 = vpop.permute.xlu1 %4554  ;;  %v3211_v7 = vshll.u32 %v6147_v18, 16  ;;  %v6176_v50 = vld [vmem:[#allocation3 + $0x48] sm:$0xf]  ;;  %v3197_v10 = vrot.slane %v3195_v31, 7  ;;  %v3294_v23 = vrot.slane %v3198_v58, 5 }
 0x25e   : > { %v3388_v19 = vor.u32 %v3386_v9, %v3385_v47  ;;  %v3487_v61 = vor.u32 %v3486_v43, %v3485_v0  ;;  %v4557_v53 = vunpack.i.h.bf16 %v4555_v29  ;;  %v4556_v21 = vunpack.i.l.bf16 %v4555_v29 }
 0x25f   : > { %3600 = vrot.lane.b32.xlu0 %v4404_v20, %s4705_s20  ;;  %v3210_v47 = vrot.slane %v3208_v54, 7  ;;  %v3293_v0 = vrot.slane %v3195_v31, 4  ;;  %v3302_v43 = vrot.slane %v3208_v54, 4  ;;  %v3399_v31 = vshll.u32 %v6176_v50, 16 }
 0x260   : > { %v3389_v9 = vsel %vm6010_vm5, %v5929_v32, %v3388_v19  ;;  %3620 = vrot.lane.b32.xlu1 %v4408_v51, %s4708_s5  ;;  %v2836_v14 = vsel %vm2830_vm12, %v2827_v33, %v4557_v53  ;;  %v2835_v20 = vsel %vm2830_vm12, %v2826_v57, %v4556_v21  ;;  %v4413_v19 = vcombine.low %v6145_v37, %v6147_v18 }
 0x261   : > { %v4420_v16 = vcombine.low %v3376_v39, %v3389_v9  ;;  %v4560_v26 = vpop.permute.xlu0 %4559  ;;  %v3488_v29 = vrot.slane %v3487_v61, 4  ;;  %v3303_v39 = vrot.slane %v3211_v7, 5  ;;  %v3396_v51 = vshrl.u32 %v6176_v50, 16 }
 0x262   : > { %v4562_v32 = vunpack.i.h.bf16 %v4560_v26  ;;  %v4561_v13 = vunpack.i.l.bf16 %v4560_v26  ;;  %v3018_v33 = vshrl.u32 %v6179_v5, 16  ;;  %v3021_v18 = vshll.u32 %v6179_v5, 16 }
 0x263   : > { %3688 = vrot.lane.b32.xlu0 %v4420_v16, %s4710_s10  ;;  %v3493_v37 = vsel %vm5984_vm10, %v3488_v29, %v5941_v25  ;;  %v3104_v54 = vor.u32 %v3103_v40, %v3102_v1  ;;  %v2956_v16 = vld [vmem:[#allocation3 + $0x74] sm:$0x8]  ;;  %v3200_v26 = vor.u32 %v3198_v58, %v3197_v10  ;;  %v3213_v60 = vor.u32 %v3211_v7, %v3210_v47 }
 0x264   : > { %v2844_v57 = vsel %vm2839_vm4, %v2835_v20, %v4561_v13  ;;  %v2845_v53 = vsel %vm2839_vm4, %v2836_v14, %v4562_v32  ;;  %3650 = vrot.lane.b32.xlu1 %v4413_v19, %s4706_s27  ;;  %v4428_v9 = vcombine.low %v3484_v35, %v3493_v37  ;;  %v3494_v36 = vrot.slane %v3396_v51, 4  ;;  %v3473_v19 = vld [vmem:[#allocation3 + $0x7c] sm:$0x1] }
 0x265   : > { %v2852_v61 = vmax.f32 %v2844_v57, 0.0  ;;  %v2853_v21 = vmax.f32 %v2845_v53, 0.0  ;;  %v3495_v2 = vrot.slane %v3399_v31, 5  ;;  %v3111_v14 = vrot.slane %v3018_v33, 4 }
 0x266   : > { %4441 = vmatprep.mubr.msk.bf16.mxu0 %vm306_vm8, %v4428_v9  ;;  %v3112_v32 = vrot.slane %v3021_v18, 5  ;;  %v3295_v3 = vor.u32 %v3294_v23, %v3293_v0  ;;  %v3304_v25 = vor.u32 %v3303_v39, %v3302_v43  ;;  %v3398_v1 = vrot.slane %v3396_v51, 7 }
 0x267   : > { %v2930_v20 = vpack.c.bf16 %v2852_v61, %v2852_v61  ;;  %v2931_v13 = vpack.c.bf16 %v2853_v21, %v2853_v21  ;;  %v3052_v40 = vshrl.u32 %v2956_v16, 16  ;;  %v3105_v58 = vrot.slane %v3104_v54, 4 }
 0x268   : > { %3668 = vrot.lane.b32.xlu1 %v4416_v56, %s4709_s8  ;;  %v2998_v35 = vsel %vm6010_vm5, %v5933_v55, %v6052_v59  ;;  %v3011_v7 = vsel %vm6010_vm5, %v5968_v45, %v6164_v12  ;;  %v3496_v10 = vor.u32 %v3495_v2, %v3494_v36  ;;  %v6653_v56 = vshrl.u32 %v6089_v22, 16  ;;  %v6228_v2 = vld [vmem:[#allocation3 + $0x8c] sm:$0x1] }
 0x269   : > { %2938 = vst.msk [vmem:[#allocation3 + $0x58] sm:$0xf] %vm199_vm0, %v2930_v20  ;;  %2939 = vst.msk [vmem:[#allocation3 + $0x68] sm:$0xf] %vm199_vm0, %v2931_v13  ;;  %v6654_v0 = vshll.u32 %v5887_v42, 16  ;;  %v6217_v43 = vcombine.low %v2998_v35, %v3011_v7  ;;  %v3526_v29 = vshll.u32 %v3473_v19, 16  ;;  %v3201_v55 = vsel %vm6010_vm5, %v5945_v34, %v3200_v26 }
 0x26a   : > { %v6210_v47 = vrot.slane %v6653_v56, 11  ;;  %v3214_v45 = vsel %vm6010_vm5, %v5947_v11, %v3213_v60  ;;  %v6655_v59 = vor.u32 %v6097_v28, %v6095_v15  ;;  %v3113_v36 = vor.u32 %v3112_v32, %v3111_v14  ;;  %v6230_v42 = vld [vmem:[#allocation3 + $0x9c] sm:$0x1] }
 0x26b   : > { %v6215_v23 = vor.u32 %v6654_v0, %v6112_v38  ;;  %v2746_v38 = vpop.permute.xlu1 %2745  ;;  %v6232_v12 = vor.u32 %v3399_v31, %v3398_v1  ;;  %v6234_v39 = vrot.slane %v3295_v3, 4  ;;  %v6236_v51 = vrot.slane %v3304_v25, 4 }
 0x26c   : > { %v3096_v22 = vrot.slane %v6655_v59, 4  ;;  %v3020_v34 = vrot.slane %v3018_v33, 7  ;;  %v3110_v11 = vsel %vm5984_vm10, %v3105_v58, %v5954_v24  ;;  %v6656_v15 = vshll.u32 %v6099_v46, 16 }
 0x26d   : > { %v6657_v60 = vshrl.u32 %v6091_v8, 16  ;;  %v6249_v53 = vrot.slane %v3052_v40, 11  ;;  %v6253_v3 = vrot.slane %v3526_v29, 5  ;;  %v3544_v37 = vshll.u32 %v6230_v42, 16  ;;  %v6665_v42 = vld [vmem:[#allocation14_spill] sm:$0xff] }
 0x26e   : > { %v6243_v28 = vrot.slane %v6656_v15, 5  ;;  %v6251_v31 = vor.u32 %v3021_v18, %v3020_v34  ;;  %v2828_v24 = vsel %vm2821_vm11, %v5804_v63, %v2746_v38  ;;  %v4409_v54 = vcombine.low %v3201_v55, %v3214_v45  ;;  %v6658_v55 = vld [vmem:[#allocation7_spill] sm:$0xff] }
 0x26f   : > { %v6247_v57 = vrot.slane %v6657_v60, 11  ;;  %v2778_v46 = vpop.permute.xlu0 %2777  ;;  %v3101_v8 = vsel %vm5984_vm10, %v3096_v22, %v5925_v49  ;;  %v6262_v61 = vrot.slane %v3113_v36, 4  ;;  %v3402_v26 = vsel %vm6010_vm5, %v5956_v62, %v6232_v12 }
 0x270   : > { %v3355_v21 = vld [vmem:[#allocation3 + $0x58] sm:$0xf]  ;;  %v4405_v9 = vcombine.low %v3101_v8, %v3110_v11  ;;  %v3301_v63 = vsel %vm5984_vm10, %v6234_v39, %v5962_v27  ;;  %v3310_v49 = vsel %vm5984_vm10, %v6236_v51, %v5964_v6  ;;  %v6280_v32 = vrot.slane %v3496_v10, 4  ;;  %v3158_v25 = vld [vmem:[#allocation3 + $0x68] sm:$0xf]  ;;  %v6664_v27 = vld [vmem:[#allocation11_spill] sm:$0xff] }
 0x271   : > { %v6264_v18 = vld [vmem:[#allocation3 + $0x58] sm:$0xf]  ;;  %v3409_v20 = vshrl.u32 %v3355_v21, 16  ;;  %v4425_v13 = vcombine.low %v6176_v50, %v3355_v21  ;;  %v2837_v58 = vsel %vm2830_vm12, %v2828_v24, %v2778_v46  ;;  %v3412_v56 = vshll.u32 %v3355_v21, 16  ;;  %v6289_v10 = vld [vmem:[#allocation3 + $0x68] sm:$0xf] }
 0x272   : > { %v3156_v16 = vld [vmem:[#allocation3 + $0x58] sm:$0xf]  ;;  %v3031_v14 = vshrl.u32 %v6264_v18, 16  ;;  %v3034_v19 = vshll.u32 %v6264_v18, 16  ;;  %v4402_v62 = vcombine.low %v6179_v5, %v6264_v18  ;;  %v3234_v38 = vshrl.u32 %v3158_v25, 16  ;;  %v6673_v39 = vld [vmem:[#allocation20_spill] sm:$0xff] }
 0x273   : > { %v3221_v1 = vshrl.u32 %v3156_v16, 16  ;;  %v3224_v40 = vshll.u32 %v3156_v16, 16  ;;  %v2810_v35 = vpop.permute.xlu1 %2809  ;;  %v3411_v7 = vrot.slane %v3409_v20, 7  ;;  %v6286_v0 = vrot.slane %v3409_v20, 4  ;;  %3718 = vrot.lane.b32.xlu0 %v4425_v13, %s4707_s30  ;;  %v2748_v50 = vpop.permute.xlu0 %2747  ;;  %v6300_v24 = vld [vmem:[#allocation3 + $0x68] sm:$0xf] }
 0x274   : > { %v2846_v29 = vsel %vm2839_vm4, %v2837_v58, %v2810_v35  ;;  %v2829_v5 = vsel %vm2821_vm11, %v6658_v55, %v2748_v50  ;;  %v3120_v45 = vrot.slane %v3031_v14, 4  ;;  %v3121_v59 = vrot.slane %v3034_v19, 5  ;;  %3584 = vrot.lane.b32.xlu1 %v4402_v62, %s4704_s12  ;;  %v6663_v6 = vld [vmem:[#allocation10_spill] sm:$0xff] }
 0x275   : > { %v2854_v22 = vmax.f32 %v2846_v29, 0.0  ;;  %v3223_v36 = vrot.slane %v3221_v1, 7  ;;  %v3237_v12 = vshll.u32 %v3158_v25, 16  ;;  %v3311_v34 = vrot.slane %v3221_v1, 4  ;;  %v6659_v1 = vld [vmem:[#allocation13_spill] sm:$0xff] }
 0x276   : > { %v3312_v11 = vrot.slane %v3224_v40, 5  ;;  %v3414_v15 = vor.u32 %v3412_v56, %v3411_v7  ;;  %v3044_v60 = vshrl.u32 %v6289_v10, 16  ;;  %v3236_v20 = vrot.slane %v3234_v38, 7 }
 0x277   : > { %v2932_v46 = vpack.c.bf16 %v2854_v22, %v2854_v22  ;;  %3622 = vrot.lane.b32.xlu0 %v4409_v54, %s4708_s5  ;;  %v2812_v8 = vpop.permute.xlu0 %2811  ;;  %v2780_v21 = vpop.permute.xlu1 %2779  ;;  %v3320_v13 = vrot.slane %v3234_v38, 4  ;;  %v4414_v58 = vcombine.low %v3156_v16, %v3158_v25  ;;  %v3321_v35 = vrot.slane %v3237_v12, 5 }
 0x278   : > { %3602 = vrot.lane.b32.xlu1 %v4405_v9, %s4705_s20  ;;  %v2838_v62 = vsel %vm2830_vm12, %v2829_v5, %v2780_v21  ;;  %v3415_v7 = vsel %vm6010_vm5, %v6659_v1, %v3414_v15  ;;  %v6611_v50 = vshll.u32 %v6289_v10, 16  ;;  %v3422_v55 = vshrl.u32 %v6300_v24, 16 }
 0x279   : > { %2940 = vst.msk [vmem:[#allocation3 + $0x78] sm:$0xf] %vm199_vm0, %v2932_v46  ;;  %v2847_v54 = vsel %vm2839_vm4, %v2838_v62, %v2812_v8  ;;  %v4421_v29 = vcombine.low %v3402_v26, %v3415_v7  ;;  %v3425_v16 = vshll.u32 %v6300_v24, 16  ;;  %v6313_v25 = vrot.slane %v3412_v56, 5  ;;  %v6667_v7 = vld [vmem:[#allocation17_spill] sm:$0xff] }
 0x27a   : > { %v2855_v9 = vmax.f32 %v2847_v54, 0.0  ;;  %v3129_v5 = vrot.slane %v3044_v60, 4  ;;  %v3122_v22 = vor.u32 %v3121_v59, %v3120_v45  ;;  %v3130_v38 = vrot.slane %v6611_v50, 5  ;;  %v6660_v59 = vld [vmem:[#allocation9_spill] sm:$0xff] }
 0x27b   : > { %3652 = vrot.lane.b32.xlu0 %v4414_v58, %s4706_s27  ;;  %v6320_v15 = vrot.slane %v3422_v55, 4  ;;  %v3226_v46 = vor.u32 %v3224_v40, %v3223_v36  ;;  %v3239_v26 = vor.u32 %v3237_v12, %v3236_v20  ;;  %v6323_v21 = vrot.slane %v3425_v16, 5  ;;  %v6661_v36 = vld [vmem:[#allocation8_spill] sm:$0xff] }
 0x27c   : > { %v2933_v8 = vpack.c.bf16 %v2855_v9, %v2855_v9  ;;  %3690 = vrot.lane.b32.xlu1 %v4421_v29, %s4710_s10  ;;  %v3123_v56 = vrot.slane %v3122_v22, 4  ;;  %v3313_v62 = vor.u32 %v3312_v11, %v3311_v34  ;;  %v4417_v45 = vcombine.low %v3301_v63, %v3310_v49  ;;  %v6666_v49 = vld [vmem:[#allocation15_spill] sm:$0xff] }
 0x27d   : > { %v3322_v40 = vor.u32 %v3321_v35, %v3320_v13  ;;  %v6662_v12 = vor.u32 %v6660_v59, %v6661_v36  ;;  %v6342_v34 = vrot.slane %v3544_v37, 5  ;;  %v3424_v11 = vrot.slane %v3422_v55, 7  ;;  %v6668_v55 = vld [vmem:[#allocation12_spill] sm:$0xff] }
 0x27e   : > { %2941 = vst.msk [vmem:[#allocation3 + $0x88] sm:$0xf] %vm199_vm0, %v2933_v8  ;;  %v3119_v51 = vsel %vm5984_vm10, %v6262_v61, %v6663_v6  ;;  %v3505_v63 = vor.u32 %v6313_v25, %v6286_v0  ;;  %v3227_v37 = vsel %vm6010_vm5, %v6665_v42, %v3226_v46  ;;  %v3240_v13 = vsel %vm6010_vm5, %v6666_v49, %v3239_v26  ;;  %v6670_v49 = vld [vmem:[#allocation19_spill] sm:$0xff] }
 0x27f   : > { %v6338_v20 = vrot.slane %v6662_v12, 4  ;;  %3670 = vrot.lane.b32.xlu0 %v4417_v45, %s4709_s8  ;;  %v3314_v58 = vrot.slane %v3313_v62, 4  ;;  %v3323_v61 = vrot.slane %v3322_v40, 4  ;;  %v3128_v54 = vsel %vm5984_vm10, %v3123_v56, %v6667_v7 }
 0x280   : > { %v6362_v35 = vld [vmem:[#allocation3 + $0x78] sm:$0xf]  ;;  %v3131_v29 = vor.u32 %v3130_v38, %v3129_v5  ;;  %v4410_v62 = vcombine.low %v3227_v37, %v3240_v13  ;;  %v3427_v5 = vor.u32 %v3425_v16, %v3424_v11  ;;  %v4406_v12 = vcombine.low %v3119_v51, %v3128_v54 }
 0x281   : > { %v3359_v1 = vld [vmem:[#allocation3 + $0x78] sm:$0xf]  ;;  %v4403_v22 = vcombine.low %v6289_v10, %v6362_v35  ;;  %v6610_v46 = vshrl.u32 %v6362_v35, 16  ;;  %v6609_v26 = vshll.u32 %v6362_v35, 16  ;;  %v3328_v13 = vsel %vm5984_vm10, %v3323_v61, %v6670_v49 }
 0x282   : > { %v6367_v0 = vld [vmem:[#allocation3 + $0x78] sm:$0xf]  ;;  %v3435_v8 = vshrl.u32 %v3359_v1, 16  ;;  %v4426_v56 = vcombine.low %v6300_v24, %v3359_v1  ;;  %v3438_v36 = vshll.u32 %v3359_v1, 16  ;;  %v3132_v42 = vrot.slane %v3131_v29, 4  ;;  %v6671_v29 = vld [vmem:[#allocation16_spill] sm:$0xff] }
 0x283   : > { %v3247_v38 = vshrl.u32 %v6367_v0, 16  ;;  %3586 = vrot.lane.b32.xlu0 %v4403_v22, %s4704_s12  ;;  %v3138_v45 = vrot.slane %v6610_v46, 4  ;;  %v3139_v40 = vrot.slane %v6609_v26, 5  ;;  %v3250_v24 = vshll.u32 %v6367_v0, 16  ;;  %v6669_v11 = vld [vmem:[#allocation18_spill] sm:$0xff]  ;;  %v6672_v26 = vld [vmem:[#allocation24_spill] sm:$0xff] }
 0x284   : > { %v3437_v59 = vrot.slane %v3435_v8, 7  ;;  %3720 = vrot.lane.b32.xlu1 %v4426_v56, %s4707_s30  ;;  %v3319_v37 = vsel %vm5984_vm10, %v3314_v58, %v6669_v11  ;;  %v3547_v44 = vsel %vm5984_vm10, %v6338_v20, %v6342_v34  ;;  %s188_s12 = sand.u32 1, %s4693_s16  }
 0x285   : > { %v3249_v6 = vrot.slane %v3247_v38, 7  ;;  %v3162_v7 = vld [vmem:[#allocation3 + $0x88] sm:$0xf]  ;;  %v3329_v22 = vrot.slane %v3247_v38, 4  ;;  %v3330_v1 = vrot.slane %v3250_v24, 5  ;;  %v3140_v54 = vor.u32 %v3139_v40, %v3138_v45  ;;  %s6555_s9 = scalar_lea.sflag [#allocation5], %s188_s12 }
 0x286   : > { %v3440_v16 = vor.u32 %v3438_v36, %v3437_v59  ;;  %v6394_v33 = vld [vmem:[#allocation3 + $0x88] sm:$0xf]  ;;  %v3260_v56 = vshrl.u32 %v3162_v7, 16  ;;  %v3263_v51 = vshll.u32 %v3162_v7, 16  ;;  %v3428_v59 = vsel %vm6010_vm5, %v6671_v29, %v3427_v5 }
 0x287   : > { %3604 = vrot.lane.b32.xlu0 %v4406_v12, %s4705_s20  ;;  %v3252_v11 = vor.u32 %v3250_v24, %v3249_v6  ;;  %v3448_v61 = vshrl.u32 %v6394_v33, 16  ;;  %v3521_v45 = vrot.slane %v3435_v8, 4  ;;  %v3522_v40 = vrot.slane %v3438_v36, 5 }
 0x288   : > { %v3441_v58 = vsel %vm6010_vm5, %v6672_v26, %v3440_v16  ;;  %3624 = vrot.lane.b32.xlu1 %v4410_v62, %s4708_s5  ;;  %v3262_v49 = vrot.slane %v3260_v56, 7  ;;  %v3338_v9 = vrot.slane %v3260_v56, 4  ;;  %v3339_v25 = vrot.slane %v3263_v51, 5 }
 0x289   : > { %v4422_v38 = vcombine.low %v3428_v59, %v3441_v58  ;;  %v4418_v12 = vcombine.low %v3319_v37, %v3328_v13  ;;  %v3331_v46 = vor.u32 %v3330_v1, %v3329_v22  ;;  %v3137_v5 = vsel %vm5984_vm10, %v3132_v42, %v6673_v39 }
 0x28a   : > { %v3265_v50 = vor.u32 %v3263_v51, %v3262_v49  ;;  %v3141_v29 = vrot.slane %v3140_v54, 4  ;;  %v3340_v26 = vor.u32 %v3339_v25, %v3338_v9  ;;  %v3253_v62 = vsel %vm6010_vm5, %v6077_v4, %v3252_v11  ;;  %v6674_v4 = vld [vmem:[#allocation21_spill] sm:$0xff] }
 0x28b   : > { %3692 = vrot.lane.b32.xlu0 %v4422_v38, %s4710_s10  ;;  %v3450_v6 = vrot.slane %v3448_v61, 7  ;;  %v3506_v24 = vrot.slane %v3505_v63, 4  ;;  %v3033_v8 = vrot.slane %v3031_v14, 7  ;;  %v3332_v39 = vrot.slane %v3331_v46, 4 }
 0x28c   : > { %3672 = vrot.lane.b32.xlu1 %v4418_v12, %s4709_s8  ;;  %v3266_v36 = vsel %vm6010_vm5, %v6114_v41, %v3265_v50  ;;  %v3341_v42 = vrot.slane %v3340_v26, 4  ;;  %v3046_v25 = vrot.slane %v3044_v60, 7  ;;  %v3451_v16 = vshll.u32 %v6394_v33, 16 }
 0x28d   : > { %v4411_v9 = vcombine.low %v3253_v62, %v3266_v36  ;;  %v3511_v63 = vsel %vm5984_vm10, %v3506_v24, %v6674_v4  ;;  %v3036_v14 = vor.u32 %v3034_v19, %v3033_v8  ;;  %v4415_v37 = vcombine.low %v6367_v0, %v3162_v7  ;;  %v6677_v0 = vld [vmem:[#allocation22_spill] sm:$0xff] }
 0x28e   : > { %v3346_v41 = vsel %vm5984_vm10, %v3341_v42, %v6243_v28  ;;  %v6675_v60 = vsel %vm5984_vm10, %v6280_v32, %v6664_v27  ;;  %v6676_v46 = vshll.u32 %v6289_v10, 16  ;;  %v3146_v18 = vsel %vm5984_vm10, %v3141_v29, %v6087_v48 }
 0x28f   : > { %v4429_v50 = vcombine.low %v6675_v60, %v3511_v63  ;;  %3626 = vrot.lane.b32.xlu0 %v4411_v9, %s4708_s5  ;;  %v3453_v19 = vor.u32 %v3451_v16, %v3450_v6  ;;  %v3037_v28 = vsel %vm6010_vm5, %v6677_v0, %v3036_v14  ;;  %v6678_v7 = vshrl.u32 %v6362_v35, 16 }
 0x290   : > { %v3049_v13 = vor.u32 %v6676_v46, %v3046_v25  ;;  %3654 = vrot.lane.b32.xlu1 %v4415_v37, %s4706_s27  ;;  %v3337_v32 = vsel %vm5984_vm10, %v3332_v39, %v6104_v52  ;;  %v6679_v10 = vsel %vm6010_vm5, %v6668_v55, %v6251_v31  ;;  %v6680_v27 = vor.u32 %v6323_v21, %v6320_v15  ;;  %v6683_v21 = vld [vmem:[#allocation23_spill] sm:$0xff] }
 0x291   : > { %v3059_v22 = vrot.slane %v6678_v7, 7  ;;  %v6455_v48 = vcombine.low %v6679_v10, %v3037_v28  ;;  %v3523_v56 = vor.u32 %v3522_v40, %v3521_v45  ;;  %v4419_v51 = vcombine.low %v3337_v32, %v3346_v41  ;;  %v4640_v40 = vld [vmem:[#allocation3 + $0x98] sm:$0xf] }
 0x292   : > { %v3515_v1 = vrot.slane %v6680_v27, 4  ;;  %v6681_v54 = vshll.u32 %v6362_v35, 16  ;;  %v3530_v58 = vrot.slane %v3448_v61, 4  ;;  %v3531_v11 = vrot.slane %v3451_v16, 5 }
 0x293   : > { %v4407_v38 = vcombine.low %v3137_v5, %v3146_v18  ;;  %v3467_v52 = vsel %vm6010_vm5, %v6247_v57, %v6215_v23  ;;  %v3524_v31 = vrot.slane %v3523_v56, 4  ;;  %v6682_v55 = vshll.u32 %v6228_v2, 16  ;;  %3674 = vrot.lane.b32.xlu0 %v4419_v51, %s4709_s8  ;;  %v6684_v2 = vld [vmem:[#allocation25_spill] sm:$0xff] }
 0x294   : > { %v3062_v59 = vor.u32 %v6681_v54, %v3059_v22  ;;  %v3454_v15 = vsel %vm6010_vm5, %v6210_v47, %v3453_v19  ;;  %v3050_v35 = vsel %vm6010_vm5, %v6683_v21, %v3049_v13  ;;  %v3532_v45 = vor.u32 %v3531_v11, %v3530_v58 }
 0x295   : > { %v3537_v49 = vrot.slane %v6682_v55, 5  ;;  %3606 = vrot.lane.b32.xlu1 %v4407_v38, %s4705_s20  ;;  %v3520_v57 = vsel %vm5984_vm10, %v3515_v1, %v6684_v2  ;;  %v3529_v47 = vsel %vm5984_vm10, %v3524_v31, %v6253_v3  ;;  %v4427_v12 = vcombine.low %v6394_v33, %v4640_v40  ;;  %s4045_s20 = sshll.u32 %s188_s12, 6 }
 0x296   : > { %v3063_v61 = vsel %vm6010_vm5, %v6249_v53, %v3062_v59  ;;  %v4430_v5 = vcombine.low %v3520_v57, %v3529_v47  ;;  %v3533_v29 = vrot.slane %v3532_v45, 4  ;;  %v4423_v53 = vcombine.low %v3454_v15, %v3467_v52  ;;  %s6534_s27 = scalar_lea.vmem [#allocation4], %s4045_s20 }
 0x297   : > { %v6479_v23 = vcombine.low %v3050_v35, %v3063_v61  ;;  %3722 = vrot.lane.b32.xlu0 %v4427_v12, %s4707_s30  ;;  %s4451_s30 = sshll.u32 %s4762_s19, 10  ;;  %s3979_s5 = sshll.u32 %s6534_s27, 4  ;;  %s6550_s5 = int_to_ptr.vmem [resolvable:$true] %s3979_s5 }
 0x298   : > { %v3538_v26 = vsel %vm5984_vm10, %v3533_v29, %v3537_v49  ;;  %s6548_s28 = scalar_lea.hbm %s6600_s4, %s4451_s30  ;;  %s4641_s19 = scalar_lea.vmem %s6550_s5, 1024 }
 0x299   : > { %3694 = vrot.lane.b32.xlu1 %v4423_v53, %s4710_s10  ;;  %v4431_v62 = vcombine.low %v3538_v26, %v3547_v44  ;;  %p4642_p11 = scmp.ne.s32.totalorder %s6550_s5, %s4641_s19  ;;  %p4648_p0 = scmp.lt.s32.totalorder %s6550_s5, %s4646_s6 }
 0x29a   : > { %p4649_p1 = scmp.lt.s32.totalorder %s4647_s7, %s4641_s19 }
 0x29b   : > { %p4643_p12 = pnand %p4642_p11, %p4779_p5 }
 0x29c   : > { %p4650_p2 = por %p4649_p1, %p4648_p0 }
 0x29d   : > { %p4644_p13 = pneg %p4643_p12 }
 0x29f   : > { %p4651_p3 = pnand %p4650_p2, %p4644_p13 }
 0x2b5   : > { %v3649_v3 = vpop.permute.xlu0 %3648 }
 0x2b6   : > { %v3581_v6 = vpop.permute.xlu1 %3580 }
 0x2b7   : > { %v3738_v39 = vsel %vm306_vm8, %v6084_v30, %v3581_v6 }
 0x2cd   : > { %v3583_v24 = vpop.permute.xlu0 %3582 }
 0x2ce   : > { %v3717_v33 = vpop.permute.xlu1 %3716  ;;  %v3741_v41 = vsel %vm306_vm8, %v6217_v43, %v3583_v24 }
 0x2d1   : > { %v3601_v8 = vpop.permute.xlu0 %3600 }
 0x2d2   : > { %v3621_v36 = vpop.permute.xlu1 %3620  ;;  %v3749_v20 = vsel %vm972_vm13, %v3738_v39, %v3601_v8 }
 0x2d3   : > { %v3757_v42 = vsel %vm981_vm14, %v3749_v20, %v3621_v36 }
 0x2d4   : > { %v3765_v17 = vsel %vm990_vm15, %v3757_v42, %v3649_v3 }
 0x2d5   : > { %v3689_v9 = vpop.permute.xlu0 %3688 }
 0x2d6   : > { %v3651_v34 = vpop.permute.xlu1 %3650 }
 0x2da   : > { %v3669_v25 = vpop.permute.xlu1 %3668 }
 0x2db   : > { %v3773_v16 = vsel %vm999_vm1, %v3765_v17, %v3669_v25 }
 0x2dc   : > { %v3781_v4 = vsel %vm1008_vm2, %v3773_v16, %v3689_v9 }
 0x2dd   : > { %v3789_v63 = vsel %vm1017_vm3, %v3781_v4, %v3717_v33 }
 0x2de   : > { %3917 = vmatmul.mubr.bf16.vlgmr.msra.gmra.mxu0 %v3789_v63 }
 0x2df   : > { %4442 = vmatprep.mubr.msk.bf16.mxu0 %vm306_vm8, %v4429_v50 }
 0x2e5   : > { %v3719_v14 = vpop.permute.xlu0 %3718 }
 0x2e6   : > { %v3585_v30 = vpop.permute.xlu1 %3584 }
 0x2e7   : > { %v3744_v43 = vsel %vm306_vm8, %v6455_v48, %v3585_v30 }
 0x2e9   : > { %v3623_v37 = vpop.permute.xlu0 %3622 }
 0x2ea   : > { %v3603_v60 = vpop.permute.xlu1 %3602 }
 0x2eb   : > { %v3751_v46 = vsel %vm972_vm13, %v3741_v41, %v3603_v60 }
 0x2ec   : > { %v3759_v18 = vsel %vm981_vm14, %v3751_v46, %v3623_v37 }
 0x2ed   : > { %v3653_v13 = vpop.permute.xlu0 %3652  ;;  %v3767_v0 = vsel %vm990_vm15, %v3759_v18, %v3651_v34 }
 0x2ee   : > { %v3691_v28 = vpop.permute.xlu1 %3690 }
 0x2f1   : > { %v3671_v19 = vpop.permute.xlu0 %3670 }
 0x2f2   : > { %v3775_v7 = vsel %vm999_vm1, %v3767_v0, %v3671_v19 }
 0x2f3   : > { %v3783_v50 = vsel %vm1008_vm2, %v3775_v7, %v3691_v28 }
 0x2f4   : > { %v3792_v22 = vsel %vm1017_vm3, %v3783_v50, %v3719_v14 }
 0x2f5   : > { %v3587_v32 = vpop.permute.xlu0 %3586  ;;  %3925 = vmatmul.mubr.bf16.gmra.mxu0 %v3792_v22 }
 0x2f6   : > { %v3721_v10 = vpop.permute.xlu1 %3720  ;;  %4443 = vmatprep.mubr.msk.bf16.mxu0 %vm306_vm8, %v4430_v5  ;;  %v3747_v49 = vsel %vm306_vm8, %v6479_v23, %v3587_v32 }
 0x2f9   : > { %v3605_v27 = vpop.permute.xlu0 %3604 }
 0x2fa   : > { %v3753_v1 = vsel %vm972_vm13, %v3744_v43, %v3605_v27  ;;  %v3625_v56 = vpop.permute.xlu1 %3624 }
 0x2fb   : > { %v3761_v51 = vsel %vm981_vm14, %v3753_v1, %v3625_v56 }
 0x2fc   : > { %v3769_v54 = vsel %vm990_vm15, %v3761_v51, %v3653_v13 }
 0x2fd   : > { %v3693_v59 = vpop.permute.xlu0 %3692 }
 0x2fe   : > { %v3673_v58 = vpop.permute.xlu1 %3672 }
 0x2ff   : > { %v3777_v11 = vsel %vm999_vm1, %v3769_v54, %v3673_v58 }
 0x300   : > { %v3785_v38 = vsel %vm1008_vm2, %v3777_v11, %v3693_v59 }
 0x301   : > { %v3627_v52 = vpop.permute.xlu0 %3626  ;;  %v3795_v31 = vsel %vm1017_vm3, %v3785_v38, %v3721_v10 }
 0x302   : > { %3933 = vmatmul.mubr.bf16.gmra.mxu0 %v3795_v31  ;;  %v3655_v48 = vpop.permute.xlu1 %3654 }
 0x303   : > { %4444 = vmatprep.mubr.msk.bf16.mxu0 %vm306_vm8, %v4431_v62 }
 0x305   : > { %v3675_v55 = vpop.permute.xlu0 %3674 }
 0x307   : > { %v3607_v15 = vpop.permute.xlu1 %3606 }
 0x308   : > { %v3755_v21 = vsel %vm972_vm13, %v3747_v49, %v3607_v15 }
 0x309   : > { %v3763_v35 = vsel %vm981_vm14, %v3755_v21, %v3627_v52  ;;  %v3723_v61 = vpop.permute.xlu0 %3722 }
 0x30a   : > { %v3771_v45 = vsel %vm990_vm15, %v3763_v35, %v3655_v48 }
 0x30b   : > { %v3779_v2 = vsel %vm999_vm1, %v3771_v45, %v3675_v55  ;;  %v3695_v57 = vpop.permute.xlu1 %3694 }
 0x30c   : > { %v3787_v47 = vsel %vm1008_vm2, %v3779_v2, %v3695_v57 }
 0x30d   : > { %v3798_v40 = vsel %vm1017_vm3, %v3787_v47, %v3723_v61 }
 0x30e   : > { %3941 = vmatmul.mubr.bf16.gmra.mxu0 %v3798_v40 }
 0x39e   : > { %v3918_v23 = vpop.f32.mrf.mxu0 }
 0x39f   : > { %v3949_v12 = vmax.f32 %v3918_v23, 0.0 }
 0x3a0   : > { %v3920_v5 = vpop.f32.mrf.mxu0 }
 0x3a1   : > { %3957 = vst [vmem:[%s6534_s27] sm:$0xff] %v3949_v12 }
 0x3a2   : > { %v3921_v29 = vpop.f32.mrf.mxu0 }
 0x3a3   : > { %v3950_v44 = vmax.f32 %v3921_v29, 0.0 }
 0x3a4   : > { %v3923_v53 = vpop.f32.mrf.mxu0 }
 0x3a5   : > { %3958 = vst [vmem:[%s6534_s27 + $0x8] sm:$0xff] %v3950_v44 }
 0x3b5   : > { %v3926_v26 = vpop.f32.mrf.mxu0 }
 0x3b6   : > { %v3951_v62 = vmax.f32 %v3926_v26, 0.0 }
 0x3b7   : > { %v3928_v3 = vpop.f32.mrf.mxu0 }
 0x3b8   : > { %3959 = vst [vmem:[%s6534_s27 + $0x10] sm:$0xff] %v3951_v62 }
 0x3b9   : > { %v3929_v6 = vpop.f32.mrf.mxu0 }
 0x3ba   : > { %v3952_v24 = vmax.f32 %v3929_v6, 0.0 }
 0x3bb   : > { %v3931_v33 = vpop.f32.mrf.mxu0 }
 0x3bc   : > { %3960 = vst [vmem:[%s6534_s27 + $0x18] sm:$0xff] %v3952_v24 }
 0x3c2   : > { %v3934_v8 = vpop.f32.mrf.mxu0 }
 0x3c3   : > { %v3953_v36 = vmax.f32 %v3934_v8, 0.0 }
 0x3c4   : > { %v3936_v39 = vpop.f32.mrf.mxu0 }
 0x3c5   : > { %3961 = vst [vmem:[%s6534_s27 + $0x20] sm:$0xff] %v3953_v36 }
 0x3c6   : > { %v3937_v20 = vpop.f32.mrf.mxu0 }
 0x3c7   : > { %v3954_v34 = vmax.f32 %v3937_v20, 0.0 }
 0x3c8   : > { %v3939_v42 = vpop.f32.mrf.mxu0 }
 0x3c9   : > { %3962 = vst [vmem:[%s6534_s27 + $0x28] sm:$0xff] %v3954_v34 }
 0x3ce   : > { %v3942_v17 = vpop.f32.mrf.mxu0 }
 0x3cf   : > { %v3955_v25 = vmax.f32 %v3942_v17, 0.0 }
 0x3d0   : > { %v3944_v9 = vpop.f32.mrf.mxu0 }
 0x3d1   : > { %3963 = vst [vmem:[%s6534_s27 + $0x30] sm:$0xff] %v3955_v25 }
 0x3d2   : > { %v3945_v16 = vpop.f32.mrf.mxu0 }
 0x3d3   : > { %v3956_v4 = vmax.f32 %v3945_v16, 0.0 }
 0x3d4   : > { %v3947_v63 = vpop.f32.mrf.mxu0 }
 0x3d5   : > { %3964 = vst [vmem:[%s6534_s27 + $0x38] sm:$0xff] %v3956_v4 }
 0x3d6   : > { %4654 = shalt.err (!%p4651_p3)
}
 0x3d7   : > { %s4655_s11 = scalar_lea.hbm %s6548_s28, 1024  ;;  %s4659_s23 = scalar_lea.hbm %s6600_s4, 4096 }
 0x3d8   : > { %p4656_p4 = scmp.ne.s32.totalorder %s6548_s28, %s4655_s11  ;;  %p4660_p9 = scmp.lt.s32.totalorder %s6548_s28, %s6600_s4 }
 0x3d9   : > { %p4661_p10 = scmp.lt.s32.totalorder %s4659_s23, %s4655_s11 }
 0x3da   : > { %p4657_p7 = pnand %p4656_p4, %p4779_p5 }
 0x3db   : > { %p4662_p11 = por %p4661_p10, %p4660_p9 }
 0x3dc   : > { %p4658_p8 = pneg %p4657_p7 }
 0x3de   : > { %p4663_p12 = pnand %p4662_p11, %p4658_p8 }
 0x3e0   : > { %4666 = shalt.err (!%p4663_p12)
}
 0x3e1   : > { %s4715_s27 = smov 128  }
 0x3e2   : > { %4467 = dma.vmem_to_hbm [thread:$0]  (%p4779_p5), %s6550_s5, 1024, %s6548_s28, %s6555_s9, %s4715_s27, %s4715_s27, %s4712_s22  }
 0x3e3 PF: > { %p4473_p13 = scmp.ge.s32.totalorder %s4701_s18, 2  ;;  %s3994_s30 = sand.u32 1, %s4689_s15  }
 0x3e4   : > { %s3995_s8 = scalar_lea.sflag [#allocation5], %s3994_s30 }
 0x3e5   : > { %p4470_p0 = pnand %p4473_p13, %p4783_p6 }
 0x3e7   : > { %p4471_p1 = pneg %p4470_p0 }
 0x3e9   : > { %4684 = dma.done.wait (%p4471_p1), %s3995_s8, 1024  }
 0x3ea   : > { %4686 = vsyncadd (%p4471_p1), %s3995_s8, 4294966272  ;;  %p14_p2 = scmp.ge.s32.totalorder %s4766_s21, 6   ;;  %s6685_s15 = smov %s4693_s16 }
 0x3eb   : > { %s6686_s16 = smov %s4697_s17  ;;  %s6687_s17 = smov %s4777_s24 }
 0x3ec   : > { %s6688_s18 = smov %s4766_s21  ;;  %16 = sbr.rel (!%p14_p2) target bundleno = 3 (0x3), region = 83 }
 0x3f1   :  { %4000 = vsyncpa [#allocation5], 1 }
 0x3f2   :  { %4002 = vsyncpa [#allocation5 + $0x1], 1 }

</bundles_post_ra>
